<compile_context>
chip_gen: v6e
topology: v6e:2x2x1
jax: 0.10.0
libtpu: 0.0.40
codegen_flags: <defaults>
</compile_context>

<pallas_src>
import jax
import jax.numpy as jnp
from jax.experimental import pallas as pl
from jax.experimental.pallas import tpu as pltpu

# ----------------------------- configuration ---------------------------------
NUM_NODES = 4
SEQ_LEN = 16          # d_model of each per-node transformer
NUM_FEATURES = 1      # must be 1 for the PyTorch fc shapes to be consistent
NUM_OUT = 8
N_HEADS = 2
NUM_LAYERS = 2
BATCH = 8
HEAD_DIM = SEQ_LEN // N_HEADS
LN_EPS = 1e-5
ATTN_SCALE = 1.0 / (HEAD_DIM ** 0.5)
_N_VEC = 7            # per-layer vector pack: [opb, l1b, l2b, ln1w, ln1b, ln2w, ln2b]


# ------------------------------- kernel --------------------------------------
def _layer_norm(x, w, b):
    mu = jnp.mean(x, axis=-1, keepdims=True)
    var = jnp.mean((x - mu) ** 2, axis=-1, keepdims=True)
    return (x - mu) * jax.lax.rsqrt(var + LN_EPS) * w + b


def _softmax(x):
    m = jnp.max(x, axis=-1, keepdims=True)
    e = jnp.exp(x - m)
    return e / jnp.sum(e, axis=-1, keepdims=True)


def temporal_transformer_kernel(
    x_ref,      # (N, B, S)           all nodes' token matrices
    qkvw_ref,   # (L*3*H, N, S, D)    per-head Q/K/V projection weights (in, out)
    qkvb_ref,   # (L*3*H, N, 1, D)    per-head Q/K/V biases
    ow_ref,     # (L*H,   N, D, S)    per-head rows of attn out_proj weight (in, out)
    ffnw_ref,   # (L*2,   N, S, S)    ffn linear1 / linear2 weights (in, out)
    vec_ref,    # (L*7,   N, 1, S)    [opb, l1b, l2b, ln1w, ln1b, ln2w, ln2b] per layer
    fcw_ref,    # (N, S, O)           shared fc weight, broadcast over nodes
    fcb_ref,    # (1, 1, O)           shared fc bias
    o_ref,      # (N, B, O)
):
    h = x_ref[...].astype(jnp.float32)               # (N, B, S)

    # TODO(synk): dropout layers are modeled as identity (inference semantics).
    for layer in range(NUM_LAYERS):
        # ---- multi-head self attention (post-LN). Heads are unrolled with per-head
        #      pre-split weights; the head outputs are folded into the out-projection
        #      by accumulation, so no lane slicing / concatenation occurs in-kernel. ----
        attn_out = vec_ref[layer * _N_VEC + 0]        # out_proj bias (N,1,S), broadcasts
        for hh in range(N_HEADS):
            qi = (layer * 3 + 0) * N_HEADS + hh
            ki = (layer * 3 + 1) * N_HEADS + hh
            vi = (layer * 3 + 2) * N_HEADS + hh
            q = jnp.einsum('nbs,nsd->nbd', h, qkvw_ref[qi],
                           preferred_element_type=jnp.float32) + qkvb_ref[qi]
            k = jnp.einsum('nbs,nsd->nbd', h, qkvw_ref[ki],
                           preferred_element_type=jnp.float32) + qkvb_ref[ki]
            v = jnp.einsum('nbs,nsd->nbd', h, qkvw_ref[vi],
                           preferred_element_type=jnp.float32) + qkvb_ref[vi]
            s = jnp.einsum('nbd,ncd->nbc', q, k,
                           preferred_element_type=jnp.float32) * ATTN_SCALE   # (N,B,B)
            p = _softmax(s)
            ctx = jnp.einsum('nbc,ncd->nbd', p, v, preferred_element_type=jnp.float32)
            attn_out = attn_out + jnp.einsum(
                'nbd,nds->nbs', ctx, ow_ref[layer * N_HEADS + hh],
                preferred_element_type=jnp.float32)

        h = _layer_norm(h + attn_out,
                        vec_ref[layer * _N_VEC + 3], vec_ref[layer * _N_VEC + 4])

        # ---- feed-forward ----
        ff = jnp.einsum('nbs,nst->nbt', h, ffnw_ref[layer * 2 + 0],
                        preferred_element_type=jnp.float32) + vec_ref[layer * _N_VEC + 1]
        ff = jnp.maximum(ff, 0.0)
        ff = jnp.einsum('nbt,nts->nbs', ff, ffnw_ref[layer * 2 + 1],
                        preferred_element_type=jnp.float32) + vec_ref[layer * _N_VEC + 2]
        h = _layer_norm(h + ff,
                        vec_ref[layer * _N_VEC + 5], vec_ref[layer * _N_VEC + 6])

    # ---- shared output projection fc(seq_len -> num_out), one store of the whole result ----
    out = jnp.einsum('nbs,nso->nbo', h, fcw_ref[...],
                     preferred_element_type=jnp.float32) + fcb_ref[...]
    o_ref[...] = out.astype(o_ref.dtype)


# ------------------------- parameter prep (outside kernel) --------------------
def pack_params(p):
    """Pack natural (PyTorch-layout) stacked params into 7 kernel operands."""
    N, L, S, H, D, O = NUM_NODES, NUM_LAYERS, SEQ_LEN, N_HEADS, HEAD_DIM, NUM_OUT

    # in_proj weight (N,L,3S,S) [out,in] -> per-head (S,D) column blocks of W^T.
    ipw_t = jnp.swapaxes(p["in_proj_w"], -1, -2)                    # (N,L,S,3S)
    qkv_w = ipw_t.reshape(N, L, S, 3, H, D)
    qkv_w = jnp.transpose(qkv_w, (1, 3, 4, 0, 2, 5)).reshape(L * 3 * H, N, S, D)

    qkv_b = p["in_proj_b"].reshape(N, L, 3, H, D)
    qkv_b = jnp.transpose(qkv_b, (1, 2, 3, 0, 4)).reshape(L * 3 * H, N, 1, D)

    # attn out_proj weight (N,L,S,S) [out,in] -> per-head (D,S) row blocks of W^T.
    opw_t = jnp.swapaxes(p["out_proj_w"], -1, -2)                   # (N,L,S_in,S_out)
    out_w = opw_t.reshape(N, L, H, D, S)
    out_w = jnp.transpose(out_w, (1, 2, 0, 3, 4)).reshape(L * H, N, D, S)

    l1w_t = jnp.swapaxes(p["linear1_w"], -1, -2)
    l2w_t = jnp.swapaxes(p["linear2_w"], -1, -2)
    ffn_w = jnp.stack([l1w_t, l2w_t], axis=2)                       # (N,L,2,S,S)
    ffn_w = jnp.transpose(ffn_w, (1, 2, 0, 3, 4)).reshape(L * 2, N, S, S)

    vecs = jnp.stack([p["out_proj_b"], p["linear1_b"], p["linear2_b"],
                      p["ln1_w"], p["ln1_b"], p["ln2_w"], p["ln2_b"]], axis=2)  # (N,L,7,S)
    vecs = jnp.transpose(vecs, (1, 2, 0, 3)).reshape(L * _N_VEC, N, 1, S)

    fc_w = jnp.broadcast_to(p["fc_w"].T, (N, S, O))                 # shared, node-broadcast
    fc_b = p["fc_b"].reshape(1, 1, O)
    return qkv_w, qkv_b, out_w, ffn_w, vecs, fc_w, fc_b


# ------------------------------ wrapper ---------------------------------------
@jax.jit
def _forward_jit(x, params):
    B, N, S = x.shape
    # x.permute(0,2,1)[:, :, n] == x[:, n, :]; stack nodes on the leading axis.
    x_nbs = jnp.transpose(x, (1, 0, 2))                              # (N, B, S)
    packed = pack_params(params)

    vmem = pl.BlockSpec(memory_space=pltpu.MemorySpace.VMEM)         # whole array in VMEM
    out_nbo = pl.pallas_call(
        temporal_transformer_kernel,
        out_shape=jax.ShapeDtypeStruct((N, B, NUM_OUT), jnp.float32),
        in_specs=[vmem] * (1 + len(packed)),
        out_specs=vmem,
    )(x_nbs, *packed)                                                # (N, B, NUM_OUT)

    # PyTorch: torch.cat(per-node results, dim=0) -> (N*B, out); then .view(B, N, out).
    # This index scramble is intentional (it is what the original forward computes).
    return out_nbo.reshape(N * B, NUM_OUT).reshape(B, N, NUM_OUT)


def temporal_transformer_forward(x, params):
    """x: (batch, num_nodes, seq_len) float32 -> (batch, num_nodes, num_out)."""
    B, N, S = x.shape
    assert (N, S) == (NUM_NODES, SEQ_LEN)
    return _forward_jit(x, params)


# --------------------------- parameter init -----------------------------------
def init_params(key):
    N, L, S, O = NUM_NODES, NUM_LAYERS, SEQ_LEN, NUM_OUT
    keys = jax.random.split(key, 10)

    def nrm(k, shape, scale=0.1):
        return (scale * jax.random.normal(k, shape)).astype(jnp.float32)

    return {
        "in_proj_w":  nrm(keys[0], (N, L, 3 * S, S)),   # PyTorch layout (out, in)
        "in_proj_b":  nrm(keys[1], (N, L, 3 * S)),
        "out_proj_w": nrm(keys[2], (N, L, S, S)),
        "out_proj_b": nrm(keys[3], (N, L, S)),
        "linear1_w":  nrm(keys[4], (N, L, S, S)),
        "linear1_b":  nrm(keys[5], (N, L, S)),
        "linear2_w":  nrm(keys[6], (N, L, S, S)),
        "linear2_b":  nrm(keys[7], (N, L, S)),
        "ln1_w": jnp.ones((N, L, S), jnp.float32),
        "ln1_b": jnp.zeros((N, L, S), jnp.float32),
        "ln2_w": jnp.ones((N, L, S), jnp.float32),
        "ln2_b": jnp.zeros((N, L, S), jnp.float32),
        "fc_w": nrm(keys[8], (O, S)),                    # requires NUM_FEATURES == 1
        "fc_b": nrm(keys[9], (O,)),
    }


# --------------------------------- main ---------------------------------------
if __name__ == "__main__":
    key = jax.random.PRNGKey(0)
    kx, kp = jax.random.split(key)

    x = jax.random.normal(kx, (BATCH, NUM_NODES, SEQ_LEN), dtype=jnp.float32)
    params = init_params(kp)

    out = temporal_transformer_forward(x, params)
    out = jax.block_until_ready(out)

    assert out.shape == (BATCH, NUM_NODES, NUM_OUT), out.shape
    assert out.dtype == jnp.float32
    print("KERNEL_OK")
</pallas_src>

<mosaic_0001>
module attributes {stable_mosaic.version = 11 : i64} {
  func.func @temporal_transformer_kernel(%arg0: memref<4x8x16xf32, #tpu.memory_space<vmem>>, %arg1: memref<12x4x16x8xf32, #tpu.memory_space<vmem>>, %arg2: memref<12x4x1x8xf32, #tpu.memory_space<vmem>>, %arg3: memref<4x4x8x16xf32, #tpu.memory_space<vmem>>, %arg4: memref<4x4x16x16xf32, #tpu.memory_space<vmem>>, %arg5: memref<14x4x1x16xf32, #tpu.memory_space<vmem>>, %arg6: memref<4x16x8xf32, #tpu.memory_space<vmem>>, %arg7: memref<1x1x8xf32, #tpu.memory_space<vmem>>, %arg8: memref<4x8x8xf32, #tpu.memory_space<vmem>>) attributes {dimension_semantics = [], scalar_prefetch = 0 : i64, scratch_operands = 0 : i64, tpu.core_type = #tpu.core_type<tc>} {
    %c0 = arith.constant 0 : index
    %c0_0 = arith.constant 0 : index
    %c0_1 = arith.constant 0 : index
    %0 = vector.load %arg0[%c0, %c0_0, %c0_1] : memref<4x8x16xf32, #tpu.memory_space<vmem>>, vector<4x8x16xf32>
    %c0_2 = arith.constant 0 : index
    %c0_3 = arith.constant 0 : index
    %c0_4 = arith.constant 0 : index
    %c0_5 = arith.constant 0 : index
    %1 = vector.load %arg5[%c0_2, %c0_3, %c0_4, %c0_5] : memref<14x4x1x16xf32, #tpu.memory_space<vmem>>, vector<1x4x1x16xf32>
    %2 = vector.shape_cast %1 : vector<1x4x1x16xf32> to vector<4x1x16xf32>
    %c0_6 = arith.constant 0 : index
    %c0_7 = arith.constant 0 : index
    %c0_8 = arith.constant 0 : index
    %c0_9 = arith.constant 0 : index
    %3 = vector.load %arg1[%c0_6, %c0_7, %c0_8, %c0_9] : memref<12x4x16x8xf32, #tpu.memory_space<vmem>>, vector<1x4x16x8xf32>
    %4 = vector.shape_cast %3 : vector<1x4x16x8xf32> to vector<4x16x8xf32>
    "tpu.trace_start"() <{level = 10 : i32, message = "nbs,nsd->nbd"}> : () -> ()
    %cst = arith.constant dense<0.000000e+00> : vector<4x8x8xf32>
    %5 = tpu.matmul %0, %4, %cst {dimension_numbers = #tpu.dot_dimension_numbers<[2], [1], [1], [2], [0, 0, 0, 1, 1, 2], [0], [0]>} : vector<4x8x16xf32>, vector<4x16x8xf32>, vector<4x8x8xf32> -> vector<4x8x8xf32>
    "tpu.trace_stop"() : () -> ()
    %c0_10 = arith.constant 0 : index
    %c0_11 = arith.constant 0 : index
    %c0_12 = arith.constant 0 : index
    %c0_13 = arith.constant 0 : index
    %6 = vector.load %arg2[%c0_10, %c0_11, %c0_12, %c0_13] : memref<12x4x1x8xf32, #tpu.memory_space<vmem>>, vector<1x4x1x8xf32>
    %7 = vector.shape_cast %6 : vector<1x4x1x8xf32> to vector<4x1x8xf32>
    %8 = vector.broadcast %7 : vector<4x1x8xf32> to vector<4x8x8xf32>
    %9 = arith.addf %5, %8 : vector<4x8x8xf32>
    %c2 = arith.constant 2 : index
    %c0_14 = arith.constant 0 : index
    %c0_15 = arith.constant 0 : index
    %c0_16 = arith.constant 0 : index
    %10 = vector.load %arg1[%c2, %c0_14, %c0_15, %c0_16] : memref<12x4x16x8xf32, #tpu.memory_space<vmem>>, vector<1x4x16x8xf32>
    %11 = vector.shape_cast %10 : vector<1x4x16x8xf32> to vector<4x16x8xf32>
    "tpu.trace_start"() <{level = 10 : i32, message = "nbs,nsd->nbd"}> : () -> ()
    %cst_17 = arith.constant dense<0.000000e+00> : vector<4x8x8xf32>
    %12 = tpu.matmul %0, %11, %cst_17 {dimension_numbers = #tpu.dot_dimension_numbers<[2], [1], [1], [2], [0, 0, 0, 1, 1, 2], [0], [0]>} : vector<4x8x16xf32>, vector<4x16x8xf32>, vector<4x8x8xf32> -> vector<4x8x8xf32>
    "tpu.trace_stop"() : () -> ()
    %c2_18 = arith.constant 2 : index
    %c0_19 = arith.constant 0 : index
    %c0_20 = arith.constant 0 : index
    %c0_21 = arith.constant 0 : index
    %13 = vector.load %arg2[%c2_18, %c0_19, %c0_20, %c0_21] : memref<12x4x1x8xf32, #tpu.memory_space<vmem>>, vector<1x4x1x8xf32>
    %14 = vector.shape_cast %13 : vector<1x4x1x8xf32> to vector<4x1x8xf32>
    %15 = vector.broadcast %14 : vector<4x1x8xf32> to vector<4x8x8xf32>
    %16 = arith.addf %12, %15 : vector<4x8x8xf32>
    %c4 = arith.constant 4 : index
    %c0_22 = arith.constant 0 : index
    %c0_23 = arith.constant 0 : index
    %c0_24 = arith.constant 0 : index
    %17 = vector.load %arg1[%c4, %c0_22, %c0_23, %c0_24] : memref<12x4x16x8xf32, #tpu.memory_space<vmem>>, vector<1x4x16x8xf32>
    %18 = vector.shape_cast %17 : vector<1x4x16x8xf32> to vector<4x16x8xf32>
    "tpu.trace_start"() <{level = 10 : i32, message = "nbs,nsd->nbd"}> : () -> ()
    %cst_25 = arith.constant dense<0.000000e+00> : vector<4x8x8xf32>
    %19 = tpu.matmul %0, %18, %cst_25 {dimension_numbers = #tpu.dot_dimension_numbers<[2], [1], [1], [2], [0, 0, 0, 1, 1, 2], [0], [0]>} : vector<4x8x16xf32>, vector<4x16x8xf32>, vector<4x8x8xf32> -> vector<4x8x8xf32>
    "tpu.trace_stop"() : () -> ()
    %c4_26 = arith.constant 4 : index
    %c0_27 = arith.constant 0 : index
    %c0_28 = arith.constant 0 : index
    %c0_29 = arith.constant 0 : index
    %20 = vector.load %arg2[%c4_26, %c0_27, %c0_28, %c0_29] : memref<12x4x1x8xf32, #tpu.memory_space<vmem>>, vector<1x4x1x8xf32>
    %21 = vector.shape_cast %20 : vector<1x4x1x8xf32> to vector<4x1x8xf32>
    %22 = vector.broadcast %21 : vector<4x1x8xf32> to vector<4x8x8xf32>
    %23 = arith.addf %19, %22 : vector<4x8x8xf32>
    "tpu.trace_start"() <{level = 10 : i32, message = "nbd,ncd->nbc"}> : () -> ()
    %cst_30 = arith.constant dense<0.000000e+00> : vector<4x8x8xf32>
    %24 = tpu.matmul %9, %16, %cst_30 {dimension_numbers = #tpu.dot_dimension_numbers<[2], [2], [1], [1], [0, 0, 0, 1, 1, 1], [0], [0]>} : vector<4x8x8xf32>, vector<4x8x8xf32>, vector<4x8x8xf32> -> vector<4x8x8xf32>
    "tpu.trace_stop"() : () -> ()
    %cst_31 = arith.constant 0.353553385 : f32
    %25 = vector.broadcast %cst_31 : f32 to vector<4x8x8xf32>
    %26 = arith.mulf %24, %25 : vector<4x8x8xf32>
    %cst_32 = arith.constant dense<0xFF800000> : vector<4x8xf32>
    %27 = vector.multi_reduction <maximumf>, %26, %cst_32 [2] : vector<4x8x8xf32> to vector<4x8xf32>
    %28 = vector.shape_cast %27 : vector<4x8xf32> to vector<4x8x1xf32>
    %29 = vector.broadcast %28 : vector<4x8x1xf32> to vector<4x8x8xf32>
    %30 = arith.subf %26, %29 : vector<4x8x8xf32>
    %31 = math.exp %30 : vector<4x8x8xf32>
    %cst_33 = arith.constant dense<0.000000e+00> : vector<4x8xf32>
    %32 = vector.multi_reduction <add>, %31, %cst_33 [2] : vector<4x8x8xf32> to vector<4x8xf32>
    %33 = vector.shape_cast %32 : vector<4x8xf32> to vector<4x8x1xf32>
    %34 = vector.broadcast %33 : vector<4x8x1xf32> to vector<4x8x8xf32>
    %35 = arith.divf %31, %34 : vector<4x8x8xf32>
    "tpu.trace_start"() <{level = 10 : i32, message = "nbc,ncd->nbd"}> : () -> ()
    %cst_34 = arith.constant dense<0.000000e+00> : vector<4x8x8xf32>
    %36 = tpu.matmul %35, %23, %cst_34 {dimension_numbers = #tpu.dot_dimension_numbers<[2], [1], [1], [2], [0, 0, 0, 1, 1, 2], [0], [0]>} : vector<4x8x8xf32>, vector<4x8x8xf32>, vector<4x8x8xf32> -> vector<4x8x8xf32>
    "tpu.trace_stop"() : () -> ()
    %c0_35 = arith.constant 0 : index
    %c0_36 = arith.constant 0 : index
    %c0_37 = arith.constant 0 : index
    %c0_38 = arith.constant 0 : index
    %37 = vector.load %arg3[%c0_35, %c0_36, %c0_37, %c0_38] : memref<4x4x8x16xf32, #tpu.memory_space<vmem>>, vector<1x4x8x16xf32>
    %38 = vector.shape_cast %37 : vector<1x4x8x16xf32> to vector<4x8x16xf32>
    "tpu.trace_start"() <{level = 10 : i32, message = "nbd,nds->nbs"}> : () -> ()
    %cst_39 = arith.constant dense<0.000000e+00> : vector<4x8x16xf32>
    %39 = tpu.matmul %36, %38, %cst_39 {dimension_numbers = #tpu.dot_dimension_numbers<[2], [1], [1], [2], [0, 0, 0, 1, 1, 2], [0], [0]>} : vector<4x8x8xf32>, vector<4x8x16xf32>, vector<4x8x16xf32> -> vector<4x8x16xf32>
    "tpu.trace_stop"() : () -> ()
    %40 = vector.broadcast %2 : vector<4x1x16xf32> to vector<4x8x16xf32>
    %41 = arith.addf %40, %39 : vector<4x8x16xf32>
    %c1 = arith.constant 1 : index
    %c0_40 = arith.constant 0 : index
    %c0_41 = arith.constant 0 : index
    %c0_42 = arith.constant 0 : index
    %42 = vector.load %arg1[%c1, %c0_40, %c0_41, %c0_42] : memref<12x4x16x8xf32, #tpu.memory_space<vmem>>, vector<1x4x16x8xf32>
    %43 = vector.shape_cast %42 : vector<1x4x16x8xf32> to vector<4x16x8xf32>
    "tpu.trace_start"() <{level = 10 : i32, message = "nbs,nsd->nbd"}> : () -> ()
    %cst_43 = arith.constant dense<0.000000e+00> : vector<4x8x8xf32>
    %44 = tpu.matmul %0, %43, %cst_43 {dimension_numbers = #tpu.dot_dimension_numbers<[2], [1], [1], [2], [0, 0, 0, 1, 1, 2], [0], [0]>} : vector<4x8x16xf32>, vector<4x16x8xf32>, vector<4x8x8xf32> -> vector<4x8x8xf32>
    "tpu.trace_stop"() : () -> ()
    %c1_44 = arith.constant 1 : index
    %c0_45 = arith.constant 0 : index
    %c0_46 = arith.constant 0 : index
    %c0_47 = arith.constant 0 : index
    %45 = vector.load %arg2[%c1_44, %c0_45, %c0_46, %c0_47] : memref<12x4x1x8xf32, #tpu.memory_space<vmem>>, vector<1x4x1x8xf32>
    %46 = vector.shape_cast %45 : vector<1x4x1x8xf32> to vector<4x1x8xf32>
    %47 = vector.broadcast %46 : vector<4x1x8xf32> to vector<4x8x8xf32>
    %48 = arith.addf %44, %47 : vector<4x8x8xf32>
    %c3 = arith.constant 3 : index
    %c0_48 = arith.constant 0 : index
    %c0_49 = arith.constant 0 : index
    %c0_50 = arith.constant 0 : index
    %49 = vector.load %arg1[%c3, %c0_48, %c0_49, %c0_50] : memref<12x4x16x8xf32, #tpu.memory_space<vmem>>, vector<1x4x16x8xf32>
    %50 = vector.shape_cast %49 : vector<1x4x16x8xf32> to vector<4x16x8xf32>
    "tpu.trace_start"() <{level = 10 : i32, message = "nbs,nsd->nbd"}> : () -> ()
    %cst_51 = arith.constant dense<0.000000e+00> : vector<4x8x8xf32>
    %51 = tpu.matmul %0, %50, %cst_51 {dimension_numbers = #tpu.dot_dimension_numbers<[2], [1], [1], [2], [0, 0, 0, 1, 1, 2], [0], [0]>} : vector<4x8x16xf32>, vector<4x16x8xf32>, vector<4x8x8xf32> -> vector<4x8x8xf32>
    "tpu.trace_stop"() : () -> ()
    %c3_52 = arith.constant 3 : index
    %c0_53 = arith.constant 0 : index
    %c0_54 = arith.constant 0 : index
    %c0_55 = arith.constant 0 : index
    %52 = vector.load %arg2[%c3_52, %c0_53, %c0_54, %c0_55] : memref<12x4x1x8xf32, #tpu.memory_space<vmem>>, vector<1x4x1x8xf32>
    %53 = vector.shape_cast %52 : vector<1x4x1x8xf32> to vector<4x1x8xf32>
    %54 = vector.broadcast %53 : vector<4x1x8xf32> to vector<4x8x8xf32>
    %55 = arith.addf %51, %54 : vector<4x8x8xf32>
    %c5 = arith.constant 5 : index
    %c0_56 = arith.constant 0 : index
    %c0_57 = arith.constant 0 : index
    %c0_58 = arith.constant 0 : index
    %56 = vector.load %arg1[%c5, %c0_56, %c0_57, %c0_58] : memref<12x4x16x8xf32, #tpu.memory_space<vmem>>, vector<1x4x16x8xf32>
    %57 = vector.shape_cast %56 : vector<1x4x16x8xf32> to vector<4x16x8xf32>
    "tpu.trace_start"() <{level = 10 : i32, message = "nbs,nsd->nbd"}> : () -> ()
    %cst_59 = arith.constant dense<0.000000e+00> : vector<4x8x8xf32>
    %58 = tpu.matmul %0, %57, %cst_59 {dimension_numbers = #tpu.dot_dimension_numbers<[2], [1], [1], [2], [0, 0, 0, 1, 1, 2], [0], [0]>} : vector<4x8x16xf32>, vector<4x16x8xf32>, vector<4x8x8xf32> -> vector<4x8x8xf32>
    "tpu.trace_stop"() : () -> ()
    %c5_60 = arith.constant 5 : index
    %c0_61 = arith.constant 0 : index
    %c0_62 = arith.constant 0 : index
    %c0_63 = arith.constant 0 : index
    %59 = vector.load %arg2[%c5_60, %c0_61, %c0_62, %c0_63] : memref<12x4x1x8xf32, #tpu.memory_space<vmem>>, vector<1x4x1x8xf32>
    %60 = vector.shape_cast %59 : vector<1x4x1x8xf32> to vector<4x1x8xf32>
    %61 = vector.broadcast %60 : vector<4x1x8xf32> to vector<4x8x8xf32>
    %62 = arith.addf %58, %61 : vector<4x8x8xf32>
    "tpu.trace_start"() <{level = 10 : i32, message = "nbd,ncd->nbc"}> : () -> ()
    %cst_64 = arith.constant dense<0.000000e+00> : vector<4x8x8xf32>
    %63 = tpu.matmul %48, %55, %cst_64 {dimension_numbers = #tpu.dot_dimension_numbers<[2], [2], [1], [1], [0, 0, 0, 1, 1, 1], [0], [0]>} : vector<4x8x8xf32>, vector<4x8x8xf32>, vector<4x8x8xf32> -> vector<4x8x8xf32>
    "tpu.trace_stop"() : () -> ()
    %cst_65 = arith.constant 0.353553385 : f32
    %64 = vector.broadcast %cst_65 : f32 to vector<4x8x8xf32>
    %65 = arith.mulf %63, %64 : vector<4x8x8xf32>
    %cst_66 = arith.constant dense<0xFF800000> : vector<4x8xf32>
    %66 = vector.multi_reduction <maximumf>, %65, %cst_66 [2] : vector<4x8x8xf32> to vector<4x8xf32>
    %67 = vector.shape_cast %66 : vector<4x8xf32> to vector<4x8x1xf32>
    %68 = vector.broadcast %67 : vector<4x8x1xf32> to vector<4x8x8xf32>
    %69 = arith.subf %65, %68 : vector<4x8x8xf32>
    %70 = math.exp %69 : vector<4x8x8xf32>
    %cst_67 = arith.constant dense<0.000000e+00> : vector<4x8xf32>
    %71 = vector.multi_reduction <add>, %70, %cst_67 [2] : vector<4x8x8xf32> to vector<4x8xf32>
    %72 = vector.shape_cast %71 : vector<4x8xf32> to vector<4x8x1xf32>
    %73 = vector.broadcast %72 : vector<4x8x1xf32> to vector<4x8x8xf32>
    %74 = arith.divf %70, %73 : vector<4x8x8xf32>
    "tpu.trace_start"() <{level = 10 : i32, message = "nbc,ncd->nbd"}> : () -> ()
    %cst_68 = arith.constant dense<0.000000e+00> : vector<4x8x8xf32>
    %75 = tpu.matmul %74, %62, %cst_68 {dimension_numbers = #tpu.dot_dimension_numbers<[2], [1], [1], [2], [0, 0, 0, 1, 1, 2], [0], [0]>} : vector<4x8x8xf32>, vector<4x8x8xf32>, vector<4x8x8xf32> -> vector<4x8x8xf32>
    "tpu.trace_stop"() : () -> ()
    %c1_69 = arith.constant 1 : index
    %c0_70 = arith.constant 0 : index
    %c0_71 = arith.constant 0 : index
    %c0_72 = arith.constant 0 : index
    %76 = vector.load %arg3[%c1_69, %c0_70, %c0_71, %c0_72] : memref<4x4x8x16xf32, #tpu.memory_space<vmem>>, vector<1x4x8x16xf32>
    %77 = vector.shape_cast %76 : vector<1x4x8x16xf32> to vector<4x8x16xf32>
    "tpu.trace_start"() <{level = 10 : i32, message = "nbd,nds->nbs"}> : () -> ()
    %cst_73 = arith.constant dense<0.000000e+00> : vector<4x8x16xf32>
    %78 = tpu.matmul %75, %77, %cst_73 {dimension_numbers = #tpu.dot_dimension_numbers<[2], [1], [1], [2], [0, 0, 0, 1, 1, 2], [0], [0]>} : vector<4x8x8xf32>, vector<4x8x16xf32>, vector<4x8x16xf32> -> vector<4x8x16xf32>
    "tpu.trace_stop"() : () -> ()
    %79 = arith.addf %41, %78 : vector<4x8x16xf32>
    %80 = arith.addf %0, %79 : vector<4x8x16xf32>
    %c3_74 = arith.constant 3 : index
    %c0_75 = arith.constant 0 : index
    %c0_76 = arith.constant 0 : index
    %c0_77 = arith.constant 0 : index
    %81 = vector.load %arg5[%c3_74, %c0_75, %c0_76, %c0_77] : memref<14x4x1x16xf32, #tpu.memory_space<vmem>>, vector<1x4x1x16xf32>
    %82 = vector.shape_cast %81 : vector<1x4x1x16xf32> to vector<4x1x16xf32>
    %c4_78 = arith.constant 4 : index
    %c0_79 = arith.constant 0 : index
    %c0_80 = arith.constant 0 : index
    %c0_81 = arith.constant 0 : index
    %83 = vector.load %arg5[%c4_78, %c0_79, %c0_80, %c0_81] : memref<14x4x1x16xf32, #tpu.memory_space<vmem>>, vector<1x4x1x16xf32>
    %84 = vector.shape_cast %83 : vector<1x4x1x16xf32> to vector<4x1x16xf32>
    %cst_82 = arith.constant dense<0.000000e+00> : vector<4x8xf32>
    %85 = vector.multi_reduction <add>, %80, %cst_82 [2] : vector<4x8x16xf32> to vector<4x8xf32>
    %86 = vector.shape_cast %85 : vector<4x8xf32> to vector<4x8x1xf32>
    %cst_83 = arith.constant 1.600000e+01 : f32
    %87 = vector.broadcast %cst_83 : f32 to vector<4x8x1xf32>
    %88 = arith.divf %86, %87 : vector<4x8x1xf32>
    %89 = vector.broadcast %88 : vector<4x8x1xf32> to vector<4x8x16xf32>
    %90 = arith.subf %80, %89 : vector<4x8x16xf32>
    %91 = arith.mulf %90, %90 : vector<4x8x16xf32>
    %cst_84 = arith.constant dense<0.000000e+00> : vector<4x8xf32>
    %92 = vector.multi_reduction <add>, %91, %cst_84 [2] : vector<4x8x16xf32> to vector<4x8xf32>
    %93 = vector.shape_cast %92 : vector<4x8xf32> to vector<4x8x1xf32>
    %cst_85 = arith.constant 1.600000e+01 : f32
    %94 = vector.broadcast %cst_85 : f32 to vector<4x8x1xf32>
    %95 = arith.divf %93, %94 : vector<4x8x1xf32>
    %96 = vector.broadcast %88 : vector<4x8x1xf32> to vector<4x8x16xf32>
    %97 = arith.subf %80, %96 : vector<4x8x16xf32>
    %cst_86 = arith.constant 9.99999974E-6 : f32
    %98 = vector.broadcast %cst_86 : f32 to vector<4x8x1xf32>
    %99 = arith.addf %95, %98 : vector<4x8x1xf32>
    %100 = math.rsqrt %99 : vector<4x8x1xf32>
    %101 = vector.broadcast %100 : vector<4x8x1xf32> to vector<4x8x16xf32>
    %102 = arith.mulf %97, %101 : vector<4x8x16xf32>
    %103 = vector.broadcast %82 : vector<4x1x16xf32> to vector<4x8x16xf32>
    %104 = arith.mulf %102, %103 : vector<4x8x16xf32>
    %105 = vector.broadcast %84 : vector<4x1x16xf32> to vector<4x8x16xf32>
    %106 = arith.addf %104, %105 : vector<4x8x16xf32>
    %c0_87 = arith.constant 0 : index
    %c0_88 = arith.constant 0 : index
    %c0_89 = arith.constant 0 : index
    %c0_90 = arith.constant 0 : index
    %107 = vector.load %arg4[%c0_87, %c0_88, %c0_89, %c0_90] : memref<4x4x16x16xf32, #tpu.memory_space<vmem>>, vector<1x4x16x16xf32>
    %108 = vector.shape_cast %107 : vector<1x4x16x16xf32> to vector<4x16x16xf32>
    "tpu.trace_start"() <{level = 10 : i32, message = "nbs,nst->nbt"}> : () -> ()
    %cst_91 = arith.constant dense<0.000000e+00> : vector<4x8x16xf32>
    %109 = tpu.matmul %106, %108, %cst_91 {dimension_numbers = #tpu.dot_dimension_numbers<[2], [1], [1], [2], [0, 0, 0, 1, 1, 2], [0], [0]>} : vector<4x8x16xf32>, vector<4x16x16xf32>, vector<4x8x16xf32> -> vector<4x8x16xf32>
    "tpu.trace_stop"() : () -> ()
    %c1_92 = arith.constant 1 : index
    %c0_93 = arith.constant 0 : index
    %c0_94 = arith.constant 0 : index
    %c0_95 = arith.constant 0 : index
    %110 = vector.load %arg5[%c1_92, %c0_93, %c0_94, %c0_95] : memref<14x4x1x16xf32, #tpu.memory_space<vmem>>, vector<1x4x1x16xf32>
    %111 = vector.shape_cast %110 : vector<1x4x1x16xf32> to vector<4x1x16xf32>
    %112 = vector.broadcast %111 : vector<4x1x16xf32> to vector<4x8x16xf32>
    %113 = arith.addf %109, %112 : vector<4x8x16xf32>
    %cst_96 = arith.constant 0.000000e+00 : f32
    %114 = vector.broadcast %cst_96 : f32 to vector<4x8x16xf32>
    %115 = arith.maximumf %113, %114 : vector<4x8x16xf32>
    %c1_97 = arith.constant 1 : index
    %c0_98 = arith.constant 0 : index
    %c0_99 = arith.constant 0 : index
    %c0_100 = arith.constant 0 : index
    %116 = vector.load %arg4[%c1_97, %c0_98, %c0_99, %c0_100] : memref<4x4x16x16xf32, #tpu.memory_space<vmem>>, vector<1x4x16x16xf32>
    %117 = vector.shape_cast %116 : vector<1x4x16x16xf32> to vector<4x16x16xf32>
    "tpu.trace_start"() <{level = 10 : i32, message = "nbt,nts->nbs"}> : () -> ()
    %cst_101 = arith.constant dense<0.000000e+00> : vector<4x8x16xf32>
    %118 = tpu.matmul %115, %117, %cst_101 {dimension_numbers = #tpu.dot_dimension_numbers<[2], [1], [1], [2], [0, 0, 0, 1, 1, 2], [0], [0]>} : vector<4x8x16xf32>, vector<4x16x16xf32>, vector<4x8x16xf32> -> vector<4x8x16xf32>
    "tpu.trace_stop"() : () -> ()
    %c2_102 = arith.constant 2 : index
    %c0_103 = arith.constant 0 : index
    %c0_104 = arith.constant 0 : index
    %c0_105 = arith.constant 0 : index
    %119 = vector.load %arg5[%c2_102, %c0_103, %c0_104, %c0_105] : memref<14x4x1x16xf32, #tpu.memory_space<vmem>>, vector<1x4x1x16xf32>
    %120 = vector.shape_cast %119 : vector<1x4x1x16xf32> to vector<4x1x16xf32>
    %121 = vector.broadcast %120 : vector<4x1x16xf32> to vector<4x8x16xf32>
    %122 = arith.addf %118, %121 : vector<4x8x16xf32>
    %123 = arith.addf %106, %122 : vector<4x8x16xf32>
    %c5_106 = arith.constant 5 : index
    %c0_107 = arith.constant 0 : index
    %c0_108 = arith.constant 0 : index
    %c0_109 = arith.constant 0 : index
    %124 = vector.load %arg5[%c5_106, %c0_107, %c0_108, %c0_109] : memref<14x4x1x16xf32, #tpu.memory_space<vmem>>, vector<1x4x1x16xf32>
    %125 = vector.shape_cast %124 : vector<1x4x1x16xf32> to vector<4x1x16xf32>
    %c6 = arith.constant 6 : index
    %c0_110 = arith.constant 0 : index
    %c0_111 = arith.constant 0 : index
    %c0_112 = arith.constant 0 : index
    %126 = vector.load %arg5[%c6, %c0_110, %c0_111, %c0_112] : memref<14x4x1x16xf32, #tpu.memory_space<vmem>>, vector<1x4x1x16xf32>
    %127 = vector.shape_cast %126 : vector<1x4x1x16xf32> to vector<4x1x16xf32>
    %cst_113 = arith.constant dense<0.000000e+00> : vector<4x8xf32>
    %128 = vector.multi_reduction <add>, %123, %cst_113 [2] : vector<4x8x16xf32> to vector<4x8xf32>
    %129 = vector.shape_cast %128 : vector<4x8xf32> to vector<4x8x1xf32>
    %cst_114 = arith.constant 1.600000e+01 : f32
    %130 = vector.broadcast %cst_114 : f32 to vector<4x8x1xf32>
    %131 = arith.divf %129, %130 : vector<4x8x1xf32>
    %132 = vector.broadcast %131 : vector<4x8x1xf32> to vector<4x8x16xf32>
    %133 = arith.subf %123, %132 : vector<4x8x16xf32>
    %134 = arith.mulf %133, %133 : vector<4x8x16xf32>
    %cst_115 = arith.constant dense<0.000000e+00> : vector<4x8xf32>
    %135 = vector.multi_reduction <add>, %134, %cst_115 [2] : vector<4x8x16xf32> to vector<4x8xf32>
    %136 = vector.shape_cast %135 : vector<4x8xf32> to vector<4x8x1xf32>
    %cst_116 = arith.constant 1.600000e+01 : f32
    %137 = vector.broadcast %cst_116 : f32 to vector<4x8x1xf32>
    %138 = arith.divf %136, %137 : vector<4x8x1xf32>
    %139 = vector.broadcast %131 : vector<4x8x1xf32> to vector<4x8x16xf32>
    %140 = arith.subf %123, %139 : vector<4x8x16xf32>
    %cst_117 = arith.constant 9.99999974E-6 : f32
    %141 = vector.broadcast %cst_117 : f32 to vector<4x8x1xf32>
    %142 = arith.addf %138, %141 : vector<4x8x1xf32>
    %143 = math.rsqrt %142 : vector<4x8x1xf32>
    %144 = vector.broadcast %143 : vector<4x8x1xf32> to vector<4x8x16xf32>
    %145 = arith.mulf %140, %144 : vector<4x8x16xf32>
    %146 = vector.broadcast %125 : vector<4x1x16xf32> to vector<4x8x16xf32>
    %147 = arith.mulf %145, %146 : vector<4x8x16xf32>
    %148 = vector.broadcast %127 : vector<4x1x16xf32> to vector<4x8x16xf32>
    %149 = arith.addf %147, %148 : vector<4x8x16xf32>
    %c7 = arith.constant 7 : index
    %c0_118 = arith.constant 0 : index
    %c0_119 = arith.constant 0 : index
    %c0_120 = arith.constant 0 : index
    %150 = vector.load %arg5[%c7, %c0_118, %c0_119, %c0_120] : memref<14x4x1x16xf32, #tpu.memory_space<vmem>>, vector<1x4x1x16xf32>
    %151 = vector.shape_cast %150 : vector<1x4x1x16xf32> to vector<4x1x16xf32>
    %c6_121 = arith.constant 6 : index
    %c0_122 = arith.constant 0 : index
    %c0_123 = arith.constant 0 : index
    %c0_124 = arith.constant 0 : index
    %152 = vector.load %arg1[%c6_121, %c0_122, %c0_123, %c0_124] : memref<12x4x16x8xf32, #tpu.memory_space<vmem>>, vector<1x4x16x8xf32>
    %153 = vector.shape_cast %152 : vector<1x4x16x8xf32> to vector<4x16x8xf32>
    "tpu.trace_start"() <{level = 10 : i32, message = "nbs,nsd->nbd"}> : () -> ()
    %cst_125 = arith.constant dense<0.000000e+00> : vector<4x8x8xf32>
    %154 = tpu.matmul %149, %153, %cst_125 {dimension_numbers = #tpu.dot_dimension_numbers<[2], [1], [1], [2], [0, 0, 0, 1, 1, 2], [0], [0]>} : vector<4x8x16xf32>, vector<4x16x8xf32>, vector<4x8x8xf32> -> vector<4x8x8xf32>
    "tpu.trace_stop"() : () -> ()
    %c6_126 = arith.constant 6 : index
    %c0_127 = arith.constant 0 : index
    %c0_128 = arith.constant 0 : index
    %c0_129 = arith.constant 0 : index
    %155 = vector.load %arg2[%c6_126, %c0_127, %c0_128, %c0_129] : memref<12x4x1x8xf32, #tpu.memory_space<vmem>>, vector<1x4x1x8xf32>
    %156 = vector.shape_cast %155 : vector<1x4x1x8xf32> to vector<4x1x8xf32>
    %157 = vector.broadcast %156 : vector<4x1x8xf32> to vector<4x8x8xf32>
    %158 = arith.addf %154, %157 : vector<4x8x8xf32>
    %c8 = arith.constant 8 : index
    %c0_130 = arith.constant 0 : index
    %c0_131 = arith.constant 0 : index
    %c0_132 = arith.constant 0 : index
    %159 = vector.load %arg1[%c8, %c0_130, %c0_131, %c0_132] : memref<12x4x16x8xf32, #tpu.memory_space<vmem>>, vector<1x4x16x8xf32>
    %160 = vector.shape_cast %159 : vector<1x4x16x8xf32> to vector<4x16x8xf32>
    "tpu.trace_start"() <{level = 10 : i32, message = "nbs,nsd->nbd"}> : () -> ()
    %cst_133 = arith.constant dense<0.000000e+00> : vector<4x8x8xf32>
    %161 = tpu.matmul %149, %160, %cst_133 {dimension_numbers = #tpu.dot_dimension_numbers<[2], [1], [1], [2], [0, 0, 0, 1, 1, 2], [0], [0]>} : vector<4x8x16xf32>, vector<4x16x8xf32>, vector<4x8x8xf32> -> vector<4x8x8xf32>
    "tpu.trace_stop"() : () -> ()
    %c8_134 = arith.constant 8 : index
    %c0_135 = arith.constant 0 : index
    %c0_136 = arith.constant 0 : index
    %c0_137 = arith.constant 0 : index
    %162 = vector.load %arg2[%c8_134, %c0_135, %c0_136, %c0_137] : memref<12x4x1x8xf32, #tpu.memory_space<vmem>>, vector<1x4x1x8xf32>
    %163 = vector.shape_cast %162 : vector<1x4x1x8xf32> to vector<4x1x8xf32>
    %164 = vector.broadcast %163 : vector<4x1x8xf32> to vector<4x8x8xf32>
    %165 = arith.addf %161, %164 : vector<4x8x8xf32>
    %c10 = arith.constant 10 : index
    %c0_138 = arith.constant 0 : index
    %c0_139 = arith.constant 0 : index
    %c0_140 = arith.constant 0 : index
    %166 = vector.load %arg1[%c10, %c0_138, %c0_139, %c0_140] : memref<12x4x16x8xf32, #tpu.memory_space<vmem>>, vector<1x4x16x8xf32>
    %167 = vector.shape_cast %166 : vector<1x4x16x8xf32> to vector<4x16x8xf32>
    "tpu.trace_start"() <{level = 10 : i32, message = "nbs,nsd->nbd"}> : () -> ()
    %cst_141 = arith.constant dense<0.000000e+00> : vector<4x8x8xf32>
    %168 = tpu.matmul %149, %167, %cst_141 {dimension_numbers = #tpu.dot_dimension_numbers<[2], [1], [1], [2], [0, 0, 0, 1, 1, 2], [0], [0]>} : vector<4x8x16xf32>, vector<4x16x8xf32>, vector<4x8x8xf32> -> vector<4x8x8xf32>
    "tpu.trace_stop"() : () -> ()
    %c10_142 = arith.constant 10 : index
    %c0_143 = arith.constant 0 : index
    %c0_144 = arith.constant 0 : index
    %c0_145 = arith.constant 0 : index
    %169 = vector.load %arg2[%c10_142, %c0_143, %c0_144, %c0_145] : memref<12x4x1x8xf32, #tpu.memory_space<vmem>>, vector<1x4x1x8xf32>
    %170 = vector.shape_cast %169 : vector<1x4x1x8xf32> to vector<4x1x8xf32>
    %171 = vector.broadcast %170 : vector<4x1x8xf32> to vector<4x8x8xf32>
    %172 = arith.addf %168, %171 : vector<4x8x8xf32>
    "tpu.trace_start"() <{level = 10 : i32, message = "nbd,ncd->nbc"}> : () -> ()
    %cst_146 = arith.constant dense<0.000000e+00> : vector<4x8x8xf32>
    %173 = tpu.matmul %158, %165, %cst_146 {dimension_numbers = #tpu.dot_dimension_numbers<[2], [2], [1], [1], [0, 0, 0, 1, 1, 1], [0], [0]>} : vector<4x8x8xf32>, vector<4x8x8xf32>, vector<4x8x8xf32> -> vector<4x8x8xf32>
    "tpu.trace_stop"() : () -> ()
    %cst_147 = arith.constant 0.353553385 : f32
    %174 = vector.broadcast %cst_147 : f32 to vector<4x8x8xf32>
    %175 = arith.mulf %173, %174 : vector<4x8x8xf32>
    %cst_148 = arith.constant dense<0xFF800000> : vector<4x8xf32>
    %176 = vector.multi_reduction <maximumf>, %175, %cst_148 [2] : vector<4x8x8xf32> to vector<4x8xf32>
    %177 = vector.shape_cast %176 : vector<4x8xf32> to vector<4x8x1xf32>
    %178 = vector.broadcast %177 : vector<4x8x1xf32> to vector<4x8x8xf32>
    %179 = arith.subf %175, %178 : vector<4x8x8xf32>
    %180 = math.exp %179 : vector<4x8x8xf32>
    %cst_149 = arith.constant dense<0.000000e+00> : vector<4x8xf32>
    %181 = vector.multi_reduction <add>, %180, %cst_149 [2] : vector<4x8x8xf32> to vector<4x8xf32>
    %182 = vector.shape_cast %181 : vector<4x8xf32> to vector<4x8x1xf32>
    %183 = vector.broadcast %182 : vector<4x8x1xf32> to vector<4x8x8xf32>
    %184 = arith.divf %180, %183 : vector<4x8x8xf32>
    "tpu.trace_start"() <{level = 10 : i32, message = "nbc,ncd->nbd"}> : () -> ()
    %cst_150 = arith.constant dense<0.000000e+00> : vector<4x8x8xf32>
    %185 = tpu.matmul %184, %172, %cst_150 {dimension_numbers = #tpu.dot_dimension_numbers<[2], [1], [1], [2], [0, 0, 0, 1, 1, 2], [0], [0]>} : vector<4x8x8xf32>, vector<4x8x8xf32>, vector<4x8x8xf32> -> vector<4x8x8xf32>
    "tpu.trace_stop"() : () -> ()
    %c2_151 = arith.constant 2 : index
    %c0_152 = arith.constant 0 : index
    %c0_153 = arith.constant 0 : index
    %c0_154 = arith.constant 0 : index
    %186 = vector.load %arg3[%c2_151, %c0_152, %c0_153, %c0_154] : memref<4x4x8x16xf32, #tpu.memory_space<vmem>>, vector<1x4x8x16xf32>
    %187 = vector.shape_cast %186 : vector<1x4x8x16xf32> to vector<4x8x16xf32>
    "tpu.trace_start"() <{level = 10 : i32, message = "nbd,nds->nbs"}> : () -> ()
    %cst_155 = arith.constant dense<0.000000e+00> : vector<4x8x16xf32>
    %188 = tpu.matmul %185, %187, %cst_155 {dimension_numbers = #tpu.dot_dimension_numbers<[2], [1], [1], [2], [0, 0, 0, 1, 1, 2], [0], [0]>} : vector<4x8x8xf32>, vector<4x8x16xf32>, vector<4x8x16xf32> -> vector<4x8x16xf32>
    "tpu.trace_stop"() : () -> ()
    %189 = vector.broadcast %151 : vector<4x1x16xf32> to vector<4x8x16xf32>
    %190 = arith.addf %189, %188 : vector<4x8x16xf32>
    %c7_156 = arith.constant 7 : index
    %c0_157 = arith.constant 0 : index
    %c0_158 = arith.constant 0 : index
    %c0_159 = arith.constant 0 : index
    %191 = vector.load %arg1[%c7_156, %c0_157, %c0_158, %c0_159] : memref<12x4x16x8xf32, #tpu.memory_space<vmem>>, vector<1x4x16x8xf32>
    %192 = vector.shape_cast %191 : vector<1x4x16x8xf32> to vector<4x16x8xf32>
    "tpu.trace_start"() <{level = 10 : i32, message = "nbs,nsd->nbd"}> : () -> ()
    %cst_160 = arith.constant dense<0.000000e+00> : vector<4x8x8xf32>
    %193 = tpu.matmul %149, %192, %cst_160 {dimension_numbers = #tpu.dot_dimension_numbers<[2], [1], [1], [2], [0, 0, 0, 1, 1, 2], [0], [0]>} : vector<4x8x16xf32>, vector<4x16x8xf32>, vector<4x8x8xf32> -> vector<4x8x8xf32>
    "tpu.trace_stop"() : () -> ()
    %c7_161 = arith.constant 7 : index
    %c0_162 = arith.constant 0 : index
    %c0_163 = arith.constant 0 : index
    %c0_164 = arith.constant 0 : index
    %194 = vector.load %arg2[%c7_161, %c0_162, %c0_163, %c0_164] : memref<12x4x1x8xf32, #tpu.memory_space<vmem>>, vector<1x4x1x8xf32>
    %195 = vector.shape_cast %194 : vector<1x4x1x8xf32> to vector<4x1x8xf32>
    %196 = vector.broadcast %195 : vector<4x1x8xf32> to vector<4x8x8xf32>
    %197 = arith.addf %193, %196 : vector<4x8x8xf32>
    %c9 = arith.constant 9 : index
    %c0_165 = arith.constant 0 : index
    %c0_166 = arith.constant 0 : index
    %c0_167 = arith.constant 0 : index
    %198 = vector.load %arg1[%c9, %c0_165, %c0_166, %c0_167] : memref<12x4x16x8xf32, #tpu.memory_space<vmem>>, vector<1x4x16x8xf32>
    %199 = vector.shape_cast %198 : vector<1x4x16x8xf32> to vector<4x16x8xf32>
    "tpu.trace_start"() <{level = 10 : i32, message = "nbs,nsd->nbd"}> : () -> ()
    %cst_168 = arith.constant dense<0.000000e+00> : vector<4x8x8xf32>
    %200 = tpu.matmul %149, %199, %cst_168 {dimension_numbers = #tpu.dot_dimension_numbers<[2], [1], [1], [2], [0, 0, 0, 1, 1, 2], [0], [0]>} : vector<4x8x16xf32>, vector<4x16x8xf32>, vector<4x8x8xf32> -> vector<4x8x8xf32>
    "tpu.trace_stop"() : () -> ()
    %c9_169 = arith.constant 9 : index
    %c0_170 = arith.constant 0 : index
    %c0_171 = arith.constant 0 : index
    %c0_172 = arith.constant 0 : index
    %201 = vector.load %arg2[%c9_169, %c0_170, %c0_171, %c0_172] : memref<12x4x1x8xf32, #tpu.memory_space<vmem>>, vector<1x4x1x8xf32>
    %202 = vector.shape_cast %201 : vector<1x4x1x8xf32> to vector<4x1x8xf32>
    %203 = vector.broadcast %202 : vector<4x1x8xf32> to vector<4x8x8xf32>
    %204 = arith.addf %200, %203 : vector<4x8x8xf32>
    %c11 = arith.constant 11 : index
    %c0_173 = arith.constant 0 : index
    %c0_174 = arith.constant 0 : index
    %c0_175 = arith.constant 0 : index
    %205 = vector.load %arg1[%c11, %c0_173, %c0_174, %c0_175] : memref<12x4x16x8xf32, #tpu.memory_space<vmem>>, vector<1x4x16x8xf32>
    %206 = vector.shape_cast %205 : vector<1x4x16x8xf32> to vector<4x16x8xf32>
    "tpu.trace_start"() <{level = 10 : i32, message = "nbs,nsd->nbd"}> : () -> ()
    %cst_176 = arith.constant dense<0.000000e+00> : vector<4x8x8xf32>
    %207 = tpu.matmul %149, %206, %cst_176 {dimension_numbers = #tpu.dot_dimension_numbers<[2], [1], [1], [2], [0, 0, 0, 1, 1, 2], [0], [0]>} : vector<4x8x16xf32>, vector<4x16x8xf32>, vector<4x8x8xf32> -> vector<4x8x8xf32>
    "tpu.trace_stop"() : () -> ()
    %c11_177 = arith.constant 11 : index
    %c0_178 = arith.constant 0 : index
    %c0_179 = arith.constant 0 : index
    %c0_180 = arith.constant 0 : index
    %208 = vector.load %arg2[%c11_177, %c0_178, %c0_179, %c0_180] : memref<12x4x1x8xf32, #tpu.memory_space<vmem>>, vector<1x4x1x8xf32>
    %209 = vector.shape_cast %208 : vector<1x4x1x8xf32> to vector<4x1x8xf32>
    %210 = vector.broadcast %209 : vector<4x1x8xf32> to vector<4x8x8xf32>
    %211 = arith.addf %207, %210 : vector<4x8x8xf32>
    "tpu.trace_start"() <{level = 10 : i32, message = "nbd,ncd->nbc"}> : () -> ()
    %cst_181 = arith.constant dense<0.000000e+00> : vector<4x8x8xf32>
    %212 = tpu.matmul %197, %204, %cst_181 {dimension_numbers = #tpu.dot_dimension_numbers<[2], [2], [1], [1], [0, 0, 0, 1, 1, 1], [0], [0]>} : vector<4x8x8xf32>, vector<4x8x8xf32>, vector<4x8x8xf32> -> vector<4x8x8xf32>
    "tpu.trace_stop"() : () -> ()
    %cst_182 = arith.constant 0.353553385 : f32
    %213 = vector.broadcast %cst_182 : f32 to vector<4x8x8xf32>
    %214 = arith.mulf %212, %213 : vector<4x8x8xf32>
    %cst_183 = arith.constant dense<0xFF800000> : vector<4x8xf32>
    %215 = vector.multi_reduction <maximumf>, %214, %cst_183 [2] : vector<4x8x8xf32> to vector<4x8xf32>
    %216 = vector.shape_cast %215 : vector<4x8xf32> to vector<4x8x1xf32>
    %217 = vector.broadcast %216 : vector<4x8x1xf32> to vector<4x8x8xf32>
    %218 = arith.subf %214, %217 : vector<4x8x8xf32>
    %219 = math.exp %218 : vector<4x8x8xf32>
    %cst_184 = arith.constant dense<0.000000e+00> : vector<4x8xf32>
    %220 = vector.multi_reduction <add>, %219, %cst_184 [2] : vector<4x8x8xf32> to vector<4x8xf32>
    %221 = vector.shape_cast %220 : vector<4x8xf32> to vector<4x8x1xf32>
    %222 = vector.broadcast %221 : vector<4x8x1xf32> to vector<4x8x8xf32>
    %223 = arith.divf %219, %222 : vector<4x8x8xf32>
    "tpu.trace_start"() <{level = 10 : i32, message = "nbc,ncd->nbd"}> : () -> ()
    %cst_185 = arith.constant dense<0.000000e+00> : vector<4x8x8xf32>
    %224 = tpu.matmul %223, %211, %cst_185 {dimension_numbers = #tpu.dot_dimension_numbers<[2], [1], [1], [2], [0, 0, 0, 1, 1, 2], [0], [0]>} : vector<4x8x8xf32>, vector<4x8x8xf32>, vector<4x8x8xf32> -> vector<4x8x8xf32>
    "tpu.trace_stop"() : () -> ()
    %c3_186 = arith.constant 3 : index
    %c0_187 = arith.constant 0 : index
    %c0_188 = arith.constant 0 : index
    %c0_189 = arith.constant 0 : index
    %225 = vector.load %arg3[%c3_186, %c0_187, %c0_188, %c0_189] : memref<4x4x8x16xf32, #tpu.memory_space<vmem>>, vector<1x4x8x16xf32>
    %226 = vector.shape_cast %225 : vector<1x4x8x16xf32> to vector<4x8x16xf32>
    "tpu.trace_start"() <{level = 10 : i32, message = "nbd,nds->nbs"}> : () -> ()
    %cst_190 = arith.constant dense<0.000000e+00> : vector<4x8x16xf32>
    %227 = tpu.matmul %224, %226, %cst_190 {dimension_numbers = #tpu.dot_dimension_numbers<[2], [1], [1], [2], [0, 0, 0, 1, 1, 2], [0], [0]>} : vector<4x8x8xf32>, vector<4x8x16xf32>, vector<4x8x16xf32> -> vector<4x8x16xf32>
    "tpu.trace_stop"() : () -> ()
    %228 = arith.addf %190, %227 : vector<4x8x16xf32>
    %229 = arith.addf %149, %228 : vector<4x8x16xf32>
    %c10_191 = arith.constant 10 : index
    %c0_192 = arith.constant 0 : index
    %c0_193 = arith.constant 0 : index
    %c0_194 = arith.constant 0 : index
    %230 = vector.load %arg5[%c10_191, %c0_192, %c0_193, %c0_194] : memref<14x4x1x16xf32, #tpu.memory_space<vmem>>, vector<1x4x1x16xf32>
    %231 = vector.shape_cast %230 : vector<1x4x1x16xf32> to vector<4x1x16xf32>
    %c11_195 = arith.constant 11 : index
    %c0_196 = arith.constant 0 : index
    %c0_197 = arith.constant 0 : index
    %c0_198 = arith.constant 0 : index
    %232 = vector.load %arg5[%c11_195, %c0_196, %c0_197, %c0_198] : memref<14x4x1x16xf32, #tpu.memory_space<vmem>>, vector<1x4x1x16xf32>
    %233 = vector.shape_cast %232 : vector<1x4x1x16xf32> to vector<4x1x16xf32>
    %cst_199 = arith.constant dense<0.000000e+00> : vector<4x8xf32>
    %234 = vector.multi_reduction <add>, %229, %cst_199 [2] : vector<4x8x16xf32> to vector<4x8xf32>
    %235 = vector.shape_cast %234 : vector<4x8xf32> to vector<4x8x1xf32>
    %cst_200 = arith.constant 1.600000e+01 : f32
    %236 = vector.broadcast %cst_200 : f32 to vector<4x8x1xf32>
    %237 = arith.divf %235, %236 : vector<4x8x1xf32>
    %238 = vector.broadcast %237 : vector<4x8x1xf32> to vector<4x8x16xf32>
    %239 = arith.subf %229, %238 : vector<4x8x16xf32>
    %240 = arith.mulf %239, %239 : vector<4x8x16xf32>
    %cst_201 = arith.constant dense<0.000000e+00> : vector<4x8xf32>
    %241 = vector.multi_reduction <add>, %240, %cst_201 [2] : vector<4x8x16xf32> to vector<4x8xf32>
    %242 = vector.shape_cast %241 : vector<4x8xf32> to vector<4x8x1xf32>
    %cst_202 = arith.constant 1.600000e+01 : f32
    %243 = vector.broadcast %cst_202 : f32 to vector<4x8x1xf32>
    %244 = arith.divf %242, %243 : vector<4x8x1xf32>
    %245 = vector.broadcast %237 : vector<4x8x1xf32> to vector<4x8x16xf32>
    %246 = arith.subf %229, %245 : vector<4x8x16xf32>
    %cst_203 = arith.constant 9.99999974E-6 : f32
    %247 = vector.broadcast %cst_203 : f32 to vector<4x8x1xf32>
    %248 = arith.addf %244, %247 : vector<4x8x1xf32>
    %249 = math.rsqrt %248 : vector<4x8x1xf32>
    %250 = vector.broadcast %249 : vector<4x8x1xf32> to vector<4x8x16xf32>
    %251 = arith.mulf %246, %250 : vector<4x8x16xf32>
    %252 = vector.broadcast %231 : vector<4x1x16xf32> to vector<4x8x16xf32>
    %253 = arith.mulf %251, %252 : vector<4x8x16xf32>
    %254 = vector.broadcast %233 : vector<4x1x16xf32> to vector<4x8x16xf32>
    %255 = arith.addf %253, %254 : vector<4x8x16xf32>
    %c2_204 = arith.constant 2 : index
    %c0_205 = arith.constant 0 : index
    %c0_206 = arith.constant 0 : index
    %c0_207 = arith.constant 0 : index
    %256 = vector.load %arg4[%c2_204, %c0_205, %c0_206, %c0_207] : memref<4x4x16x16xf32, #tpu.memory_space<vmem>>, vector<1x4x16x16xf32>
    %257 = vector.shape_cast %256 : vector<1x4x16x16xf32> to vector<4x16x16xf32>
    "tpu.trace_start"() <{level = 10 : i32, message = "nbs,nst->nbt"}> : () -> ()
    %cst_208 = arith.constant dense<0.000000e+00> : vector<4x8x16xf32>
    %258 = tpu.matmul %255, %257, %cst_208 {dimension_numbers = #tpu.dot_dimension_numbers<[2], [1], [1], [2], [0, 0, 0, 1, 1, 2], [0], [0]>} : vector<4x8x16xf32>, vector<4x16x16xf32>, vector<4x8x16xf32> -> vector<4x8x16xf32>
    "tpu.trace_stop"() : () -> ()
    %c8_209 = arith.constant 8 : index
    %c0_210 = arith.constant 0 : index
    %c0_211 = arith.constant 0 : index
    %c0_212 = arith.constant 0 : index
    %259 = vector.load %arg5[%c8_209, %c0_210, %c0_211, %c0_212] : memref<14x4x1x16xf32, #tpu.memory_space<vmem>>, vector<1x4x1x16xf32>
    %260 = vector.shape_cast %259 : vector<1x4x1x16xf32> to vector<4x1x16xf32>
    %261 = vector.broadcast %260 : vector<4x1x16xf32> to vector<4x8x16xf32>
    %262 = arith.addf %258, %261 : vector<4x8x16xf32>
    %cst_213 = arith.constant 0.000000e+00 : f32
    %263 = vector.broadcast %cst_213 : f32 to vector<4x8x16xf32>
    %264 = arith.maximumf %262, %263 : vector<4x8x16xf32>
    %c3_214 = arith.constant 3 : index
    %c0_215 = arith.constant 0 : index
    %c0_216 = arith.constant 0 : index
    %c0_217 = arith.constant 0 : index
    %265 = vector.load %arg4[%c3_214, %c0_215, %c0_216, %c0_217] : memref<4x4x16x16xf32, #tpu.memory_space<vmem>>, vector<1x4x16x16xf32>
    %266 = vector.shape_cast %265 : vector<1x4x16x16xf32> to vector<4x16x16xf32>
    "tpu.trace_start"() <{level = 10 : i32, message = "nbt,nts->nbs"}> : () -> ()
    %cst_218 = arith.constant dense<0.000000e+00> : vector<4x8x16xf32>
    %267 = tpu.matmul %264, %266, %cst_218 {dimension_numbers = #tpu.dot_dimension_numbers<[2], [1], [1], [2], [0, 0, 0, 1, 1, 2], [0], [0]>} : vector<4x8x16xf32>, vector<4x16x16xf32>, vector<4x8x16xf32> -> vector<4x8x16xf32>
    "tpu.trace_stop"() : () -> ()
    %c9_219 = arith.constant 9 : index
    %c0_220 = arith.constant 0 : index
    %c0_221 = arith.constant 0 : index
    %c0_222 = arith.constant 0 : index
    %268 = vector.load %arg5[%c9_219, %c0_220, %c0_221, %c0_222] : memref<14x4x1x16xf32, #tpu.memory_space<vmem>>, vector<1x4x1x16xf32>
    %269 = vector.shape_cast %268 : vector<1x4x1x16xf32> to vector<4x1x16xf32>
    %270 = vector.broadcast %269 : vector<4x1x16xf32> to vector<4x8x16xf32>
    %271 = arith.addf %267, %270 : vector<4x8x16xf32>
    %272 = arith.addf %255, %271 : vector<4x8x16xf32>
    %c12 = arith.constant 12 : index
    %c0_223 = arith.constant 0 : index
    %c0_224 = arith.constant 0 : index
    %c0_225 = arith.constant 0 : index
    %273 = vector.load %arg5[%c12, %c0_223, %c0_224, %c0_225] : memref<14x4x1x16xf32, #tpu.memory_space<vmem>>, vector<1x4x1x16xf32>
    %274 = vector.shape_cast %273 : vector<1x4x1x16xf32> to vector<4x1x16xf32>
    %c13 = arith.constant 13 : index
    %c0_226 = arith.constant 0 : index
    %c0_227 = arith.constant 0 : index
    %c0_228 = arith.constant 0 : index
    %275 = vector.load %arg5[%c13, %c0_226, %c0_227, %c0_228] : memref<14x4x1x16xf32, #tpu.memory_space<vmem>>, vector<1x4x1x16xf32>
    %276 = vector.shape_cast %275 : vector<1x4x1x16xf32> to vector<4x1x16xf32>
    %cst_229 = arith.constant dense<0.000000e+00> : vector<4x8xf32>
    %277 = vector.multi_reduction <add>, %272, %cst_229 [2] : vector<4x8x16xf32> to vector<4x8xf32>
    %278 = vector.shape_cast %277 : vector<4x8xf32> to vector<4x8x1xf32>
    %cst_230 = arith.constant 1.600000e+01 : f32
    %279 = vector.broadcast %cst_230 : f32 to vector<4x8x1xf32>
    %280 = arith.divf %278, %279 : vector<4x8x1xf32>
    %281 = vector.broadcast %280 : vector<4x8x1xf32> to vector<4x8x16xf32>
    %282 = arith.subf %272, %281 : vector<4x8x16xf32>
    %283 = arith.mulf %282, %282 : vector<4x8x16xf32>
    %cst_231 = arith.constant dense<0.000000e+00> : vector<4x8xf32>
    %284 = vector.multi_reduction <add>, %283, %cst_231 [2] : vector<4x8x16xf32> to vector<4x8xf32>
    %285 = vector.shape_cast %284 : vector<4x8xf32> to vector<4x8x1xf32>
    %cst_232 = arith.constant 1.600000e+01 : f32
    %286 = vector.broadcast %cst_232 : f32 to vector<4x8x1xf32>
    %287 = arith.divf %285, %286 : vector<4x8x1xf32>
    %288 = vector.broadcast %280 : vector<4x8x1xf32> to vector<4x8x16xf32>
    %289 = arith.subf %272, %288 : vector<4x8x16xf32>
    %cst_233 = arith.constant 9.99999974E-6 : f32
    %290 = vector.broadcast %cst_233 : f32 to vector<4x8x1xf32>
    %291 = arith.addf %287, %290 : vector<4x8x1xf32>
    %292 = math.rsqrt %291 : vector<4x8x1xf32>
    %293 = vector.broadcast %292 : vector<4x8x1xf32> to vector<4x8x16xf32>
    %294 = arith.mulf %289, %293 : vector<4x8x16xf32>
    %295 = vector.broadcast %274 : vector<4x1x16xf32> to vector<4x8x16xf32>
    %296 = arith.mulf %294, %295 : vector<4x8x16xf32>
    %297 = vector.broadcast %276 : vector<4x1x16xf32> to vector<4x8x16xf32>
    %298 = arith.addf %296, %297 : vector<4x8x16xf32>
    %c0_234 = arith.constant 0 : index
    %c0_235 = arith.constant 0 : index
    %c0_236 = arith.constant 0 : index
    %299 = vector.load %arg6[%c0_234, %c0_235, %c0_236] : memref<4x16x8xf32, #tpu.memory_space<vmem>>, vector<4x16x8xf32>
    "tpu.trace_start"() <{level = 10 : i32, message = "nbs,nso->nbo"}> : () -> ()
    %cst_237 = arith.constant dense<0.000000e+00> : vector<4x8x8xf32>
    %300 = tpu.matmul %298, %299, %cst_237 {dimension_numbers = #tpu.dot_dimension_numbers<[2], [1], [1], [2], [0, 0, 0, 1, 1, 2], [0], [0]>} : vector<4x8x16xf32>, vector<4x16x8xf32>, vector<4x8x8xf32> -> vector<4x8x8xf32>
    "tpu.trace_stop"() : () -> ()
    %c0_238 = arith.constant 0 : index
    %c0_239 = arith.constant 0 : index
    %c0_240 = arith.constant 0 : index
    %301 = vector.load %arg7[%c0_238, %c0_239, %c0_240] : memref<1x1x8xf32, #tpu.memory_space<vmem>>, vector<1x1x8xf32>
    %302 = vector.broadcast %301 : vector<1x1x8xf32> to vector<4x8x8xf32>
    %303 = arith.addf %300, %302 : vector<4x8x8xf32>
    %c0_241 = arith.constant 0 : index
    %c0_242 = arith.constant 0 : index
    %c0_243 = arith.constant 0 : index
    %304 = vector.load %arg8[%c0_241, %c0_242, %c0_243] : memref<4x8x8xf32, #tpu.memory_space<vmem>>, vector<4x8x8xf32>
    tpu.vector_store %arg8[%c0_241, %c0_242, %c0_243], %303 {strides = array<i32>} : memref<4x8x8xf32, #tpu.memory_space<vmem>>, vector<4x8x8xf32>,
    return
  }
}

</mosaic_0001>

<bundles_post_ra>
// kernel: _forward_jit.1
= control target key start
LH: loop header
LB: loop body
LE: loop exit
PB: predicated region body
PF: predicated region fallthrough
CT: control target
= control target key end

     0   :  { %v11453_v2 = vmov 0.0   ;;  %vm74_vm0 = vcmask 130048   ;;  %vm11454_vm1 = vmmov 0   ;;  %s13070_s0 = inlined_call_operand.vmem [shape: f32[4,8,16], index: 0, kind: input, shape index: {}]   ;;  %s13071_s1 = inlined_call_operand.vmem [shape: f32[12,4,16,8], index: 1, kind: input, shape index: {}]   ;;  %s13072_s2 = inlined_call_operand.vmem [shape: f32[12,4,1,8], index: 2, kind: input, shape index: {}]   ;;  %s13073_s3 = inlined_call_operand.vmem [shape: f32[4,4,8,16], index: 3, kind: input, shape index: {}]   ;;  %s13074_s4 = inlined_call_operand.vmem [shape: f32[4,4,16,16], index: 4, kind: input, shape index: {}]   ;;  %s13075_s5 = inlined_call_operand.vmem [shape: f32[14,4,1,16], index: 5, kind: input, shape index: {}]   ;;  %s13076_s6 = inlined_call_operand.vmem [shape: f32[4,16,8], index: 6, kind: input, shape index: {}]   ;;  %s13077_s7 = inlined_call_operand.vmem [shape: f32[1,1,8], index: 7, kind: input, shape index: {}]   ;;  %s13078_s8 = inlined_call_operand.hbm [shape: f32[4,8,8], index: 8, kind: output, shape index: {}]  }
   0x1   :  { %v39_v0 = vld [vmem:[%s13071_s1 + $0x8] sm:$0xff]  ;;  %v41_v1 = vld [vmem:[%s13071_s1 + $0x18] sm:$0xff]  ;;  %10610 = vmatprep.subr.mxu0 %v11453_v2  ;;  %10617 = vmatprep.subr.mxu1 %v11453_v2  ;;  %v38_v3 = vld [vmem:[%s13071_s1] sm:$0xff] }
   0x2   :  { %10611 = vmatpush3.msra.mxu0 %v39_v0  ;;  %10618 = vmatpush3.msra.mxu1 %v41_v1  ;;  %v40_v4 = vld [vmem:[%s13071_s1 + $0x10] sm:$0xff]  ;;  %v11522_v5 = vld [vmem:[%s13070_s0] sm:$0xff]  ;;  %v11527_v6 = vld [vmem:[%s13070_s0 + $0x8] sm:$0xff] }
   0x3   :  { %10612 = vmatprep.subr.mxu0 %v11453_v2  ;;  %10619 = vmatprep.subr.mxu1 %v11453_v2  ;;  %v43_v7 = vld [vmem:[%s13071_s1 + $0x28] sm:$0xff]  ;;  %v45_v8 = vld [vmem:[%s13071_s1 + $0x38] sm:$0xff]  ;;  %v42_v9 = vld [vmem:[%s13071_s1 + $0x20] sm:$0xff] }
   0x4   :  { %10613 = vmatpush3.msra.mxu0 %v38_v3  ;;  %10614 = vmatprep.mubr.msk.f32.mxu0 %vm11454_vm1, %v11453_v2 }
   0x5   :  { %10620 = vmatpush3.msra.mxu1 %v40_v4  ;;  %10621 = vmatprep.mubr.msk.f32.mxu1 %vm11454_vm1, %v11453_v2 }
   0x6   :  { %10615 = vmatmul.mubr.msk.f32.vlgmr.msra.gmra.mxu0 %vm74_vm0, %v11522_v5  ;;  %10622 = vmatmul.mubr.msk.f32.vlgmr.msra.gmra.mxu1 %vm74_vm0, %v11527_v6 }
   0x7   :  { %10624 = vmatprep.subr.mxu0 %v11453_v2  ;;  %10631 = vmatprep.subr.mxu1 %v11453_v2 }
   0x8   :  { %13 = vsyncpa [#allocation3], 0  ;;  %10625 = vmatpush3.msra.mxu0 %v43_v7  ;;  %10632 = vmatpush3.msra.mxu1 %v45_v8  ;;  %v44_v10 = vld [vmem:[%s13071_s1 + $0x30] sm:$0xff]  ;;  %v11561_v12 = vld [vmem:[%s13070_s0 + $0x18] sm:$0xff]  ;;  %vm1003_vm2 = vcmask 64512  }
   0x9   :  { %10626 = vmatprep.subr.mxu0 %v11453_v2  ;;  %10633 = vmatprep.subr.mxu1 %v11453_v2  ;;  %v11556_v11 = vld [vmem:[%s13070_s0 + $0x10] sm:$0xff]  ;;  %v9862_v13 = vld [vmem:[%s13071_s1 + $0x88] sm:$0xff]  ;;  %v9864_v14 = vld [vmem:[%s13071_s1 + $0x98] sm:$0xff] }
   0xa   :  { %10627 = vmatpush3.msra.mxu0 %v42_v9  ;;  %10628 = vmatprep.mubr.msk.f32.mxu0 %vm11454_vm1, %v11453_v2  ;;  %v9861_v15 = vld [vmem:[%s13071_s1 + $0x80] sm:$0xff]  ;;  %v9863_v16 = vld [vmem:[%s13071_s1 + $0x90] sm:$0xff]  ;;  %v9866_v17 = vld [vmem:[%s13071_s1 + $0xa8] sm:$0xff] }
   0xb   :  { %10634 = vmatpush3.msra.mxu1 %v44_v10  ;;  %10635 = vmatprep.mubr.msk.f32.mxu1 %vm11454_vm1, %v11453_v2  ;;  %v9868_v18 = vld [vmem:[%s13071_s1 + $0xb8] sm:$0xff]  ;;  %v9865_v19 = vld [vmem:[%s13071_s1 + $0xa0] sm:$0xff]  ;;  %v9867_v20 = vld [vmem:[%s13071_s1 + $0xb0] sm:$0xff] }
   0xc   :  { %10629 = vmatmul.mubr.msk.f32.vlgmr.msra.gmra.mxu0 %vm74_vm0, %v11556_v11  ;;  %10636 = vmatmul.mubr.msk.f32.vlgmr.msra.gmra.mxu1 %vm74_vm0, %v11561_v12  ;;  %v9882_v21 = vld [vmem:[%s13071_s1 + $0x108] sm:$0xff]  ;;  %v9881_v22 = vld [vmem:[%s13071_s1 + $0x100] sm:$0xff]  ;;  %v9884_v23 = vld [vmem:[%s13071_s1 + $0x118] sm:$0xff] }
   0xd   :  { %10638 = vmatprep.subr.mxu0 %v11453_v2  ;;  %10645 = vmatprep.subr.mxu1 %v11453_v2  ;;  %v9883_v24 = vld [vmem:[%s13071_s1 + $0x110] sm:$0xff]  ;;  %v9886_v25 = vld [vmem:[%s13071_s1 + $0x128] sm:$0xff]  ;;  %v9885_v26 = vld [vmem:[%s13071_s1 + $0x120] sm:$0xff] }
   0xe   :  { %10639 = vmatpush3.msra.mxu0 %v9862_v13  ;;  %10646 = vmatpush3.msra.mxu1 %v9864_v14  ;;  %v9888_v27 = vld [vmem:[%s13071_s1 + $0x138] sm:$0xff]  ;;  %v9887_v28 = vld [vmem:[%s13071_s1 + $0x130] sm:$0xff]  ;;  %v9873_v37 = vld [vmem:[%s13072_s2 + $0x8] ss:$0 sm:$0xff] }
   0xf   :  { %10640 = vmatprep.subr.mxu0 %v11453_v2  ;;  %10647 = vmatprep.subr.mxu1 %v11453_v2  ;;  %v9874_v38 = vld [vmem:[%s13072_s2 + $0x9] ss:$0 sm:$0xff]  ;;  %v9853_v41 = vld [vmem:[%s13072_s2] ss:$0 sm:$0xff]  ;;  %v9854_v42 = vld [vmem:[%s13072_s2 + $0x1] ss:$0 sm:$0xff] }
  0x10   :  { %10641 = vmatpush3.msra.mxu0 %v9861_v15  ;;  %10642 = vmatprep.mubr.msk.f32.mxu0 %vm11454_vm1, %v11453_v2  ;;  %v9875_v49 = vld [vmem:[%s13072_s2 + $0xa] ss:$0 sm:$0xff]  ;;  %v9876_v50 = vld [vmem:[%s13072_s2 + $0xb] ss:$0 sm:$0xff]  ;;  %v9855_v53 = vld [vmem:[%s13072_s2 + $0x2] ss:$0 sm:$0xff] }
  0x11   :  { %10648 = vmatpush3.msra.mxu1 %v9863_v16  ;;  %10649 = vmatprep.mubr.msk.f32.mxu1 %vm11454_vm1, %v11453_v2  ;;  %v9856_v54 = vld [vmem:[%s13072_s2 + $0x3] ss:$0 sm:$0xff]  ;;  %v9893_v61 = vld [vmem:[%s13072_s2 + $0x10] ss:$0 sm:$0xff]  ;;  %v9894_v1 = vld [vmem:[%s13072_s2 + $0x11] ss:$0 sm:$0xff] }
  0x12   :  { %10643 = vmatmul.mubr.msk.f32.vlgmr.msra.gmra.mxu0 %vm74_vm0, %v11522_v5  ;;  %10650 = vmatmul.mubr.msk.f32.vlgmr.msra.gmra.mxu1 %vm74_vm0, %v11527_v6 }
  0x13   :  { %10652 = vmatprep.subr.mxu0 %v11453_v2  ;;  %10659 = vmatprep.subr.mxu1 %v11453_v2 }
  0x14   :  { %10653 = vmatpush3.msra.mxu0 %v9866_v17  ;;  %10660 = vmatpush3.msra.mxu1 %v9868_v18 }
  0x15   :  { %10654 = vmatprep.subr.mxu0 %v11453_v2  ;;  %10661 = vmatprep.subr.mxu1 %v11453_v2 }
  0x16   :  { %10655 = vmatpush3.msra.mxu0 %v9865_v19  ;;  %10656 = vmatprep.mubr.msk.f32.mxu0 %vm11454_vm1, %v11453_v2 }
  0x17   :  { %10662 = vmatpush3.msra.mxu1 %v9867_v20  ;;  %10663 = vmatprep.mubr.msk.f32.mxu1 %vm11454_vm1, %v11453_v2 }
  0x18   :  { %10657 = vmatmul.mubr.msk.f32.vlgmr.msra.gmra.mxu0 %vm74_vm0, %v11556_v11  ;;  %10664 = vmatmul.mubr.msk.f32.vlgmr.msra.gmra.mxu1 %vm74_vm0, %v11561_v12 }
  0x19   :  { %10666 = vmatprep.subr.mxu0 %v11453_v2  ;;  %10673 = vmatprep.subr.mxu1 %v11453_v2 }
  0x1a   :  { %10670 = vmatprep.mubr.msk.f32.mxu0 %vm11454_vm1, %v11453_v2  ;;  %10677 = vmatprep.mubr.msk.f32.mxu1 %vm11454_vm1, %v11453_v2 }
  0x1b   :  { %10667 = vmatpush3.msra.mxu0 %v9882_v21  ;;  %10674 = vmatpush3.msra.mxu1 %v9884_v23 }
  0x1c   :  { %10668 = vmatprep.subr.mxu0 %v11453_v2  ;;  %10675 = vmatprep.subr.mxu1 %v11453_v2 }
  0x1d   :  { %10669 = vmatpush3.msra.mxu0 %v9881_v22  ;;  %10676 = vmatpush3.msra.mxu1 %v9883_v24 }
  0x1e   :  { %10671 = vmatmul.mubr.msk.f32.vlgmr.msra.gmra.mxu0 %vm74_vm0, %v11522_v5  ;;  %10680 = vmatprep.subr.mxu0 %v11453_v2 }
  0x1f   :  { %10684 = vmatprep.mubr.msk.f32.mxu0 %vm11454_vm1, %v11453_v2  ;;  %10681 = vmatpush3.msra.mxu0 %v9886_v25 }
  0x20   :  { %10678 = vmatmul.mubr.msk.f32.vlgmr.msra.gmra.mxu1 %vm74_vm0, %v11527_v6  ;;  %10682 = vmatprep.subr.mxu0 %v11453_v2 }
  0x21   :  { %10687 = vmatprep.subr.mxu1 %v11453_v2  ;;  %10683 = vmatpush3.msra.mxu0 %v9885_v26 }
  0x22   :  { %10688 = vmatpush3.msra.mxu1 %v9888_v27  ;;  %10685 = vmatmul.mubr.msk.f32.vlgmr.msra.gmra.mxu0 %vm74_vm0, %v11556_v11 }
  0x23   :  { %10689 = vmatprep.subr.mxu1 %v11453_v2  ;;  %10691 = vmatprep.mubr.msk.f32.mxu1 %vm11454_vm1, %v11453_v2 }
  0x24   :  { %10694 = vmatprep.subr.mxu0 %v11453_v2  ;;  %10696 = vmatprep.mubr.msk.f32.mxu0 %vm11454_vm1, %v11453_v2 }
  0x25   :  { %10690 = vmatpush3.msra.mxu1 %v9887_v28 }
  0x26   :  { %10692 = vmatmul.mubr.msk.f32.vlgmr.msra.gmra.mxu1 %vm74_vm0, %v11561_v12  ;;  %10699 = vmatprep.subr.mxu1 %v11453_v2 }
  0x27   :  { %10701 = vmatprep.mubr.msk.f32.mxu1 %vm11454_vm1, %v11453_v2 }
  0xc6   :  { %v144_v29 = vpop.f32.mrf.mxu0  ;;  %v217_v30 = vpop.f32.mrf.mxu1 }
  0xc7   :  { %v145_v47 = vadd.f32 %v9853_v41, %v144_v29  ;;  %v218_v48 = vadd.f32 %v9854_v42, %v217_v30 }
  0xc8   :  { %v10616_v31 = vpop.f32.mrf.mxu0  ;;  %v10623_v32 = vpop.f32.mrf.mxu1 }
  0xcc   :  { %v290_v33 = vpop.f32.mrf.mxu0  ;;  %v363_v34 = vpop.f32.mrf.mxu1 }
  0xcd   :  { %v291_v59 = vadd.f32 %v9855_v53, %v290_v33  ;;  %v364_v60 = vadd.f32 %v9856_v54, %v363_v34  ;;  %v9895_v54 = vld [vmem:[%s13072_s2 + $0x12] ss:$0 sm:$0xff] }
  0xce   :  { %v10630_v35 = vpop.f32.mrf.mxu0  ;;  %v10637_v36 = vpop.f32.mrf.mxu1 }
  0xd2   :  { %v471_v39 = vpop.f32.mrf.mxu0  ;;  %v541_v40 = vpop.f32.mrf.mxu1 }
  0xd3   :  { %v472_v43 = vadd.f32 %v9873_v37, %v471_v39  ;;  %v542_v44 = vadd.f32 %v9874_v38, %v541_v40 }
  0xd4   :  { %v10644_v45 = vpop.f32.mrf.mxu0  ;;  %v10651_v46 = vpop.f32.mrf.mxu1 }
  0xd5   :  { %10695 = vmatpush3.xpose.msk.msra.mxu0 %vm1003_vm2, %v472_v43  ;;  %10700 = vmatpush3.xpose.msk.msra.mxu1 %vm1003_vm2, %v542_v44 }
  0xd6   :  { %10704 = vmatprep.subr.mxu0 %v11453_v2  ;;  %10709 = vmatprep.subr.mxu1 %v11453_v2 }
  0xd8   :  { %v611_v51 = vpop.f32.mrf.mxu0  ;;  %v681_v52 = vpop.f32.mrf.mxu1  ;;  %10697 = vmatmul.mubr.msk.f32.vlgmr.msra.gmra.mxu0 %vm1003_vm2, %v145_v47  ;;  %10702 = vmatmul.mubr.msk.f32.vlgmr.msra.gmra.mxu1 %vm1003_vm2, %v218_v48 }
  0xd9   :  { %v612_v55 = vadd.f32 %v9875_v49, %v611_v51  ;;  %v682_v56 = vadd.f32 %v9876_v50, %v681_v52  ;;  %10706 = vmatprep.mubr.msk.f32.mxu0 %vm11454_vm1, %v11453_v2  ;;  %10711 = vmatprep.mubr.msk.f32.mxu1 %vm11454_vm1, %v11453_v2 }
  0xda   :  { %v10658_v57 = vpop.f32.mrf.mxu0  ;;  %v10665_v58 = vpop.f32.mrf.mxu1 }
  0xdb   :  { %10705 = vmatpush3.xpose.msk.msra.mxu0 %vm1003_vm2, %v612_v55  ;;  %10710 = vmatpush3.xpose.msk.msra.mxu1 %vm1003_vm2, %v682_v56  ;;  %v9896_v58 = vld [vmem:[%s13072_s2 + $0x13] ss:$0 sm:$0xff] }
  0xdc   :  { %10714 = vmatprep.subr.mxu0 %v11453_v2  ;;  %10719 = vmatprep.subr.mxu1 %v11453_v2 }
  0xde   :  { %10707 = vmatmul.mubr.msk.f32.vlgmr.msra.gmra.mxu0 %vm1003_vm2, %v291_v59  ;;  %10712 = vmatmul.mubr.msk.f32.vlgmr.msra.gmra.mxu1 %vm1003_vm2, %v364_v60  ;;  %v789_v62 = vpop.f32.mrf.mxu0 }
  0xdf   :  { %10716 = vmatprep.mubr.msk.f32.mxu0 %vm11454_vm1, %v11453_v2  ;;  %10721 = vmatprep.mubr.msk.f32.mxu1 %vm11454_vm1, %v11453_v2  ;;  %v790_v63 = vadd.f32 %v9893_v61, %v789_v62 }
  0xe0   :  { %v10672_v0 = vpop.f32.mrf.mxu0  ;;  %v859_v3 = vpop.f32.mrf.mxu1 }
  0xe1   :  { %10715 = vmatpush3.msra.mxu0 %v790_v63  ;;  %v860_v4 = vadd.f32 %v9894_v1, %v859_v3  ;;  %v1648_v3 = vld [vmem:[%s13073_s3] sm:$0xff] }
  0xe2   :  { %10724 = vmatprep.subr.mxu0 %v11453_v2  ;;  %v10679_v7 = vpop.f32.mrf.mxu1  ;;  %v11724_v8 = vpop.f32.mrf.mxu0 }
  0xe3   :  { %10720 = vmatpush3.msra.mxu1 %v860_v4  ;;  %v930_v57 = vadd.f32 %v9895_v54, %v11724_v8  ;;  %v1649_v4 = vld [vmem:[%s13073_s3 + $0x8] sm:$0xff]  ;;  %v1650_v7 = vld [vmem:[%s13073_s3 + $0x10] sm:$0xff] }
  0xe4   :  { %v10686_v9 = vpop.f32.mrf.mxu0  ;;  %10729 = vmatprep.subr.mxu1 %v11453_v2 }
  0xe6   :  { %v11727_v10 = vpop.f32.mrf.mxu1 }
  0xe7   :  { %v1000_v62 = vadd.f32 %v9896_v58, %v11727_v10  ;;  %v1651_v10 = vld [vmem:[%s13073_s3 + $0x18] sm:$0xff] }
  0xe8   :  { %v10693_v13 = vpop.f32.mrf.mxu1 }
 0x198   :  { %v1076_v14 = vpop.f32.mrf.mxu0  ;;  %v1152_v15 = vpop.f32.mrf.mxu1 }
 0x199   :  { %v1308_v16 = vmul.f32 0.35355338, %v1076_v14  ;;  %v1309_v19 = vmul.f32 0.35355338, %v1152_v15  ;;  %v9922_v14 = vld [vmem:[%s13071_s1 + $0x48] sm:$0xff] }
 0x19a   :  { %v10698_v17 = vpop.f32.mrf.mxu0  ;;  %v10703_v18 = vpop.f32.mrf.mxu1 }
 0x19b   :  { %v1312_v20 = vsel %vm1003_vm2, %v1308_v16, -inf  ;;  %v1315_v24 = vsel %vm1003_vm2, %v1309_v19, -inf  ;;  %v9921_v17 = vld [vmem:[%s13071_s1 + $0x40] sm:$0xff] }
 0x19c   :  { %1313 = vmax.xlane.f32.xlu0 %v1312_v20 }
 0x19e   :  { %v1304_v21 = vpop.f32.mrf.mxu1  ;;  %v1228_v22 = vpop.f32.mrf.mxu0 }
 0x19f   :  { %v1310_v23 = vmul.f32 0.35355338, %v1228_v22  ;;  %v1311_v27 = vmul.f32 0.35355338, %v1304_v21  ;;  %v9926_v21 = vld [vmem:[%s13071_s1 + $0x68] sm:$0xff]  ;;  %v9923_v22 = vld [vmem:[%s13071_s1 + $0x50] sm:$0xff] }
 0x1a0   :  { %v10708_v25 = vpop.f32.mrf.mxu0  ;;  %v10713_v26 = vpop.f32.mrf.mxu1  ;;  %1316 = vmax.xlane.f32.xlu0 %v1315_v24  ;;  %v9925_v24 = vld [vmem:[%s13071_s1 + $0x60] sm:$0xff] }
 0x1a1   :  { %v1318_v28 = vsel %vm1003_vm2, %v1310_v23, -inf  ;;  %v1321_v29 = vsel %vm1003_vm2, %v1311_v27, -inf  ;;  %v9928_v25 = vld [vmem:[%s13071_s1 + $0x78] sm:$0xff]  ;;  %v9942_v26 = vld [vmem:[%s13071_s1 + $0xc8] sm:$0xff] }
 0x1a2   :  { %1319 = vmax.xlane.f32.xlu1 %v1318_v28  ;;  %v9941_v28 = vld [vmem:[%s13071_s1 + $0xc0] sm:$0xff] }
 0x1a6   :  { %1322 = vmax.xlane.f32.xlu1 %v1321_v29  ;;  %v9944_v29 = vld [vmem:[%s13071_s1 + $0xd8] sm:$0xff] }
 0x225   :  { %v1314_v30 = vpop.xlane.xlu0 %1313 }
 0x226   :  { %v1324_v31 = vsub.f32 %v1308_v16, %v1314_v30  ;;  %v9946_v30 = vld [vmem:[%s13071_s1 + $0xe8] sm:$0xff] }
 0x228   :  { %v1328_v32 = vmul.f32 1.442695, %v1324_v31  ;;  %v9943_v31 = vld [vmem:[%s13071_s1 + $0xd0] sm:$0xff] }
 0x229   :  { %v1317_v33 = vpop.xlane.xlu0 %1316 }
 0x22a   :  { %11331 = vpow2.f32 %v1328_v32  ;;  %v1325_v34 = vsub.f32 %v1309_v19, %v1317_v33  ;;  %v9924_v19 = vld [vmem:[%s13071_s1 + $0x58] sm:$0xff]  ;;  %v9945_v32 = vld [vmem:[%s13071_s1 + $0xe0] sm:$0xff] }
 0x22b   :  { %v1320_v35 = vpop.xlane.xlu1 %1319  ;;  %v9948_v33 = vld [vmem:[%s13071_s1 + $0xf8] sm:$0xff] }
 0x22c   :  { %v1330_v36 = vmul.f32 1.442695, %v1325_v34  ;;  %v1326_v37 = vsub.f32 %v1310_v23, %v1320_v35  ;;  %v9947_v34 = vld [vmem:[%s13071_s1 + $0xf0] sm:$0xff]  ;;  %v9962_v35 = vld [vmem:[%s13071_s1 + $0x148] sm:$0xff] }
 0x22e   :  { %11333 = vpow2.f32 %v1330_v36  ;;  %v1332_v38 = vmul.f32 1.442695, %v1326_v37  ;;  %v9961_v36 = vld [vmem:[%s13071_s1 + $0x140] sm:$0xff]  ;;  %v9964_v37 = vld [vmem:[%s13071_s1 + $0x158] sm:$0xff] }
 0x22f   :  { %v1323_v39 = vpop.xlane.xlu1 %1322 }
 0x230   :  { %11335 = vpow2.f32 %v1332_v38  ;;  %v1327_v40 = vsub.f32 %v1311_v27, %v1323_v39  ;;  %v9927_v27 = vld [vmem:[%s13071_s1 + $0x70] sm:$0xff]  ;;  %v9966_v39 = vld [vmem:[%s13071_s1 + $0x168] sm:$0xff] }
 0x231   :  { %v9963_v38 = vld [vmem:[%s13071_s1 + $0x150] sm:$0xff] }
 0x232   :  { %v1334_v41 = vmul.f32 1.442695, %v1327_v40  ;;  %v9965_v40 = vld [vmem:[%s13071_s1 + $0x160] sm:$0xff] }
 0x234   :  { %11337 = vpow2.f32 %v1334_v41 }
 0x237   :  { %v11332_v42 = vpop.eup %11331 }
 0x238   :  { %v1336_v43 = vsel %vm1003_vm2, %v11332_v42, 0.0 }
 0x239   :  { %1337 = vadd.xlane.f32.xlu0 %v1336_v43 }
 0x23b   :  { %v11334_v44 = vpop.eup %11333 }
 0x23c   :  { %v1339_v45 = vsel %vm1003_vm2, %v11334_v44, 0.0 }
 0x23d   :  { %v11336_v46 = vpop.eup %11335  ;;  %1340 = vadd.xlane.f32.xlu1 %v1339_v45 }
 0x23e   :  { %v1342_v47 = vsel %vm1003_vm2, %v11336_v46, 0.0 }
 0x23f   :  { %1343 = vadd.xlane.f32.xlu0 %v1342_v47 }
 0x241   :  { %v11338_v48 = vpop.eup %11337 }
 0x242   :  { %v1345_v49 = vsel %vm1003_vm2, %v11338_v48, 0.0 }
 0x243   :  { %1346 = vadd.xlane.f32.xlu1 %v1345_v49 }
 0x2c2   :  { %v1338_v50 = vpop.xlane.xlu0 %1337 }
 0x2c3   :  { %11339 = vrcp.f32 %v1338_v50 }
 0x2c6   :  { %v1341_v51 = vpop.xlane.xlu1 %1340 }
 0x2c7   :  { %11341 = vrcp.f32 %v1341_v51 }
 0x2c8   :  { %v1344_v52 = vpop.xlane.xlu0 %1343 }
 0x2c9   :  { %11343 = vrcp.f32 %v1344_v52 }
 0x2cc   :  { %v1347_v53 = vpop.xlane.xlu1 %1346 }
 0x2cd   :  { %11345 = vrcp.f32 %v1347_v53  ;;  %v9953_v53 = vld [vmem:[%s13072_s2 + $0xc] ss:$0 sm:$0xff] }
 0x2d0   :  { %v11340_v55 = vpop.eup %11339 }
 0x2d1   :  { %v1349_v56 = vmul.f32 %v11340_v55, %v11332_v42 }
 0x2d3   :  { %10717 = vmatmul.mubr.msk.f32.vlgmr.msra.gmra.mxu0 %vm1003_vm2, %v1349_v56  ;;  %v9933_v56 = vld [vmem:[%s13072_s2 + $0x4] ss:$0 sm:$0xff] }
 0x2d4   :  { %v11342_v59 = vpop.eup %11341  ;;  %10725 = vmatpush3.msra.mxu0 %v930_v57  ;;  %10726 = vmatprep.mubr.msk.f32.mxu0 %vm11454_vm1, %v11453_v2 }
 0x2d5   :  { %v1351_v60 = vmul.f32 %v11342_v59, %v11334_v44  ;;  %10734 = vmatprep.subr.mxu0 %v11453_v2 }
 0x2d6   :  { %v11344_v61 = vpop.eup %11343 }
 0x2d7   :  { %10722 = vmatmul.mubr.msk.f32.vlgmr.msra.gmra.mxu1 %vm1003_vm2, %v1351_v60  ;;  %v1353_v63 = vmul.f32 %v11344_v61, %v11336_v46  ;;  %v9954_v60 = vld [vmem:[%s13072_s2 + $0xd] ss:$0 sm:$0xff] }
 0x2d8   :  { %10730 = vmatpush3.msra.mxu1 %v1000_v62  ;;  %10731 = vmatprep.mubr.msk.f32.mxu1 %vm11454_vm1, %v11453_v2  ;;  %v9955_v62 = vld [vmem:[%s13072_s2 + $0xe] ss:$0 sm:$0xff] }
 0x2d9   :  { %10727 = vmatmul.mubr.msk.f32.vlgmr.msra.gmra.mxu0 %vm1003_vm2, %v1353_v63  ;;  %10739 = vmatprep.subr.mxu1 %v11453_v2 }
 0x2da   :  { %v11346_v0 = vpop.eup %11345  ;;  %10736 = vmatprep.mubr.msk.f32.mxu0 %vm11454_vm1, %v11453_v2  ;;  %10735 = vmatpush3.msra.mxu0 %v1648_v3 }
 0x2db   :  { %v1355_v1 = vmul.f32 %v11346_v0, %v11338_v48  ;;  %10744 = vmatprep.subr.mxu0 %v11453_v2  ;;  %v9934_v0 = vld [vmem:[%s13072_s2 + $0x5] ss:$0 sm:$0xff] }
 0x2dd   :  { %10732 = vmatmul.mubr.msk.f32.vlgmr.msra.gmra.mxu1 %vm1003_vm2, %v1355_v1 }
 0x2de   :  { %10741 = vmatprep.mubr.msk.f32.mxu1 %vm11454_vm1, %v11453_v2  ;;  %10740 = vmatpush3.msra.mxu1 %v1649_v4  ;;  %v9935_v4 = vld [vmem:[%s13072_s2 + $0x6] ss:$0 sm:$0xff] }
 0x2df   :  { %10749 = vmatprep.subr.mxu1 %v11453_v2 }
 0x393   :  { %v1425_v8 = vpop.f32.mrf.mxu0 }
 0x394   :  { %10737 = vmatmul.mubr.msk.f32.vlgmr.msra.gmra.mxu0 %vm1003_vm2, %v1425_v8 }
 0x395   :  { %v10718_v9 = vpop.f32.mrf.mxu0  ;;  %10745 = vmatpush3.msra.mxu0 %v1650_v7  ;;  %10746 = vmatprep.mubr.msk.f32.mxu0 %vm11454_vm1, %v11453_v2 }
 0x396   :  { %10754 = vmatprep.subr.mxu0 %v11453_v2 }
 0x397   :  { %v1498_v13 = vpop.f32.mrf.mxu1 }
 0x398   :  { %10742 = vmatmul.mubr.msk.f32.vlgmr.msra.gmra.mxu1 %vm1003_vm2, %v1498_v13 }
 0x399   :  { %v1571_v15 = vpop.f32.mrf.mxu0  ;;  %v10723_v16 = vpop.f32.mrf.mxu1  ;;  %10750 = vmatpush3.msra.mxu1 %v1651_v10  ;;  %10751 = vmatprep.mubr.msk.f32.mxu1 %vm11454_vm1, %v11453_v2  ;;  %v9956_v10 = vld [vmem:[%s13072_s2 + $0xf] ss:$0 sm:$0xff] }
 0x39a   :  { %10747 = vmatmul.mubr.msk.f32.vlgmr.msra.gmra.mxu0 %vm1003_vm2, %v1571_v15  ;;  %10761 = vmatprep.subr.mxu1 %v11453_v2  ;;  %v9936_v16 = vld [vmem:[%s13072_s2 + $0x7] ss:$0 sm:$0xff] }
 0x39b   :  { %v10728_v18 = vpop.f32.mrf.mxu0  ;;  %10755 = vmatpush3.msra.mxu0 %v9922_v14  ;;  %10758 = vmatprep.mubr.msk.f32.mxu0 %vm11454_vm1, %v11453_v2 }
 0x39c   :  { %10756 = vmatprep.subr.mxu0 %v11453_v2 }
 0x39d   :  { %v1644_v20 = vpop.f32.mrf.mxu1  ;;  %10757 = vmatpush3.msra.mxu0 %v9921_v17 }
 0x39e   :  { %10752 = vmatmul.mubr.msk.f32.vlgmr.msra.gmra.mxu1 %vm1003_vm2, %v1644_v20  ;;  %10759 = vmatmul.mubr.msk.f32.vlgmr.msra.gmra.mxu0 %vm74_vm0, %v11522_v5  ;;  %v9973_v20 = vld [vmem:[%s13072_s2 + $0x14] ss:$0 sm:$0xff] }
 0x39f   :  { %10768 = vmatprep.subr.mxu0 %v11453_v2  ;;  %v10733_v23 = vpop.f32.mrf.mxu1  ;;  %10762 = vmatpush3.msra.mxu1 %v9924_v19 }
 0x3a0   :  { %10769 = vmatpush3.msra.mxu0 %v9926_v21  ;;  %10763 = vmatprep.subr.mxu1 %v11453_v2 }
 0x3a1   :  { %10770 = vmatprep.subr.mxu0 %v11453_v2  ;;  %10764 = vmatpush3.msra.mxu1 %v9923_v22  ;;  %v9974_v22 = vld [vmem:[%s13072_s2 + $0x15] ss:$0 sm:$0xff] }
 0x3a2   :  { %10765 = vmatprep.mubr.msk.f32.mxu1 %vm11454_vm1, %v11453_v2  ;;  %10771 = vmatpush3.msra.mxu0 %v9925_v24 }
 0x3a3   :  { %10772 = vmatprep.mubr.msk.f32.mxu0 %vm11454_vm1, %v11453_v2  ;;  %10766 = vmatmul.mubr.msk.f32.vlgmr.msra.gmra.mxu1 %vm74_vm0, %v11527_v6 }
 0x3a4   :  { %10773 = vmatmul.mubr.msk.f32.vlgmr.msra.gmra.mxu0 %vm74_vm0, %v11556_v11  ;;  %10775 = vmatprep.subr.mxu1 %v11453_v2 }
 0x3a5   :  { %10782 = vmatprep.subr.mxu0 %v11453_v2  ;;  %10776 = vmatpush3.msra.mxu1 %v9928_v25 }
 0x3a6   :  { %10783 = vmatpush3.msra.mxu0 %v9942_v26  ;;  %10777 = vmatprep.subr.mxu1 %v11453_v2 }
 0x3a7   :  { %10784 = vmatprep.subr.mxu0 %v11453_v2  ;;  %10778 = vmatpush3.msra.mxu1 %v9927_v27 }
 0x3a8   :  { %10779 = vmatprep.mubr.msk.f32.mxu1 %vm11454_vm1, %v11453_v2  ;;  %10785 = vmatpush3.msra.mxu0 %v9941_v28 }
 0x3a9   :  { %10786 = vmatprep.mubr.msk.f32.mxu0 %vm11454_vm1, %v11453_v2  ;;  %10780 = vmatmul.mubr.msk.f32.vlgmr.msra.gmra.mxu1 %vm74_vm0, %v11561_v12 }
 0x3aa   :  { %10787 = vmatmul.mubr.msk.f32.vlgmr.msra.gmra.mxu0 %vm74_vm0, %v11522_v5  ;;  %10789 = vmatprep.subr.mxu1 %v11453_v2 }
 0x3ab   :  { %10796 = vmatprep.subr.mxu0 %v11453_v2  ;;  %10790 = vmatpush3.msra.mxu1 %v9944_v29 }
 0x3ac   :  { %10797 = vmatpush3.msra.mxu0 %v9946_v30  ;;  %10791 = vmatprep.subr.mxu1 %v11453_v2 }
 0x3ad   :  { %10798 = vmatprep.subr.mxu0 %v11453_v2  ;;  %10792 = vmatpush3.msra.mxu1 %v9943_v31 }
 0x3ae   :  { %10793 = vmatprep.mubr.msk.f32.mxu1 %vm11454_vm1, %v11453_v2  ;;  %10799 = vmatpush3.msra.mxu0 %v9945_v32 }
 0x3af   :  { %10800 = vmatprep.mubr.msk.f32.mxu0 %vm11454_vm1, %v11453_v2  ;;  %10794 = vmatmul.mubr.msk.f32.vlgmr.msra.gmra.mxu1 %vm74_vm0, %v11527_v6 }
 0x3b0   :  { %10801 = vmatmul.mubr.msk.f32.vlgmr.msra.gmra.mxu0 %vm74_vm0, %v11556_v11  ;;  %10803 = vmatprep.subr.mxu1 %v11453_v2 }
 0x3b1   :  { %10804 = vmatpush3.msra.mxu1 %v9948_v33  ;;  %10807 = vmatprep.mubr.msk.f32.mxu1 %vm11454_vm1, %v11453_v2 }
 0x3b2   :  { %10805 = vmatprep.subr.mxu1 %v11453_v2  ;;  %10810 = vmatprep.subr.mxu0 %v11453_v2 }
 0x3b3   :  { %10806 = vmatpush3.msra.mxu1 %v9947_v34  ;;  %10814 = vmatprep.mubr.msk.f32.mxu0 %vm11454_vm1, %v11453_v2 }
 0x3b4   :  { %10808 = vmatmul.mubr.msk.f32.vlgmr.msra.gmra.mxu1 %vm74_vm0, %v11561_v12  ;;  %10817 = vmatprep.subr.mxu1 %v11453_v2 }
 0x3b5   :  { %10821 = vmatprep.mubr.msk.f32.mxu1 %vm11454_vm1, %v11453_v2  ;;  %10811 = vmatpush3.msra.mxu0 %v9962_v35 }
 0x3b6   :  { %10812 = vmatprep.subr.mxu0 %v11453_v2  ;;  %10818 = vmatpush3.msra.mxu1 %v9964_v37 }
 0x3b7   :  { %10813 = vmatpush3.msra.mxu0 %v9961_v36  ;;  %10819 = vmatprep.subr.mxu1 %v11453_v2 }
 0x3b8   :  { %10815 = vmatmul.mubr.msk.f32.vlgmr.msra.gmra.mxu0 %vm74_vm0, %v11522_v5  ;;  %10824 = vmatprep.subr.mxu0 %v11453_v2  ;;  %v9968_v5 = vld [vmem:[%s13071_s1 + $0x178] sm:$0xff] }
 0x3b9   :  { %10820 = vmatpush3.msra.mxu1 %v9963_v38  ;;  %10825 = vmatpush3.msra.mxu0 %v9966_v39 }
 0x3ba   :  { %10822 = vmatmul.mubr.msk.f32.vlgmr.msra.gmra.mxu1 %vm74_vm0, %v11527_v6  ;;  %10826 = vmatprep.subr.mxu0 %v11453_v2  ;;  %v9967_v6 = vld [vmem:[%s13071_s1 + $0x170] sm:$0xff] }
 0x3bb   :  { %10831 = vmatprep.subr.mxu1 %v11453_v2  ;;  %10828 = vmatprep.mubr.msk.f32.mxu0 %vm11454_vm1, %v11453_v2 }
 0x3bc   :  { %10835 = vmatprep.mubr.msk.f32.mxu1 %vm11454_vm1, %v11453_v2  ;;  %10827 = vmatpush3.msra.mxu0 %v9965_v40 }
 0x3bd   :  { %10832 = vmatpush3.msra.mxu1 %v9968_v5  ;;  %10829 = vmatmul.mubr.msk.f32.vlgmr.msra.gmra.mxu0 %vm74_vm0, %v11556_v11 }
 0x3be   :  { %10833 = vmatprep.subr.mxu1 %v11453_v2  ;;  %10838 = vmatprep.subr.mxu0 %v11453_v2 }
 0x3bf   :  { %10834 = vmatpush3.msra.mxu1 %v9967_v6  ;;  %10840 = vmatprep.mubr.msk.f32.mxu0 %vm11454_vm1, %v11453_v2 }
 0x3c0   :  { %10836 = vmatmul.mubr.msk.f32.vlgmr.msra.gmra.mxu1 %vm74_vm0, %v11561_v12  ;;  %10843 = vmatprep.subr.mxu1 %v11453_v2 }
 0x3c1   :  { %10845 = vmatprep.mubr.msk.f32.mxu1 %vm11454_vm1, %v11453_v2 }
 0x454   :  { %v11931_v41 = vpop.f32.mrf.mxu0 }
 0x456   :  { %v10738_v42 = vpop.f32.mrf.mxu0 }
 0x458   :  { %v11933_v11 = vpop.f32.mrf.mxu1 }
 0x45a   :  { %v11935_v43 = vpop.f32.mrf.mxu0  ;;  %v10743_v44 = vpop.f32.mrf.mxu1 }
 0x45c   :  { %v10748_v45 = vpop.f32.mrf.mxu0 }
 0x45e   :  { %v11937_v46 = vpop.f32.mrf.mxu1  ;;  %v2076_v12 = vpop.f32.mrf.mxu0 }
 0x45f   :  { %v2077_v61 = vadd.f32 %v9933_v56, %v2076_v12 }
 0x460   :  { %v10753_v47 = vpop.f32.mrf.mxu1  ;;  %v10760_v48 = vpop.f32.mrf.mxu0 }
 0x463   :  { %v2146_v49 = vpop.f32.mrf.mxu1 }
 0x464   :  { %v2216_v50 = vpop.f32.mrf.mxu0  ;;  %v2147_v13 = vadd.f32 %v9934_v0, %v2146_v49 }
 0x465   :  { %v10767_v51 = vpop.f32.mrf.mxu1  ;;  %v2217_v14 = vadd.f32 %v9935_v4, %v2216_v50 }
 0x466   :  { %v10774_v52 = vpop.f32.mrf.mxu0 }
 0x469   :  { %v2286_v54 = vpop.f32.mrf.mxu1 }
 0x46a   :  { %v2394_v55 = vpop.f32.mrf.mxu0  ;;  %v2287_v19 = vadd.f32 %v9936_v16, %v2286_v54 }
 0x46b   :  { %v2395_v57 = vadd.f32 %v9953_v53, %v2394_v55  ;;  %v10781_v58 = vpop.f32.mrf.mxu1 }
 0x46c   :  { %v10788_v59 = vpop.f32.mrf.mxu0 }
 0x46d   :  { %10839 = vmatpush3.xpose.msk.msra.mxu0 %vm1003_vm2, %v2395_v57 }
 0x46e   :  { %10848 = vmatprep.subr.mxu0 %v11453_v2 }
 0x46f   :  { %v2464_v63 = vpop.f32.mrf.mxu1 }
 0x470   :  { %v2465_v1 = vadd.f32 %v9954_v60, %v2464_v63  ;;  %v2534_v3 = vpop.f32.mrf.mxu0  ;;  %10841 = vmatmul.mubr.msk.f32.vlgmr.msra.gmra.mxu0 %vm1003_vm2, %v2077_v61 }
 0x471   :  { %v2535_v7 = vadd.f32 %v9955_v62, %v2534_v3  ;;  %v10795_v8 = vpop.f32.mrf.mxu1  ;;  %10850 = vmatprep.mubr.msk.f32.mxu0 %vm11454_vm1, %v11453_v2 }
 0x472   :  { %10844 = vmatpush3.xpose.msk.msra.mxu1 %vm1003_vm2, %v2465_v1  ;;  %v10802_v9 = vpop.f32.mrf.mxu0 }
 0x473   :  { %10849 = vmatpush3.xpose.msk.msra.mxu0 %vm1003_vm2, %v2535_v7  ;;  %10853 = vmatprep.subr.mxu1 %v11453_v2 }
 0x474   :  { %v2604_v15 = vpop.f32.mrf.mxu1  ;;  %10858 = vmatprep.subr.mxu0 %v11453_v2 }
 0x475   :  { %v2605_v17 = vadd.f32 %v9956_v10, %v2604_v15  ;;  %10846 = vmatmul.mubr.msk.f32.vlgmr.msra.gmra.mxu1 %vm1003_vm2, %v2147_v13  ;;  %v9975_v13 = vld [vmem:[%s13072_s2 + $0x16] ss:$0 sm:$0xff] }
 0x476   :  { %v10809_v18 = vpop.f32.mrf.mxu1  ;;  %10851 = vmatmul.mubr.msk.f32.vlgmr.msra.gmra.mxu0 %vm1003_vm2, %v2217_v14  ;;  %10855 = vmatprep.mubr.msk.f32.mxu1 %vm11454_vm1, %v11453_v2 }
 0x477   :  { %10854 = vmatpush3.xpose.msk.msra.mxu1 %vm1003_vm2, %v2605_v17  ;;  %10860 = vmatprep.mubr.msk.f32.mxu0 %vm11454_vm1, %v11453_v2  ;;  %v9976_v17 = vld [vmem:[%s13072_s2 + $0x17] ss:$0 sm:$0xff] }
 0x478   :  { %10863 = vmatprep.subr.mxu1 %v11453_v2  ;;  %v2712_v21 = vpop.f32.mrf.mxu0 }
 0x479   :  { %v2713_v23 = vadd.f32 %v9973_v20, %v2712_v21 }
 0x47a   :  { %10856 = vmatmul.mubr.msk.f32.vlgmr.msra.gmra.mxu1 %vm1003_vm2, %v2287_v19  ;;  %v10816_v24 = vpop.f32.mrf.mxu0  ;;  %v2782_v25 = vpop.f32.mrf.mxu1 }
 0x47b   :  { %10865 = vmatprep.mubr.msk.f32.mxu1 %vm11454_vm1, %v11453_v2  ;;  %v2783_v26 = vadd.f32 %v9974_v22, %v2782_v25  ;;  %10859 = vmatpush3.msra.mxu0 %v2713_v23  ;;  %v9993_v25 = vld [vmem:[%s13073_s3 + $0x20] sm:$0xff] }
 0x47c   :  { %v10823_v27 = vpop.f32.mrf.mxu1  ;;  %10868 = vmatprep.subr.mxu0 %v11453_v2 }
 0x47d   :  { %10864 = vmatpush3.msra.mxu1 %v2783_v26  ;;  %v11990_v28 = vpop.f32.mrf.mxu0  ;;  %v9994_v26 = vld [vmem:[%s13073_s3 + $0x28] sm:$0xff]  ;;  %v9995_v27 = vld [vmem:[%s13073_s3 + $0x30] sm:$0xff] }
 0x47e   :  { %10873 = vmatprep.subr.mxu1 %v11453_v2  ;;  %v2853_v16 = vadd.f32 %v9975_v13, %v11990_v28 }
 0x47f   :  { %v10830_v29 = vpop.f32.mrf.mxu0 }
 0x480   :  { %v11993_v30 = vpop.f32.mrf.mxu1 }
 0x481   :  { %v2923_v21 = vadd.f32 %v9976_v17, %v11993_v30  ;;  %v9996_v30 = vld [vmem:[%s13073_s3 + $0x38] sm:$0xff] }
 0x482   :  { %v10837_v31 = vpop.f32.mrf.mxu1 }
 0x530   :  { %v2998_v32 = vpop.f32.mrf.mxu0 }
 0x531   :  { %v3230_v33 = vmul.f32 0.35355338, %v2998_v32 }
 0x532   :  { %v10842_v34 = vpop.f32.mrf.mxu0 }
 0x533   :  { %v3234_v35 = vsel %vm1003_vm2, %v3230_v33, -inf }
 0x534   :  { %3235 = vmax.xlane.f32.xlu0 %v3234_v35 }
 0x535   :  { %v3074_v36 = vpop.f32.mrf.mxu1 }
 0x536   :  { %v3231_v37 = vmul.f32 0.35355338, %v3074_v36  ;;  %v3150_v38 = vpop.f32.mrf.mxu0 }
 0x537   :  { %v3232_v39 = vmul.f32 0.35355338, %v3150_v38  ;;  %v10847_v40 = vpop.f32.mrf.mxu1 }
 0x538   :  { %v10852_v5 = vpop.f32.mrf.mxu0  ;;  %v3237_v6 = vsel %vm1003_vm2, %v3231_v37, -inf  ;;  %v9918_v40 = vld [vmem:[%s13075_s5 + $0x1] ss:$0 sm:$0xff] }
 0x539   :  { %3238 = vmax.xlane.f32.xlu1 %v3237_v6  ;;  %v3240_v42 = vsel %vm1003_vm2, %v3232_v39, -inf  ;;  %v9919_v6 = vld [vmem:[%s13075_s5 + $0x2] ss:$0 sm:$0xff] }
 0x53a   :  { %v3226_v44 = vpop.f32.mrf.mxu1  ;;  %3241 = vmax.xlane.f32.xlu0 %v3240_v42 }
 0x53b   :  { %v3233_v45 = vmul.f32 0.35355338, %v3226_v44  ;;  %v11427_v44 = vld [vmem:[%s13070_s0] sm:$0xff] }
 0x53c   :  { %v10857_v12 = vpop.f32.mrf.mxu1 }
 0x53d   :  { %v3243_v47 = vsel %vm1003_vm2, %v3233_v45, -inf  ;;  %v1969_v12 = vadd.f32 %v9918_v40, %v11933_v11 }
 0x53e   :  { %3244 = vmax.xlane.f32.xlu1 %v3243_v47 }
 0x5bd   :  { %v3236_v48 = vpop.xlane.xlu0 %3235 }
 0x5be   :  { %v3246_v49 = vsub.f32 %v3230_v33, %v3236_v48 }
 0x5c0   :  { %v3250_v50 = vmul.f32 1.442695, %v3246_v49  ;;  %v9920_v49 = vld [vmem:[%s13075_s5 + $0x3] ss:$0 sm:$0xff] }
 0x5c2   :  { %11347 = vpow2.f32 %v3250_v50  ;;  %v3239_v51 = vpop.xlane.xlu1 %3238 }
 0x5c3   :  { %v3247_v52 = vsub.f32 %v3231_v37, %v3239_v51  ;;  %v3242_v53 = vpop.xlane.xlu0 %3241  ;;  %v9917_v37 = vld [vmem:[%s13075_s5] ss:$0 sm:$0xff] }
 0x5c4   :  { %v3248_v54 = vsub.f32 %v3232_v39, %v3242_v53  ;;  %v1968_v38 = vadd.f32 %v9917_v37, %v11931_v41  ;;  %v1970_v41 = vadd.f32 %v9919_v6, %v11935_v43  ;;  %v1971_v43 = vadd.f32 %v9920_v49, %v11937_v46  ;;  %v10010_v49 = vld [vmem:[%s13075_s5 + $0xd] ss:$0 sm:$0xff] }
 0x5c5   :  { %v3252_v55 = vmul.f32 1.442695, %v3247_v52 }
 0x5c6   :  { %v3254_v56 = vmul.f32 1.442695, %v3248_v54 }
 0x5c7   :  { %11349 = vpow2.f32 %v3252_v55  ;;  %v3245_v57 = vpop.xlane.xlu1 %3244  ;;  %v11428_v55 = vld [vmem:[%s13070_s0 + $0x8] sm:$0xff] }
 0x5c8   :  { %11351 = vpow2.f32 %v3254_v56  ;;  %v3249_v58 = vsub.f32 %v3233_v45, %v3245_v57  ;;  %v11429_v56 = vld [vmem:[%s13070_s0 + $0x10] sm:$0xff] }
 0x5ca   :  { %v3256_v59 = vmul.f32 1.442695, %v3249_v58 }
 0x5cc   :  { %11353 = vpow2.f32 %v3256_v59 }
 0x5cf   :  { %v11348_v60 = vpop.eup %11347 }
 0x5d0   :  { %v3258_v61 = vsel %vm1003_vm2, %v11348_v60, 0.0 }
 0x5d1   :  { %3259 = vadd.xlane.f32.xlu0 %v3258_v61 }
 0x5d4   :  { %v11350_v62 = vpop.eup %11349 }
 0x5d5   :  { %v11352_v63 = vpop.eup %11351  ;;  %v3261_v0 = vsel %vm1003_vm2, %v11350_v62, 0.0 }
 0x5d6   :  { %3262 = vadd.xlane.f32.xlu1 %v3261_v0  ;;  %v3264_v1 = vsel %vm1003_vm2, %v11352_v63, 0.0 }
 0x5d7   :  { %3265 = vadd.xlane.f32.xlu0 %v3264_v1 }
 0x5d9   :  { %v11354_v3 = vpop.eup %11353 }
 0x5da   :  { %v3267_v4 = vsel %vm1003_vm2, %v11354_v3, 0.0 }
 0x5db   :  { %3268 = vadd.xlane.f32.xlu1 %v3267_v4 }
 0x65a   :  { %v3260_v7 = vpop.xlane.xlu0 %3259 }
 0x65b   :  { %11355 = vrcp.f32 %v3260_v7 }
 0x65f   :  { %v3263_v8 = vpop.xlane.xlu1 %3262 }
 0x660   :  { %11357 = vrcp.f32 %v3263_v8  ;;  %v3266_v9 = vpop.xlane.xlu0 %3265 }
 0x661   :  { %11359 = vrcp.f32 %v3266_v9 }
 0x664   :  { %v3269_v10 = vpop.xlane.xlu1 %3268 }
 0x665   :  { %11361 = vrcp.f32 %v3269_v10 }
 0x668   :  { %v11356_v14 = vpop.eup %11355 }
 0x669   :  { %v3271_v15 = vmul.f32 %v11356_v14, %v11348_v60 }
 0x66b   :  { %10861 = vmatmul.mubr.msk.f32.vlgmr.msra.gmra.mxu0 %vm1003_vm2, %v3271_v15 }
 0x66c   :  { %10869 = vmatpush3.msra.mxu0 %v2853_v16  ;;  %10870 = vmatprep.mubr.msk.f32.mxu0 %vm11454_vm1, %v11453_v2 }
 0x66d   :  { %v11358_v18 = vpop.eup %11357  ;;  %10878 = vmatprep.subr.mxu0 %v11453_v2 }
 0x66e   :  { %v11360_v19 = vpop.eup %11359  ;;  %v3273_v20 = vmul.f32 %v11358_v18, %v11350_v62 }
 0x66f   :  { %v3275_v22 = vmul.f32 %v11360_v19, %v11352_v63  ;;  %v11430_v63 = vld [vmem:[%s13070_s0 + $0x18] sm:$0xff] }
 0x670   :  { %10866 = vmatmul.mubr.msk.f32.vlgmr.msra.gmra.mxu1 %vm1003_vm2, %v3273_v20 }
 0x671   :  { %10871 = vmatmul.mubr.msk.f32.vlgmr.msra.gmra.mxu0 %vm1003_vm2, %v3275_v22  ;;  %10874 = vmatpush3.msra.mxu1 %v2923_v21 }
 0x672   :  { %v11362_v23 = vpop.eup %11361  ;;  %10875 = vmatprep.mubr.msk.f32.mxu1 %vm11454_vm1, %v11453_v2  ;;  %10880 = vmatprep.mubr.msk.f32.mxu0 %vm11454_vm1, %v11453_v2 }
 0x673   :  { %v3277_v24 = vmul.f32 %v11362_v23, %v11354_v3  ;;  %10883 = vmatprep.subr.mxu1 %v11453_v2  ;;  %10879 = vmatpush3.msra.mxu0 %v9993_v25 }
 0x674   :  { %10888 = vmatprep.subr.mxu0 %v11453_v2 }
 0x675   :  { %10876 = vmatmul.mubr.msk.f32.vlgmr.msra.gmra.mxu1 %vm1003_vm2, %v3277_v24 }
 0x676   :  { %10885 = vmatprep.mubr.msk.f32.mxu1 %vm11454_vm1, %v11453_v2  ;;  %10884 = vmatpush3.msra.mxu1 %v9994_v26  ;;  %v3995_v26 = vld [vmem:[%s13074_s4 + $0x8] sm:$0xff] }
 0x677   :  { %10893 = vmatprep.subr.mxu1 %v11453_v2 }
 0x72b   :  { %v3347_v28 = vpop.f32.mrf.mxu0 }
 0x72c   :  { %10881 = vmatmul.mubr.msk.f32.vlgmr.msra.gmra.mxu0 %vm1003_vm2, %v3347_v28  ;;  %v3997_v28 = vld [vmem:[%s13074_s4 + $0x18] sm:$0xff] }
 0x72d   :  { %v10862_v29 = vpop.f32.mrf.mxu0  ;;  %10889 = vmatpush3.msra.mxu0 %v9995_v27  ;;  %10890 = vmatprep.mubr.msk.f32.mxu0 %vm11454_vm1, %v11453_v2  ;;  %v3994_v27 = vld [vmem:[%s13074_s4] sm:$0xff] }
 0x72e   :  { %10898 = vmatprep.subr.mxu0 %v11453_v2  ;;  %v3996_v29 = vld [vmem:[%s13074_s4 + $0x10] sm:$0xff] }
 0x730   :  { %v3420_v31 = vpop.f32.mrf.mxu1 }
 0x731   :  { %v3493_v32 = vpop.f32.mrf.mxu0  ;;  %10886 = vmatmul.mubr.msk.f32.vlgmr.msra.gmra.mxu1 %vm1003_vm2, %v3420_v31 }
 0x732   :  { %10891 = vmatmul.mubr.msk.f32.vlgmr.msra.gmra.mxu0 %vm1003_vm2, %v3493_v32  ;;  %v10867_v33 = vpop.f32.mrf.mxu1  ;;  %10894 = vmatpush3.msra.mxu1 %v9996_v30 }
 0x733   :  { %v10872_v34 = vpop.f32.mrf.mxu0  ;;  %10895 = vmatprep.mubr.msk.f32.mxu1 %vm11454_vm1, %v11453_v2  ;;  %10902 = vmatprep.mubr.msk.f32.mxu0 %vm11454_vm1, %v11453_v2 }
 0x734   :  { %10905 = vmatprep.subr.mxu1 %v11453_v2  ;;  %10899 = vmatpush3.msra.mxu0 %v3995_v26 }
 0x735   :  { %v3566_v35 = vpop.f32.mrf.mxu1  ;;  %10900 = vmatprep.subr.mxu0 %v11453_v2 }
 0x736   :  { %10896 = vmatmul.mubr.msk.f32.vlgmr.msra.gmra.mxu1 %vm1003_vm2, %v3566_v35  ;;  %10901 = vmatpush3.msra.mxu0 %v3994_v27  ;;  %v10024_v27 = vld [vmem:[%s13075_s5 + $0x7] ss:$0 sm:$0xff] }
 0x737   :  { %v10877_v36 = vpop.f32.mrf.mxu1  ;;  %10909 = vmatprep.mubr.msk.f32.mxu1 %vm11454_vm1, %v11453_v2  ;;  %10912 = vmatprep.subr.mxu0 %v11453_v2 }
 0x738   :  { %10906 = vmatpush3.msra.mxu1 %v3997_v28  ;;  %v10036_v28 = vld [vmem:[%s13074_s4 + $0x78] sm:$0xff] }
 0x739   :  { %10907 = vmatprep.subr.mxu1 %v11453_v2 }
 0x73a   :  { %10908 = vmatpush3.msra.mxu1 %v3996_v29 }
 0x73b   :  { %10919 = vmatprep.subr.mxu1 %v11453_v2 }
 0x7ec   :  { %v3644_v39 = vpop.f32.mrf.mxu0 }
 0x7ed   :  { %v3867_v5 = vadd.f32 %v3644_v39, %v1968_v38 }
 0x7ee   :  { %v10882_v42 = vpop.f32.mrf.mxu0 }
 0x7ef   :  { %v3871_v45 = vadd.f32 %v11427_v44, %v3867_v5  ;;  %v10009_v42 = vld [vmem:[%s13075_s5 + $0xc] ss:$0 sm:$0xff] }
 0x7f1   :  { %v3717_v47 = vpop.f32.mrf.mxu1  ;;  %v3885_v48 = vsel %vm74_vm0, %v3871_v45, 0.0 }
 0x7f2   :  { %v3868_v50 = vadd.f32 %v3717_v47, %v1969_v12  ;;  %v3790_v51 = vpop.f32.mrf.mxu0  ;;  %3886 = vadd.xlane.f32.xlu0 %v3885_v48  ;;  %v3999_v48 = vld [vmem:[%s13074_s4 + $0x28] sm:$0xff] }
 0x7f3   :  { %v3869_v52 = vadd.f32 %v3790_v51, %v1970_v41  ;;  %v10887_v53 = vpop.f32.mrf.mxu1 }
 0x7f4   :  { %v10892_v54 = vpop.f32.mrf.mxu0  ;;  %v3872_v11 = vadd.f32 %v11428_v55, %v3868_v50  ;;  %v10014_v55 = vld [vmem:[%s13075_s5 + $0x11] ss:$0 sm:$0xff] }
 0x7f5   :  { %v3873_v57 = vadd.f32 %v11429_v56, %v3869_v52  ;;  %v10011_v52 = vld [vmem:[%s13075_s5 + $0xe] ss:$0 sm:$0xff]  ;;  %v3998_v54 = vld [vmem:[%s13074_s4 + $0x20] sm:$0xff] }
 0x7f6   :  { %v3863_v58 = vpop.f32.mrf.mxu1  ;;  %v3888_v59 = vsel %vm74_vm0, %v3872_v11, 0.0 }
 0x7f7   :  { %v3870_v60 = vadd.f32 %v3863_v58, %v1971_v43  ;;  %3889 = vadd.xlane.f32.xlu1 %v3888_v59  ;;  %v3891_v61 = vsel %vm74_vm0, %v3873_v57, 0.0  ;;  %v10015_v43 = vld [vmem:[%s13075_s5 + $0x12] ss:$0 sm:$0xff]  ;;  %v4001_v59 = vld [vmem:[%s13074_s4 + $0x38] sm:$0xff] }
 0x7f8   :  { %v10897_v62 = vpop.f32.mrf.mxu1  ;;  %3892 = vadd.xlane.f32.xlu0 %v3891_v61 }
 0x7f9   :  { %v3874_v0 = vadd.f32 %v11430_v63, %v3870_v60  ;;  %v10012_v60 = vld [vmem:[%s13075_s5 + $0xf] ss:$0 sm:$0xff]  ;;  %v4000_v63 = vld [vmem:[%s13074_s4 + $0x30] sm:$0xff] }
 0x7fb   :  { %v3894_v46 = vsel %vm74_vm0, %v3874_v0, 0.0 }
 0x7fc   :  { %3895 = vadd.xlane.f32.xlu1 %v3894_v46 }
 0x87b   :  { %v3887_v1 = vpop.xlane.xlu0 %3886 }
 0x87c   :  { %v3898_v3 = vmul.f32 0.0625, %v3887_v1 }
 0x87e   :  { %v3902_v4 = vsub.f32 %v3871_v45, %v3898_v3  ;;  %v10013_v45 = vld [vmem:[%s13075_s5 + $0x10] ss:$0 sm:$0xff]  ;;  %v10030_v3 = vld [vmem:[%s13074_s4 + $0x48] sm:$0xff] }
 0x880   :  { %v3890_v7 = vpop.xlane.xlu1 %3889  ;;  %v3906_v8 = vmul.f32 %v3902_v4, %v3902_v4 }
 0x881   :  { %v3899_v9 = vmul.f32 0.0625, %v3890_v7  ;;  %v3893_v10 = vpop.xlane.xlu0 %3892  ;;  %v10032_v7 = vld [vmem:[%s13074_s4 + $0x58] sm:$0xff] }
 0x882   :  { %v3900_v13 = vmul.f32 0.0625, %v3893_v10  ;;  %v3910_v14 = vsel %vm74_vm0, %v3906_v8, 0.0  ;;  %v10031_v8 = vld [vmem:[%s13074_s4 + $0x50] sm:$0xff] }
 0x883   :  { %v3903_v15 = vsub.f32 %v3872_v11, %v3899_v9  ;;  %3911 = vadd.xlane.f32.xlu0 %v3910_v14  ;;  %v10021_v9 = vld [vmem:[%s13075_s5 + $0x4] ss:$0 sm:$0xff] }
 0x884   :  { %v3904_v16 = vsub.f32 %v3873_v57, %v3900_v13 }
 0x885   :  { %v3896_v17 = vpop.xlane.xlu1 %3895  ;;  %v3907_v18 = vmul.f32 %v3903_v15, %v3903_v15 }
 0x886   :  { %v3901_v19 = vmul.f32 0.0625, %v3896_v17  ;;  %v3908_v20 = vmul.f32 %v3904_v16, %v3904_v16  ;;  %v10034_v17 = vld [vmem:[%s13074_s4 + $0x68] sm:$0xff] }
 0x887   :  { %v3913_v21 = vsel %vm74_vm0, %v3907_v18, 0.0  ;;  %v10023_v18 = vld [vmem:[%s13075_s5 + $0x6] ss:$0 sm:$0xff] }
 0x888   :  { %v3905_v22 = vsub.f32 %v3874_v0, %v3901_v19  ;;  %3914 = vadd.xlane.f32.xlu1 %v3913_v21  ;;  %v3916_v23 = vsel %vm74_vm0, %v3908_v20, 0.0  ;;  %v10016_v0 = vld [vmem:[%s13075_s5 + $0x13] ss:$0 sm:$0xff]  ;;  %v10033_v20 = vld [vmem:[%s13074_s4 + $0x60] sm:$0xff] }
 0x889   :  { %3917 = vadd.xlane.f32.xlu0 %v3916_v23 }
 0x88a   :  { %v3909_v24 = vmul.f32 %v3905_v22, %v3905_v22 }
 0x88c   :  { %v3919_v25 = vsel %vm74_vm0, %v3909_v24, 0.0 }
 0x88d   :  { %3920 = vadd.xlane.f32.xlu1 %v3919_v25 }
 0x90c   :  { %v3912_v30 = vpop.xlane.xlu0 %3911 }
 0x90d   :  { %v3922_v31 = vmul.f32 0.0625, %v3912_v30 }
 0x90f   :  { %v3926_v32 = vadd.f32 1e-05, %v3922_v31  ;;  %v10035_v31 = vld [vmem:[%s13074_s4 + $0x70] sm:$0xff] }
 0x911   :  { %11363 = vrsqrt.f32 %v3926_v32  ;;  %v3915_v33 = vpop.xlane.xlu1 %3914 }
 0x912   :  { %v3923_v34 = vmul.f32 0.0625, %v3915_v33  ;;  %v3918_v35 = vpop.xlane.xlu0 %3917 }
 0x913   :  { %v3924_v36 = vmul.f32 0.0625, %v3918_v35  ;;  %v10041_v35 = vld [vmem:[%s13075_s5 + $0x8] ss:$0 sm:$0xff] }
 0x914   :  { %v3927_v37 = vadd.f32 1e-05, %v3923_v34 }
 0x915   :  { %v3928_v38 = vadd.f32 1e-05, %v3924_v36 }
 0x916   :  { %11365 = vrsqrt.f32 %v3927_v37  ;;  %v3921_v39 = vpop.xlane.xlu1 %3920 }
 0x917   :  { %11367 = vrsqrt.f32 %v3928_v38  ;;  %v3925_v40 = vmul.f32 0.0625, %v3921_v39  ;;  %v10042_v39 = vld [vmem:[%s13075_s5 + $0x9] ss:$0 sm:$0xff] }
 0x919   :  { %v3929_v5 = vadd.f32 1e-05, %v3925_v40 }
 0x91b   :  { %11369 = vrsqrt.f32 %v3929_v5  ;;  %v10043_v5 = vld [vmem:[%s13075_s5 + $0xa] ss:$0 sm:$0xff] }
 0x91e   :  { %v11364_v6 = vpop.eup %11363 }
 0x91f   :  { %v3934_v44 = vmul.f32 %v11364_v6, %v3902_v4  ;;  %v10029_v4 = vld [vmem:[%s13074_s4 + $0x40] sm:$0xff] }
 0x921   :  { %v3962_v12 = vmul.f32 %v10009_v42, %v3934_v44 }
 0x923   :  { %v11366_v41 = vpop.eup %11365  ;;  %v12111_v47 = vadd.f32 %v10013_v45, %v3962_v12 }
 0x924   :  { %v11368_v50 = vpop.eup %11367  ;;  %v3935_v51 = vmul.f32 %v11366_v41, %v3903_v15 }
 0x925   :  { %v3936_v53 = vmul.f32 %v11368_v50, %v3904_v16  ;;  %10903 = vmatmul.mubr.msk.f32.vlgmr.msra.gmra.mxu0 %vm74_vm0, %v12111_v47  ;;  %v10022_v16 = vld [vmem:[%s13075_s5 + $0x5] ss:$0 sm:$0xff] }
 0x926   :  { %10913 = vmatpush3.msra.mxu0 %v3999_v48  ;;  %10916 = vmatprep.mubr.msk.f32.mxu0 %vm11454_vm1, %v11453_v2  ;;  %v3963_v11 = vmul.f32 %v10010_v49, %v3935_v51  ;;  %v10044_v49 = vld [vmem:[%s13075_s5 + $0xb] ss:$0 sm:$0xff] }
 0x927   :  { %10914 = vmatprep.subr.mxu0 %v11453_v2  ;;  %v3964_v56 = vmul.f32 %v10011_v52, %v3936_v53 }
 0x928   :  { %v11370_v57 = vpop.eup %11369  ;;  %10915 = vmatpush3.msra.mxu0 %v3998_v54  ;;  %v12136_v58 = vadd.f32 %v10014_v55, %v3963_v11 }
 0x929   :  { %v3937_v61 = vmul.f32 %v11370_v57, %v3905_v22  ;;  %v12144_v62 = vadd.f32 %v10015_v43, %v3964_v56  ;;  %10926 = vmatprep.subr.mxu0 %v11453_v2 }
 0x92a   :  { %10910 = vmatmul.mubr.msk.f32.vlgmr.msra.gmra.mxu1 %vm74_vm0, %v12136_v58 }
 0x92b   :  { %10917 = vmatmul.mubr.msk.f32.vlgmr.msra.gmra.mxu0 %vm74_vm0, %v12144_v62  ;;  %10920 = vmatpush3.msra.mxu1 %v4001_v59  ;;  %v3965_v46 = vmul.f32 %v10012_v60, %v3937_v61 }
 0x92c   :  { %10921 = vmatprep.subr.mxu1 %v11453_v2  ;;  %10923 = vmatprep.mubr.msk.f32.mxu1 %vm11454_vm1, %v11453_v2 }
 0x92d   :  { %10922 = vmatpush3.msra.mxu1 %v4000_v63  ;;  %v12160_v1 = vadd.f32 %v10016_v0, %v3965_v46  ;;  %10930 = vmatprep.mubr.msk.f32.mxu0 %vm11454_vm1, %v11453_v2 }
 0x92e   :  { %10933 = vmatprep.subr.mxu1 %v11453_v2  ;;  %10927 = vmatpush3.msra.mxu0 %v10030_v3 }
 0x92f   :  { %10924 = vmatmul.mubr.msk.f32.vlgmr.msra.gmra.mxu1 %vm74_vm0, %v12160_v1  ;;  %10928 = vmatprep.subr.mxu0 %v11453_v2 }
 0x930   :  { %10937 = vmatprep.mubr.msk.f32.mxu1 %vm11454_vm1, %v11453_v2  ;;  %10929 = vmatpush3.msra.mxu0 %v10029_v4 }
 0x931   :  { %10940 = vmatprep.subr.mxu0 %v11453_v2  ;;  %10934 = vmatpush3.msra.mxu1 %v10032_v7 }
 0x932   :  { %10935 = vmatprep.subr.mxu1 %v11453_v2 }
 0x933   :  { %10936 = vmatpush3.msra.mxu1 %v10031_v8 }
 0x934   :  { %10947 = vmatprep.subr.mxu1 %v11453_v2 }
 0x9e5   :  { %v4100_v10 = vpop.f32.mrf.mxu0 }
 0x9e6   :  { %v4101_v13 = vadd.f32 %v10021_v9, %v4100_v10 }
 0x9e7   :  { %v10904_v14 = vpop.f32.mrf.mxu0 }
 0x9e8   :  { %v4323_v15 = vmax.f32 %v4101_v13, 0.0 }
 0x9ea   :  { %v4173_v19 = vpop.f32.mrf.mxu1  ;;  %10931 = vmatmul.mubr.msk.f32.vlgmr.msra.gmra.mxu0 %vm74_vm0, %v4323_v15 }
 0x9eb   :  { %v4174_v21 = vadd.f32 %v10022_v16, %v4173_v19  ;;  %v4246_v22 = vpop.f32.mrf.mxu0  ;;  %10941 = vmatpush3.msra.mxu0 %v10034_v17  ;;  %10944 = vmatprep.mubr.msk.f32.mxu0 %vm11454_vm1, %v11453_v2  ;;  %v10070_v16 = vld [vmem:[%s13071_s1 + $0x188] sm:$0xff]  ;;  %v10069_v17 = vld [vmem:[%s13071_s1 + $0x180] sm:$0xff]  ;;  %v10071_v19 = vld [vmem:[%s13071_s1 + $0x190] sm:$0xff] }
 0x9ec   :  { %v4247_v23 = vadd.f32 %v10023_v18, %v4246_v22  ;;  %v10911_v24 = vpop.f32.mrf.mxu1  ;;  %10942 = vmatprep.subr.mxu0 %v11453_v2  ;;  %v10072_v18 = vld [vmem:[%s13071_s1 + $0x198] sm:$0xff] }
 0x9ed   :  { %v4324_v25 = vmax.f32 %v4174_v21, 0.0  ;;  %v10918_v26 = vpop.f32.mrf.mxu0  ;;  %10943 = vmatpush3.msra.mxu0 %v10033_v20 }
 0x9ee   :  { %v4325_v29 = vmax.f32 %v4247_v23, 0.0  ;;  %10954 = vmatprep.subr.mxu0 %v11453_v2 }
 0x9ef   :  { %v4319_v30 = vpop.f32.mrf.mxu1  ;;  %10938 = vmatmul.mubr.msk.f32.vlgmr.msra.gmra.mxu1 %vm74_vm0, %v4324_v25 }
 0x9f0   :  { %v4320_v32 = vadd.f32 %v10024_v27, %v4319_v30  ;;  %10945 = vmatmul.mubr.msk.f32.vlgmr.msra.gmra.mxu0 %vm74_vm0, %v4325_v29  ;;  %10948 = vmatpush3.msra.mxu1 %v10036_v28 }
 0x9f1   :  { %v10925_v33 = vpop.f32.mrf.mxu1  ;;  %10949 = vmatprep.subr.mxu1 %v11453_v2  ;;  %10951 = vmatprep.mubr.msk.f32.mxu1 %vm11454_vm1, %v11453_v2 }
 0x9f2   :  { %v4326_v34 = vmax.f32 %v4320_v32, 0.0  ;;  %10950 = vmatpush3.msra.mxu1 %v10035_v31  ;;  %10958 = vmatprep.mubr.msk.f32.mxu0 %vm11454_vm1, %v11453_v2  ;;  %v10057_v33 = vld [vmem:[%s13075_s5 + $0x14] ss:$0 sm:$0xff] }
 0x9f3   :  { %10961 = vmatprep.subr.mxu1 %v11453_v2  ;;  %10955 = vmatpush3.msra.mxu0 %v10070_v16 }
 0x9f4   :  { %10952 = vmatmul.mubr.msk.f32.vlgmr.msra.gmra.mxu1 %vm74_vm0, %v4326_v34  ;;  %10956 = vmatprep.subr.mxu0 %v11453_v2 }
 0x9f5   :  { %10965 = vmatprep.mubr.msk.f32.mxu1 %vm11454_vm1, %v11453_v2  ;;  %10957 = vmatpush3.msra.mxu0 %v10069_v17 }
 0x9f6   :  { %10968 = vmatprep.subr.mxu0 %v11453_v2  ;;  %10962 = vmatpush3.msra.mxu1 %v10072_v18 }
 0x9f7   :  { %10963 = vmatprep.subr.mxu1 %v11453_v2 }
 0x9f8   :  { %10964 = vmatpush3.msra.mxu1 %v10071_v19  ;;  %v10101_v19 = vld [vmem:[%s13072_s2 + $0x20] ss:$0 sm:$0xff] }
 0x9f9   :  { %10975 = vmatprep.subr.mxu1 %v11453_v2 }
 0xaaa   :  { %v4434_v36 = vpop.f32.mrf.mxu0 }
 0xaab   :  { %v4435_v37 = vadd.f32 %v10041_v35, %v4434_v36  ;;  %v10061_v35 = vld [vmem:[%s13075_s5 + $0x18] ss:$0 sm:$0xff] }
 0xaac   :  { %v10932_v38 = vpop.f32.mrf.mxu0 }
 0xaad   :  { %v4657_v40 = vadd.f32 %v4435_v37, %v12111_v47 }
 0xaaf   :  { %v4507_v6 = vpop.f32.mrf.mxu1  ;;  %v4671_v42 = vsel %vm74_vm0, %v4657_v40, 0.0 }
 0xab0   :  { %v4508_v44 = vadd.f32 %v10042_v39, %v4507_v6  ;;  %v4580_v45 = vpop.f32.mrf.mxu0  ;;  %4672 = vadd.xlane.f32.xlu0 %v4671_v42  ;;  %v10058_v39 = vld [vmem:[%s13075_s5 + $0x15] ss:$0 sm:$0xff]  ;;  %v10059_v42 = vld [vmem:[%s13075_s5 + $0x16] ss:$0 sm:$0xff] }
 0xab1   :  { %v4581_v12 = vadd.f32 %v10043_v5, %v4580_v45  ;;  %v10939_v41 = vpop.f32.mrf.mxu1 }
 0xab2   :  { %v10946_v48 = vpop.f32.mrf.mxu0  ;;  %v4658_v50 = vadd.f32 %v4508_v44, %v12136_v58  ;;  %v10062_v44 = vld [vmem:[%s13075_s5 + $0x19] ss:$0 sm:$0xff] }
 0xab3   :  { %v4659_v47 = vadd.f32 %v4581_v12, %v12144_v62  ;;  %v10073_v12 = vld [vmem:[%s13071_s1 + $0x1a0] sm:$0xff]  ;;  %v10063_v48 = vld [vmem:[%s13075_s5 + $0x1a] ss:$0 sm:$0xff] }
 0xab4   :  { %v4653_v51 = vpop.f32.mrf.mxu1  ;;  %v4674_v52 = vsel %vm74_vm0, %v4658_v50, 0.0 }
 0xab5   :  { %v4654_v53 = vadd.f32 %v10044_v49, %v4653_v51  ;;  %4675 = vadd.xlane.f32.xlu1 %v4674_v52  ;;  %v4677_v54 = vsel %vm74_vm0, %v4659_v47, 0.0  ;;  %v10060_v51 = vld [vmem:[%s13075_s5 + $0x17] ss:$0 sm:$0xff]  ;;  %v10076_v52 = vld [vmem:[%s13071_s1 + $0x1b8] sm:$0xff] }
 0xab6   :  { %v10953_v55 = vpop.f32.mrf.mxu1  ;;  %4678 = vadd.xlane.f32.xlu0 %v4677_v54 }
 0xab7   :  { %v4660_v11 = vadd.f32 %v4654_v53, %v12160_v1  ;;  %v10090_v55 = vld [vmem:[%s13071_s1 + $0x208] sm:$0xff] }
 0xab9   :  { %v4680_v43 = vsel %vm74_vm0, %v4660_v11, 0.0 }
 0xaba   :  { %4681 = vadd.xlane.f32.xlu1 %v4680_v43  ;;  %v10075_v43 = vld [vmem:[%s13071_s1 + $0x1b0] sm:$0xff] }
 0xb39   :  { %v4673_v56 = vpop.xlane.xlu0 %4672 }
 0xb3a   :  { %v4683_v57 = vmul.f32 0.0625, %v4673_v56 }
 0xb3c   :  { %v4687_v59 = vsub.f32 %v4657_v40, %v4683_v57  ;;  %v10074_v40 = vld [vmem:[%s13071_s1 + $0x1a8] sm:$0xff]  ;;  %v10089_v57 = vld [vmem:[%s13071_s1 + $0x200] sm:$0xff] }
 0xb3e   :  { %v4676_v58 = vpop.xlane.xlu1 %4675  ;;  %v4691_v60 = vmul.f32 %v4687_v59, %v4687_v59 }
 0xb3f   :  { %v4684_v61 = vmul.f32 0.0625, %v4676_v58  ;;  %v4679_v62 = vpop.xlane.xlu0 %4678  ;;  %v10092_v58 = vld [vmem:[%s13071_s1 + $0x218] sm:$0xff] }
 0xb40   :  { %v4685_v63 = vmul.f32 0.0625, %v4679_v62  ;;  %v4695_v0 = vsel %vm74_vm0, %v4691_v60, 0.0  ;;  %v10094_v60 = vld [vmem:[%s13071_s1 + $0x228] sm:$0xff]  ;;  %v10093_v62 = vld [vmem:[%s13071_s1 + $0x220] sm:$0xff] }
 0xb41   :  { %v4688_v46 = vsub.f32 %v4658_v50, %v4684_v61  ;;  %4696 = vadd.xlane.f32.xlu0 %v4695_v0  ;;  %v10091_v61 = vld [vmem:[%s13071_s1 + $0x210] sm:$0xff]  ;;  %v10110_v0 = vld [vmem:[%s13071_s1 + $0x288] sm:$0xff] }
 0xb42   :  { %v4689_v3 = vsub.f32 %v4659_v47, %v4685_v63  ;;  %v10096_v63 = vld [vmem:[%s13071_s1 + $0x238] sm:$0xff] }
 0xb43   :  { %v4682_v4 = vpop.xlane.xlu1 %4681  ;;  %v4692_v7 = vmul.f32 %v4688_v46, %v4688_v46 }
 0xb44   :  { %v4686_v8 = vmul.f32 0.0625, %v4682_v4  ;;  %v4693_v1 = vmul.f32 %v4689_v3, %v4689_v3  ;;  %v10112_v4 = vld [vmem:[%s13071_s1 + $0x298] sm:$0xff] }
 0xb45   :  { %v4698_v9 = vsel %vm74_vm0, %v4692_v7, 0.0  ;;  %v10114_v7 = vld [vmem:[%s13071_s1 + $0x2a8] sm:$0xff] }
 0xb46   :  { %v12247_v10 = vsub.f32 %v4660_v11, %v4686_v8  ;;  %4699 = vadd.xlane.f32.xlu1 %v4698_v9  ;;  %v4701_v13 = vsel %vm74_vm0, %v4693_v1, 0.0  ;;  %v10064_v11 = vld [vmem:[%s13075_s5 + $0x1b] ss:$0 sm:$0xff]  ;;  %v10111_v8 = vld [vmem:[%s13071_s1 + $0x290] sm:$0xff]  ;;  %v10113_v1 = vld [vmem:[%s13071_s1 + $0x2a0] sm:$0xff] }
 0xb47   :  { %4702 = vadd.xlane.f32.xlu0 %v4701_v13  ;;  %v10116_v9 = vld [vmem:[%s13071_s1 + $0x2b8] sm:$0xff] }
 0xb48   :  { %v4694_v14 = vmul.f32 %v12247_v10, %v12247_v10 }
 0xb4a   :  { %v4704_v15 = vsel %vm74_vm0, %v4694_v14, 0.0 }
 0xb4b   :  { %4705 = vadd.xlane.f32.xlu1 %v4704_v15 }
 0xbca   :  { %v4697_v20 = vpop.xlane.xlu0 %4696 }
 0xbcb   :  { %v4707_v21 = vmul.f32 0.0625, %v4697_v20 }
 0xbcd   :  { %v4711_v22 = vadd.f32 1e-05, %v4707_v21 }
 0xbcf   :  { %11371 = vrsqrt.f32 %v4711_v22  ;;  %v4700_v23 = vpop.xlane.xlu1 %4699  ;;  %v10081_v22 = vld [vmem:[%s13072_s2 + $0x18] ss:$0 sm:$0xff] }
 0xbd0   :  { %v4708_v24 = vmul.f32 0.0625, %v4700_v23  ;;  %v4703_v25 = vpop.xlane.xlu0 %4702 }
 0xbd1   :  { %v4709_v26 = vmul.f32 0.0625, %v4703_v25 }
 0xbd2   :  { %v4712_v27 = vadd.f32 1e-05, %v4708_v24 }
 0xbd3   :  { %v4713_v28 = vadd.f32 1e-05, %v4709_v26  ;;  %v10102_v26 = vld [vmem:[%s13072_s2 + $0x21] ss:$0 sm:$0xff] }
 0xbd4   :  { %11373 = vrsqrt.f32 %v4712_v27  ;;  %v4706_v29 = vpop.xlane.xlu1 %4705 }
 0xbd5   :  { %11375 = vrsqrt.f32 %v4713_v28  ;;  %v4710_v30 = vmul.f32 0.0625, %v4706_v29  ;;  %v10103_v28 = vld [vmem:[%s13072_s2 + $0x22] ss:$0 sm:$0xff] }
 0xbd7   :  { %v4714_v31 = vadd.f32 1e-05, %v4710_v30  ;;  %v10082_v30 = vld [vmem:[%s13072_s2 + $0x19] ss:$0 sm:$0xff] }
 0xbd9   :  { %11377 = vrsqrt.f32 %v4714_v31 }
 0xbdc   :  { %v11372_v32 = vpop.eup %11371 }
 0xbdd   :  { %v4719_v34 = vmul.f32 %v11372_v32, %v4687_v59 }
 0xbdf   :  { %v4747_v36 = vmul.f32 %v10057_v33, %v4719_v34  ;;  %v10083_v33 = vld [vmem:[%s13072_s2 + $0x1a] ss:$0 sm:$0xff] }
 0xbe1   :  { %v11374_v37 = vpop.eup %11373  ;;  %v12275_v38 = vadd.f32 %v10061_v35, %v4747_v36 }
 0xbe2   :  { %v11376_v5 = vpop.eup %11375  ;;  %v4720_v6 = vmul.f32 %v11374_v37, %v4688_v46  ;;  %v10095_v46 = vld [vmem:[%s13071_s1 + $0x230] sm:$0xff] }
 0xbe3   :  { %v4721_v45 = vmul.f32 %v11376_v5, %v4689_v3  ;;  %10959 = vmatmul.mubr.msk.f32.vlgmr.msra.gmra.mxu0 %vm74_vm0, %v12275_v38  ;;  %v10109_v3 = vld [vmem:[%s13071_s1 + $0x280] sm:$0xff]  ;;  %v10121_v5 = vld [vmem:[%s13072_s2 + $0x28] ss:$0 sm:$0xff] }
 0xbe4   :  { %v4748_v41 = vmul.f32 %v10058_v39, %v4720_v6  ;;  %10969 = vmatpush3.msra.mxu0 %v10074_v40  ;;  %10972 = vmatprep.mubr.msk.f32.mxu0 %vm11454_vm1, %v11453_v2  ;;  %v10104_v39 = vld [vmem:[%s13072_s2 + $0x23] ss:$0 sm:$0xff] }
 0xbe5   :  { %v4749_v49 = vmul.f32 %v10059_v42, %v4721_v45  ;;  %10970 = vmatprep.subr.mxu0 %v11453_v2  ;;  %v10084_v42 = vld [vmem:[%s13072_s2 + $0x1b] ss:$0 sm:$0xff] }
 0xbe6   :  { %v11378_v50 = vpop.eup %11377  ;;  %v12300_v47 = vadd.f32 %v10062_v44, %v4748_v41  ;;  %10971 = vmatpush3.msra.mxu0 %v10073_v12 }
 0xbe7   :  { %v12308_v53 = vadd.f32 %v10063_v48, %v4749_v49  ;;  %v4722_v54 = vmul.f32 %v11378_v50, %v12247_v10  ;;  %10982 = vmatprep.subr.mxu0 %v11453_v2  ;;  %v10115_v10 = vld [vmem:[%s13071_s1 + $0x2b0] sm:$0xff]  ;;  %v10122_v50 = vld [vmem:[%s13072_s2 + $0x29] ss:$0 sm:$0xff] }
 0xbe8   :  { %10966 = vmatmul.mubr.msk.f32.vlgmr.msra.gmra.mxu1 %vm74_vm0, %v12300_v47 }
 0xbe9   :  { %v4750_v56 = vmul.f32 %v10060_v51, %v4722_v54  ;;  %10973 = vmatmul.mubr.msk.f32.vlgmr.msra.gmra.mxu0 %vm74_vm0, %v12308_v53  ;;  %10976 = vmatpush3.msra.mxu1 %v10076_v52 }
 0xbea   :  { %10983 = vmatpush3.msra.mxu0 %v10090_v55  ;;  %10977 = vmatprep.subr.mxu1 %v11453_v2 }
 0xbeb   :  { %v12329_v59 = vadd.f32 %v10064_v11, %v4750_v56  ;;  %10984 = vmatprep.subr.mxu0 %v11453_v2  ;;  %10978 = vmatpush3.msra.mxu1 %v10075_v43 }
 0xbec   :  { %10979 = vmatprep.mubr.msk.f32.mxu1 %vm11454_vm1, %v11453_v2  ;;  %10985 = vmatpush3.msra.mxu0 %v10089_v57 }
 0xbed   :  { %10986 = vmatprep.mubr.msk.f32.mxu0 %vm11454_vm1, %v11453_v2  ;;  %10980 = vmatmul.mubr.msk.f32.vlgmr.msra.gmra.mxu1 %vm74_vm0, %v12329_v59 }
 0xbee   :  { %10987 = vmatmul.mubr.msk.f32.vlgmr.msra.gmra.mxu0 %vm74_vm0, %v12275_v38  ;;  %10989 = vmatprep.subr.mxu1 %v11453_v2 }
 0xbef   :  { %10996 = vmatprep.subr.mxu0 %v11453_v2  ;;  %10990 = vmatpush3.msra.mxu1 %v10092_v58 }
 0xbf0   :  { %10997 = vmatpush3.msra.mxu0 %v10094_v60  ;;  %10991 = vmatprep.subr.mxu1 %v11453_v2 }
 0xbf1   :  { %10998 = vmatprep.subr.mxu0 %v11453_v2  ;;  %10992 = vmatpush3.msra.mxu1 %v10091_v61 }
 0xbf2   :  { %10993 = vmatprep.mubr.msk.f32.mxu1 %vm11454_vm1, %v11453_v2  ;;  %10999 = vmatpush3.msra.mxu0 %v10093_v62 }
 0xbf3   :  { %11000 = vmatprep.mubr.msk.f32.mxu0 %vm11454_vm1, %v11453_v2  ;;  %10994 = vmatmul.mubr.msk.f32.vlgmr.msra.gmra.mxu1 %vm74_vm0, %v12300_v47 }
 0xbf4   :  { %11001 = vmatmul.mubr.msk.f32.vlgmr.msra.gmra.mxu0 %vm74_vm0, %v12308_v53  ;;  %11003 = vmatprep.subr.mxu1 %v11453_v2 }
 0xbf5   :  { %11010 = vmatprep.subr.mxu0 %v11453_v2  ;;  %11004 = vmatpush3.msra.mxu1 %v10096_v63 }
 0xbf6   :  { %11011 = vmatpush3.msra.mxu0 %v10110_v0  ;;  %11005 = vmatprep.subr.mxu1 %v11453_v2 }
 0xbf7   :  { %11012 = vmatprep.subr.mxu0 %v11453_v2  ;;  %11006 = vmatpush3.msra.mxu1 %v10095_v46 }
 0xbf8   :  { %11007 = vmatprep.mubr.msk.f32.mxu1 %vm11454_vm1, %v11453_v2  ;;  %11013 = vmatpush3.msra.mxu0 %v10109_v3 }
 0xbf9   :  { %11014 = vmatprep.mubr.msk.f32.mxu0 %vm11454_vm1, %v11453_v2  ;;  %11008 = vmatmul.mubr.msk.f32.vlgmr.msra.gmra.mxu1 %vm74_vm0, %v12329_v59 }
 0xbfa   :  { %11015 = vmatmul.mubr.msk.f32.vlgmr.msra.gmra.mxu0 %vm74_vm0, %v12275_v38  ;;  %11017 = vmatprep.subr.mxu1 %v11453_v2 }
 0xbfb   :  { %11024 = vmatprep.subr.mxu0 %v11453_v2  ;;  %11018 = vmatpush3.msra.mxu1 %v10112_v4 }
 0xbfc   :  { %11025 = vmatpush3.msra.mxu0 %v10114_v7  ;;  %11019 = vmatprep.subr.mxu1 %v11453_v2 }
 0xbfd   :  { %11026 = vmatprep.subr.mxu0 %v11453_v2  ;;  %11020 = vmatpush3.msra.mxu1 %v10111_v8 }
 0xbfe   :  { %11021 = vmatprep.mubr.msk.f32.mxu1 %vm11454_vm1, %v11453_v2  ;;  %11027 = vmatpush3.msra.mxu0 %v10113_v1 }
 0xbff   :  { %11028 = vmatprep.mubr.msk.f32.mxu0 %vm11454_vm1, %v11453_v2  ;;  %11022 = vmatmul.mubr.msk.f32.vlgmr.msra.gmra.mxu1 %vm74_vm0, %v12300_v47 }
 0xc00   :  { %11029 = vmatmul.mubr.msk.f32.vlgmr.msra.gmra.mxu0 %vm74_vm0, %v12308_v53  ;;  %11031 = vmatprep.subr.mxu1 %v11453_v2 }
 0xc01   :  { %11032 = vmatpush3.msra.mxu1 %v10116_v9  ;;  %11035 = vmatprep.mubr.msk.f32.mxu1 %vm11454_vm1, %v11453_v2 }
 0xc02   :  { %11033 = vmatprep.subr.mxu1 %v11453_v2  ;;  %11038 = vmatprep.subr.mxu0 %v11453_v2 }
 0xc03   :  { %11034 = vmatpush3.msra.mxu1 %v10115_v10  ;;  %11040 = vmatprep.mubr.msk.f32.mxu0 %vm11454_vm1, %v11453_v2 }
 0xc04   :  { %11036 = vmatmul.mubr.msk.f32.vlgmr.msra.gmra.mxu1 %vm74_vm0, %v12329_v59  ;;  %11043 = vmatprep.subr.mxu1 %v11453_v2 }
 0xc05   :  { %11045 = vmatprep.mubr.msk.f32.mxu1 %vm11454_vm1, %v11453_v2 }
 0xca3   :  { %v4891_v13 = vpop.f32.mrf.mxu0 }
 0xca4   :  { %v4892_v27 = vadd.f32 %v10081_v22, %v4891_v13 }
 0xca5   :  { %v10960_v14 = vpop.f32.mrf.mxu0 }
 0xca8   :  { %v4964_v15 = vpop.f32.mrf.mxu1 }
 0xca9   :  { %v5037_v16 = vpop.f32.mrf.mxu0  ;;  %v4965_v37 = vadd.f32 %v10082_v30, %v4964_v15 }
 0xcaa   :  { %v10967_v17 = vpop.f32.mrf.mxu1  ;;  %v5038_v40 = vadd.f32 %v10083_v33, %v5037_v16 }
 0xcab   :  { %v10974_v18 = vpop.f32.mrf.mxu0 }
 0xcad   :  { %v5110_v20 = vpop.f32.mrf.mxu1 }
 0xcae   :  { %v5218_v21 = vpop.f32.mrf.mxu0  ;;  %v5111_v49 = vadd.f32 %v10084_v42, %v5110_v20  ;;  %v10124_v42 = vld [vmem:[%s13072_s2 + $0x2b] ss:$0 sm:$0xff] }
 0xcaf   :  { %v5219_v23 = vadd.f32 %v10101_v19, %v5218_v21  ;;  %v10981_v24 = vpop.f32.mrf.mxu1 }
 0xcb0   :  { %v10988_v25 = vpop.f32.mrf.mxu0 }
 0xcb1   :  { %11039 = vmatpush3.xpose.msk.msra.mxu0 %vm1003_vm2, %v5219_v23 }
 0xcb2   :  { %11048 = vmatprep.subr.mxu0 %v11453_v2 }
 0xcb3   :  { %v5288_v29 = vpop.f32.mrf.mxu1 }
 0xcb4   :  { %v5289_v31 = vadd.f32 %v10102_v26, %v5288_v29  ;;  %v5358_v32 = vpop.f32.mrf.mxu0  ;;  %11041 = vmatmul.mubr.msk.f32.vlgmr.msra.gmra.mxu0 %vm1003_vm2, %v4892_v27 }
 0xcb5   :  { %v5359_v34 = vadd.f32 %v10103_v28, %v5358_v32  ;;  %v10995_v35 = vpop.f32.mrf.mxu1  ;;  %11050 = vmatprep.mubr.msk.f32.mxu0 %vm11454_vm1, %v11453_v2 }
 0xcb6   :  { %v11002_v36 = vpop.f32.mrf.mxu0  ;;  %11044 = vmatpush3.xpose.msk.msra.mxu1 %vm1003_vm2, %v5289_v31 }
 0xcb7   :  { %11049 = vmatpush3.xpose.msk.msra.mxu0 %vm1003_vm2, %v5359_v34  ;;  %11053 = vmatprep.subr.mxu1 %v11453_v2 }
 0xcb8   :  { %11058 = vmatprep.subr.mxu0 %v11453_v2 }
 0xcb9   :  { %v5428_v6 = vpop.f32.mrf.mxu1  ;;  %11046 = vmatmul.mubr.msk.f32.vlgmr.msra.gmra.mxu1 %vm1003_vm2, %v4965_v37 }
 0xcba   :  { %v5429_v44 = vadd.f32 %v10104_v39, %v5428_v6  ;;  %v5536_v45 = vpop.f32.mrf.mxu0  ;;  %11051 = vmatmul.mubr.msk.f32.vlgmr.msra.gmra.mxu0 %vm1003_vm2, %v5038_v40  ;;  %11055 = vmatprep.mubr.msk.f32.mxu1 %vm11454_vm1, %v11453_v2  ;;  %v10123_v39 = vld [vmem:[%s13072_s2 + $0x2a] ss:$0 sm:$0xff] }
 0xcbb   :  { %v5537_v12 = vadd.f32 %v10121_v5, %v5536_v45  ;;  %v11009_v41 = vpop.f32.mrf.mxu1  ;;  %11060 = vmatprep.mubr.msk.f32.mxu0 %vm11454_vm1, %v11453_v2 }
 0xcbc   :  { %v11016_v48 = vpop.f32.mrf.mxu0  ;;  %11054 = vmatpush3.xpose.msk.msra.mxu1 %vm1003_vm2, %v5429_v44 }
 0xcbd   :  { %11059 = vmatpush3.msra.mxu0 %v5537_v12  ;;  %11063 = vmatprep.subr.mxu1 %v11453_v2 }
 0xcbe   :  { %11068 = vmatprep.subr.mxu0 %v11453_v2 }
 0xcbf   :  { %v5606_v51 = vpop.f32.mrf.mxu1  ;;  %11056 = vmatmul.mubr.msk.f32.vlgmr.msra.gmra.mxu1 %vm1003_vm2, %v5111_v49 }
 0xcc0   :  { %v5607_v52 = vadd.f32 %v10122_v50, %v5606_v51  ;;  %v12479_v54 = vpop.f32.mrf.mxu0  ;;  %11065 = vmatprep.mubr.msk.f32.mxu1 %vm11454_vm1, %v11453_v2  ;;  %v10141_v51 = vld [vmem:[%s13073_s3 + $0x40] sm:$0xff] }
 0xcc1   :  { %v11023_v55 = vpop.f32.mrf.mxu1  ;;  %v5677_v6 = vadd.f32 %v10123_v39, %v12479_v54  ;;  %v10143_v54 = vld [vmem:[%s13073_s3 + $0x50] sm:$0xff] }
 0xcc2   :  { %v11030_v11 = vpop.f32.mrf.mxu0  ;;  %11064 = vmatpush3.msra.mxu1 %v5607_v52  ;;  %v10142_v52 = vld [vmem:[%s13073_s3 + $0x48] sm:$0xff] }
 0xcc3   :  { %11073 = vmatprep.subr.mxu1 %v11453_v2 }
 0xcc4   :  { %v12484_v43 = vpop.f32.mrf.mxu1 }
 0xcc5   :  { %v5747_v41 = vadd.f32 %v10124_v42, %v12484_v43  ;;  %v10144_v43 = vld [vmem:[%s13073_s3 + $0x58] sm:$0xff] }
 0xcc6   :  { %v11037_v56 = vpop.f32.mrf.mxu1 }
 0xd74   :  { %v5822_v57 = vpop.f32.mrf.mxu0 }
 0xd75   :  { %v6054_v58 = vmul.f32 0.35355338, %v5822_v57  ;;  %v10154_v57 = vld [vmem:[%s13071_s1 + $0x1c8] sm:$0xff] }
 0xd76   :  { %v11042_v60 = vpop.f32.mrf.mxu0 }
 0xd77   :  { %v6058_v61 = vsel %vm1003_vm2, %v6054_v58, -inf }
 0xd78   :  { %6059 = vmax.xlane.f32.xlu0 %v6058_v61  ;;  %v10153_v61 = vld [vmem:[%s13071_s1 + $0x1c0] sm:$0xff] }
 0xd79   :  { %v5898_v62 = vpop.f32.mrf.mxu1 }
 0xd7a   :  { %v6055_v63 = vmul.f32 0.35355338, %v5898_v62  ;;  %v5974_v0 = vpop.f32.mrf.mxu0 }
 0xd7b   :  { %v6056_v46 = vmul.f32 0.35355338, %v5974_v0  ;;  %v11047_v3 = vpop.f32.mrf.mxu1  ;;  %v10156_v0 = vld [vmem:[%s13071_s1 + $0x1d8] sm:$0xff] }
 0xd7c   :  { %v11052_v4 = vpop.f32.mrf.mxu0  ;;  %v6061_v7 = vsel %vm1003_vm2, %v6055_v63, -inf  ;;  %v10155_v3 = vld [vmem:[%s13071_s1 + $0x1d0] sm:$0xff] }
 0xd7d   :  { %6062 = vmax.xlane.f32.xlu1 %v6061_v7  ;;  %v6064_v8 = vsel %vm1003_vm2, %v6056_v46, -inf  ;;  %v10157_v4 = vld [vmem:[%s13071_s1 + $0x1e0] sm:$0xff] }
 0xd7e   :  { %6065 = vmax.xlane.f32.xlu0 %v6064_v8  ;;  %v10160_v8 = vld [vmem:[%s13071_s1 + $0x1f8] sm:$0xff] }
 0xd7f   :  { %v6050_v1 = vpop.f32.mrf.mxu1 }
 0xd80   :  { %v6057_v9 = vmul.f32 0.35355338, %v6050_v1  ;;  %v10174_v1 = vld [vmem:[%s13071_s1 + $0x248] sm:$0xff] }
 0xd81   :  { %v11057_v10 = vpop.f32.mrf.mxu1 }
 0xd82   :  { %v6067_v13 = vsel %vm1003_vm2, %v6057_v9, -inf  ;;  %v10173_v10 = vld [vmem:[%s13071_s1 + $0x240] sm:$0xff] }
 0xd83   :  { %6068 = vmax.xlane.f32.xlu1 %v6067_v13  ;;  %v10176_v13 = vld [vmem:[%s13071_s1 + $0x258] sm:$0xff] }
 0xe01   :  { %v6060_v14 = vpop.xlane.xlu0 %6059 }
 0xe02   :  { %v6070_v15 = vsub.f32 %v6054_v58, %v6060_v14  ;;  %v10178_v14 = vld [vmem:[%s13071_s1 + $0x268] sm:$0xff] }
 0xe04   :  { %v6074_v16 = vmul.f32 1.442695, %v6070_v15  ;;  %v10175_v15 = vld [vmem:[%s13071_s1 + $0x250] sm:$0xff] }
 0xe06   :  { %11379 = vpow2.f32 %v6074_v16  ;;  %v6063_v17 = vpop.xlane.xlu1 %6062  ;;  %v10177_v16 = vld [vmem:[%s13071_s1 + $0x260] sm:$0xff] }
 0xe07   :  { %v6071_v18 = vsub.f32 %v6055_v63, %v6063_v17  ;;  %v6066_v19 = vpop.xlane.xlu0 %6065  ;;  %v10158_v63 = vld [vmem:[%s13071_s1 + $0x1e8] sm:$0xff]  ;;  %v10180_v17 = vld [vmem:[%s13071_s1 + $0x278] sm:$0xff] }
 0xe08   :  { %v6072_v20 = vsub.f32 %v6056_v46, %v6066_v19  ;;  %v10179_v19 = vld [vmem:[%s13071_s1 + $0x270] sm:$0xff] }
 0xe09   :  { %v6076_v21 = vmul.f32 1.442695, %v6071_v18  ;;  %v10194_v18 = vld [vmem:[%s13071_s1 + $0x2c8] sm:$0xff] }
 0xe0a   :  { %v6078_v22 = vmul.f32 1.442695, %v6072_v20  ;;  %v10193_v20 = vld [vmem:[%s13071_s1 + $0x2c0] sm:$0xff] }
 0xe0b   :  { %11381 = vpow2.f32 %v6076_v21  ;;  %v10196_v21 = vld [vmem:[%s13071_s1 + $0x2d8] sm:$0xff] }
 0xe0c   :  { %11383 = vpow2.f32 %v6078_v22  ;;  %v6069_v23 = vpop.xlane.xlu1 %6068  ;;  %v10198_v22 = vld [vmem:[%s13071_s1 + $0x2e8] sm:$0xff] }
 0xe0d   :  { %v6073_v24 = vsub.f32 %v6057_v9, %v6069_v23  ;;  %v10159_v9 = vld [vmem:[%s13071_s1 + $0x1f0] sm:$0xff] }
 0xe0e   :  { %v10195_v23 = vld [vmem:[%s13071_s1 + $0x2d0] sm:$0xff] }
 0xe0f   :  { %v6080_v25 = vmul.f32 1.442695, %v6073_v24  ;;  %v10197_v24 = vld [vmem:[%s13071_s1 + $0x2e0] sm:$0xff] }
 0xe11   :  { %11385 = vpow2.f32 %v6080_v25  ;;  %v10200_v25 = vld [vmem:[%s13071_s1 + $0x2f8] sm:$0xff] }
 0xe13   :  { %v11380_v26 = vpop.eup %11379 }
 0xe14   :  { %v6082_v27 = vsel %vm1003_vm2, %v11380_v26, 0.0 }
 0xe15   :  { %6083 = vadd.xlane.f32.xlu0 %v6082_v27 }
 0xe18   :  { %v11382_v28 = vpop.eup %11381 }
 0xe19   :  { %v11384_v29 = vpop.eup %11383  ;;  %v6085_v30 = vsel %vm1003_vm2, %v11382_v28, 0.0 }
 0xe1a   :  { %6086 = vadd.xlane.f32.xlu1 %v6085_v30  ;;  %v6088_v31 = vsel %vm1003_vm2, %v11384_v29, 0.0 }
 0xe1b   :  { %6089 = vadd.xlane.f32.xlu0 %v6088_v31 }
 0xe1e   :  { %v11386_v32 = vpop.eup %11385 }
 0xe1f   :  { %v6091_v33 = vsel %vm1003_vm2, %v11386_v32, 0.0 }
 0xe20   :  { %6092 = vadd.xlane.f32.xlu1 %v6091_v33 }
 0xe9e   :  { %v6084_v34 = vpop.xlane.xlu0 %6083 }
 0xe9f   :  { %11387 = vrcp.f32 %v6084_v34 }
 0xea3   :  { %v6087_v35 = vpop.xlane.xlu1 %6086 }
 0xea4   :  { %11389 = vrcp.f32 %v6087_v35  ;;  %v6090_v36 = vpop.xlane.xlu0 %6089 }
 0xea5   :  { %11391 = vrcp.f32 %v6090_v36 }
 0xea9   :  { %v6093_v37 = vpop.xlane.xlu1 %6092 }
 0xeaa   :  { %11393 = vrcp.f32 %v6093_v37 }
 0xeac   :  { %v11388_v40 = vpop.eup %11387 }
 0xead   :  { %v6095_v5 = vmul.f32 %v11388_v40, %v11380_v26  ;;  %v10199_v26 = vld [vmem:[%s13071_s1 + $0x2f0] sm:$0xff] }
 0xeaf   :  { %11061 = vmatmul.mubr.msk.f32.vlgmr.msra.gmra.mxu0 %vm1003_vm2, %v6095_v5 }
 0xeb0   :  { %11069 = vmatpush3.msra.mxu0 %v5677_v6  ;;  %11070 = vmatprep.mubr.msk.f32.mxu0 %vm11454_vm1, %v11453_v2  ;;  %v10185_v6 = vld [vmem:[%s13072_s2 + $0x24] ss:$0 sm:$0xff] }
 0xeb1   :  { %v11390_v44 = vpop.eup %11389  ;;  %11078 = vmatprep.subr.mxu0 %v11453_v2 }
 0xeb2   :  { %v11392_v45 = vpop.eup %11391  ;;  %v6097_v12 = vmul.f32 %v11390_v44, %v11382_v28 }
 0xeb3   :  { %v6099_v48 = vmul.f32 %v11392_v45, %v11384_v29  ;;  %v10165_v45 = vld [vmem:[%s13072_s2 + $0x1c] ss:$0 sm:$0xff] }
 0xeb4   :  { %11066 = vmatmul.mubr.msk.f32.vlgmr.msra.gmra.mxu1 %vm1003_vm2, %v6097_v12 }
 0xeb5   :  { %11071 = vmatmul.mubr.msk.f32.vlgmr.msra.gmra.mxu0 %vm1003_vm2, %v6099_v48  ;;  %11074 = vmatpush3.msra.mxu1 %v5747_v41 }
 0xeb6   :  { %11075 = vmatprep.mubr.msk.f32.mxu1 %vm11454_vm1, %v11453_v2  ;;  %11080 = vmatprep.mubr.msk.f32.mxu0 %vm11454_vm1, %v11453_v2 }
 0xeb7   :  { %v11394_v49 = vpop.eup %11393  ;;  %11083 = vmatprep.subr.mxu1 %v11453_v2  ;;  %11079 = vmatpush3.msra.mxu0 %v10141_v51  ;;  %v10187_v51 = vld [vmem:[%s13072_s2 + $0x26] ss:$0 sm:$0xff] }
 0xeb8   :  { %v6101_v50 = vmul.f32 %v11394_v49, %v11386_v32  ;;  %11088 = vmatprep.subr.mxu0 %v11453_v2  ;;  %v10186_v49 = vld [vmem:[%s13072_s2 + $0x25] ss:$0 sm:$0xff] }
 0xeba   :  { %11076 = vmatmul.mubr.msk.f32.vlgmr.msra.gmra.mxu1 %vm1003_vm2, %v6101_v50 }
 0xebb   :  { %11085 = vmatprep.mubr.msk.f32.mxu1 %vm11454_vm1, %v11453_v2  ;;  %11084 = vmatpush3.msra.mxu1 %v10142_v52 }
 0xebc   :  { %11093 = vmatprep.subr.mxu1 %v11453_v2 }
 0xf6f   :  { %v6171_v55 = vpop.f32.mrf.mxu0 }
 0xf70   :  { %11081 = vmatmul.mubr.msk.f32.vlgmr.msra.gmra.mxu0 %vm1003_vm2, %v6171_v55 }
 0xf71   :  { %v11062_v11 = vpop.f32.mrf.mxu0  ;;  %11089 = vmatpush3.msra.mxu0 %v10143_v54  ;;  %11090 = vmatprep.mubr.msk.f32.mxu0 %vm11454_vm1, %v11453_v2  ;;  %v10166_v54 = vld [vmem:[%s13072_s2 + $0x1d] ss:$0 sm:$0xff] }
 0xf72   :  { %11098 = vmatprep.subr.mxu0 %v11453_v2 }
 0xf74   :  { %v6244_v56 = vpop.f32.mrf.mxu1 }
 0xf75   :  { %v6317_v58 = vpop.f32.mrf.mxu0  ;;  %11086 = vmatmul.mubr.msk.f32.vlgmr.msra.gmra.mxu1 %vm1003_vm2, %v6244_v56 }
 0xf76   :  { %11091 = vmatmul.mubr.msk.f32.vlgmr.msra.gmra.mxu0 %vm1003_vm2, %v6317_v58  ;;  %v11067_v60 = vpop.f32.mrf.mxu1  ;;  %11094 = vmatpush3.msra.mxu1 %v10144_v43  ;;  %v10167_v43 = vld [vmem:[%s13072_s2 + $0x1e] ss:$0 sm:$0xff] }
 0xf77   :  { %v11072_v62 = vpop.f32.mrf.mxu0  ;;  %11099 = vmatpush3.msra.mxu0 %v10154_v57  ;;  %11095 = vmatprep.mubr.msk.f32.mxu1 %vm11454_vm1, %v11453_v2 }
 0xf78   :  { %11100 = vmatprep.subr.mxu0 %v11453_v2  ;;  %11102 = vmatprep.mubr.msk.f32.mxu0 %vm11454_vm1, %v11453_v2 }
 0xf79   :  { %11101 = vmatpush3.msra.mxu0 %v10153_v61  ;;  %11105 = vmatprep.subr.mxu1 %v11453_v2  ;;  %v10188_v61 = vld [vmem:[%s13072_s2 + $0x27] ss:$0 sm:$0xff] }
 0xf7a   :  { %v6390_v46 = vpop.f32.mrf.mxu1  ;;  %11103 = vmatmul.mubr.msk.f32.vlgmr.msra.gmra.mxu0 %vm74_vm0, %v12275_v38  ;;  %11112 = vmatprep.subr.mxu0 %v11453_v2 }
 0xf7b   :  { %11096 = vmatmul.mubr.msk.f32.vlgmr.msra.gmra.mxu1 %vm1003_vm2, %v6390_v46  ;;  %11113 = vmatpush3.msra.mxu0 %v10158_v63  ;;  %v10205_v63 = vld [vmem:[%s13072_s2 + $0x2c] ss:$0 sm:$0xff]  ;;  %v10168_v46 = vld [vmem:[%s13072_s2 + $0x1f] ss:$0 sm:$0xff] }
 0xf7c   :  { %v11077_v7 = vpop.f32.mrf.mxu1  ;;  %11106 = vmatpush3.msra.mxu1 %v10156_v0  ;;  %11114 = vmatprep.subr.mxu0 %v11453_v2 }
 0xf7d   :  { %11107 = vmatprep.subr.mxu1 %v11453_v2  ;;  %11109 = vmatprep.mubr.msk.f32.mxu1 %vm11454_vm1, %v11453_v2 }
 0xf7e   :  { %11108 = vmatpush3.msra.mxu1 %v10155_v3  ;;  %11115 = vmatpush3.msra.mxu0 %v10157_v4 }
 0xf7f   :  { %11116 = vmatprep.mubr.msk.f32.mxu0 %vm11454_vm1, %v11453_v2  ;;  %11110 = vmatmul.mubr.msk.f32.vlgmr.msra.gmra.mxu1 %vm74_vm0, %v12300_v47 }
 0xf80   :  { %11117 = vmatmul.mubr.msk.f32.vlgmr.msra.gmra.mxu0 %vm74_vm0, %v12308_v53  ;;  %11119 = vmatprep.subr.mxu1 %v11453_v2 }
 0xf81   :  { %11126 = vmatprep.subr.mxu0 %v11453_v2  ;;  %11120 = vmatpush3.msra.mxu1 %v10160_v8 }
 0xf82   :  { %11127 = vmatpush3.msra.mxu0 %v10174_v1  ;;  %11121 = vmatprep.subr.mxu1 %v11453_v2 }
 0xf83   :  { %11128 = vmatprep.subr.mxu0 %v11453_v2  ;;  %11122 = vmatpush3.msra.mxu1 %v10159_v9 }
 0xf84   :  { %11123 = vmatprep.mubr.msk.f32.mxu1 %vm11454_vm1, %v11453_v2  ;;  %11129 = vmatpush3.msra.mxu0 %v10173_v10  ;;  %v10206_v10 = vld [vmem:[%s13072_s2 + $0x2d] ss:$0 sm:$0xff] }
 0xf85   :  { %11130 = vmatprep.mubr.msk.f32.mxu0 %vm11454_vm1, %v11453_v2  ;;  %11124 = vmatmul.mubr.msk.f32.vlgmr.msra.gmra.mxu1 %vm74_vm0, %v12329_v59 }
 0xf86   :  { %11131 = vmatmul.mubr.msk.f32.vlgmr.msra.gmra.mxu0 %vm74_vm0, %v12275_v38  ;;  %11133 = vmatprep.subr.mxu1 %v11453_v2 }
 0xf87   :  { %11140 = vmatprep.subr.mxu0 %v11453_v2  ;;  %11134 = vmatpush3.msra.mxu1 %v10176_v13 }
 0xf88   :  { %11141 = vmatpush3.msra.mxu0 %v10178_v14  ;;  %11135 = vmatprep.subr.mxu1 %v11453_v2 }
 0xf89   :  { %11142 = vmatprep.subr.mxu0 %v11453_v2  ;;  %11136 = vmatpush3.msra.mxu1 %v10175_v15 }
 0xf8a   :  { %11137 = vmatprep.mubr.msk.f32.mxu1 %vm11454_vm1, %v11453_v2  ;;  %11143 = vmatpush3.msra.mxu0 %v10177_v16 }
 0xf8b   :  { %11144 = vmatprep.mubr.msk.f32.mxu0 %vm11454_vm1, %v11453_v2  ;;  %11138 = vmatmul.mubr.msk.f32.vlgmr.msra.gmra.mxu1 %vm74_vm0, %v12300_v47 }
 0xf8c   :  { %11145 = vmatmul.mubr.msk.f32.vlgmr.msra.gmra.mxu0 %vm74_vm0, %v12308_v53  ;;  %11147 = vmatprep.subr.mxu1 %v11453_v2 }
 0xf8d   :  { %11154 = vmatprep.subr.mxu0 %v11453_v2  ;;  %11148 = vmatpush3.msra.mxu1 %v10180_v17 }
 0xf8e   :  { %11155 = vmatpush3.msra.mxu0 %v10194_v18  ;;  %11149 = vmatprep.subr.mxu1 %v11453_v2 }
 0xf8f   :  { %11156 = vmatprep.subr.mxu0 %v11453_v2  ;;  %11150 = vmatpush3.msra.mxu1 %v10179_v19 }
 0xf90   :  { %11151 = vmatprep.mubr.msk.f32.mxu1 %vm11454_vm1, %v11453_v2  ;;  %11157 = vmatpush3.msra.mxu0 %v10193_v20 }
 0xf91   :  { %11158 = vmatprep.mubr.msk.f32.mxu0 %vm11454_vm1, %v11453_v2  ;;  %11152 = vmatmul.mubr.msk.f32.vlgmr.msra.gmra.mxu1 %vm74_vm0, %v12329_v59 }
 0xf92   :  { %11159 = vmatmul.mubr.msk.f32.vlgmr.msra.gmra.mxu0 %vm74_vm0, %v12275_v38  ;;  %11161 = vmatprep.subr.mxu1 %v11453_v2 }
 0xf93   :  { %11168 = vmatprep.subr.mxu0 %v11453_v2  ;;  %11162 = vmatpush3.msra.mxu1 %v10196_v21 }
 0xf94   :  { %11169 = vmatpush3.msra.mxu0 %v10198_v22  ;;  %11163 = vmatprep.subr.mxu1 %v11453_v2 }
 0xf95   :  { %11170 = vmatprep.subr.mxu0 %v11453_v2  ;;  %11164 = vmatpush3.msra.mxu1 %v10195_v23 }
 0xf96   :  { %11165 = vmatprep.mubr.msk.f32.mxu1 %vm11454_vm1, %v11453_v2  ;;  %11171 = vmatpush3.msra.mxu0 %v10197_v24 }
 0xf97   :  { %11172 = vmatprep.mubr.msk.f32.mxu0 %vm11454_vm1, %v11453_v2  ;;  %11166 = vmatmul.mubr.msk.f32.vlgmr.msra.gmra.mxu1 %vm74_vm0, %v12300_v47 }
 0xf98   :  { %11173 = vmatmul.mubr.msk.f32.vlgmr.msra.gmra.mxu0 %vm74_vm0, %v12308_v53  ;;  %11175 = vmatprep.subr.mxu1 %v11453_v2 }
 0xf99   :  { %11176 = vmatpush3.msra.mxu1 %v10200_v25  ;;  %11179 = vmatprep.mubr.msk.f32.mxu1 %vm11454_vm1, %v11453_v2 }
 0xf9a   :  { %11177 = vmatprep.subr.mxu1 %v11453_v2  ;;  %11182 = vmatprep.subr.mxu0 %v11453_v2 }
 0xf9b   :  { %11178 = vmatpush3.msra.mxu1 %v10199_v26  ;;  %11184 = vmatprep.mubr.msk.f32.mxu0 %vm11454_vm1, %v11453_v2 }
 0xf9c   :  { %11180 = vmatmul.mubr.msk.f32.vlgmr.msra.gmra.mxu1 %vm74_vm0, %v12329_v59  ;;  %11187 = vmatprep.subr.mxu1 %v11453_v2 }
 0xf9d   :  { %11189 = vmatprep.mubr.msk.f32.mxu1 %vm11454_vm1, %v11453_v2 }
0x1030   :  { %v12688_v27 = vpop.f32.mrf.mxu0 }
0x1032   :  { %v11082_v28 = vpop.f32.mrf.mxu0 }
0x1035   :  { %v12690_v29 = vpop.f32.mrf.mxu1 }
0x1036   :  { %v12692_v30 = vpop.f32.mrf.mxu0 }
0x1037   :  { %v11087_v31 = vpop.f32.mrf.mxu1 }
0x1038   :  { %v11092_v32 = vpop.f32.mrf.mxu0 }
0x103a   :  { %v6823_v33 = vpop.f32.mrf.mxu0 }
0x103b   :  { %v12694_v34 = vpop.f32.mrf.mxu1  ;;  %v6824_v50 = vadd.f32 %v10165_v45, %v6823_v33 }
0x103c   :  { %v11104_v35 = vpop.f32.mrf.mxu0 }
0x103d   :  { %v11097_v36 = vpop.f32.mrf.mxu1 }
0x103f   :  { %v6893_v37 = vpop.f32.mrf.mxu1 }
0x1040   :  { %v6963_v39 = vpop.f32.mrf.mxu0  ;;  %v6894_v60 = vadd.f32 %v10166_v54, %v6893_v37 }
0x1041   :  { %v11111_v40 = vpop.f32.mrf.mxu1  ;;  %v6964_v62 = vadd.f32 %v10167_v43, %v6963_v39 }
0x1042   :  { %v11118_v5 = vpop.f32.mrf.mxu0 }
0x1045   :  { %v7033_v42 = vpop.f32.mrf.mxu1 }
0x1046   :  { %v7141_v44 = vpop.f32.mrf.mxu0  ;;  %v7034_v9 = vadd.f32 %v10168_v46, %v7033_v42  ;;  %v10207_v46 = vld [vmem:[%s13072_s2 + $0x2e] ss:$0 sm:$0xff] }
0x1047   :  { %v7142_v12 = vadd.f32 %v10185_v6, %v7141_v44  ;;  %v11125_v41 = vpop.f32.mrf.mxu1 }
0x1048   :  { %v11132_v48 = vpop.f32.mrf.mxu0 }
0x1049   :  { %11183 = vmatpush3.xpose.msk.msra.mxu0 %vm1003_vm2, %v7142_v12 }
0x104a   :  { %11192 = vmatprep.subr.mxu0 %v11453_v2 }
0x104b   :  { %v7211_v52 = vpop.f32.mrf.mxu1 }
0x104c   :  { %v7212_v55 = vadd.f32 %v10186_v49, %v7211_v52  ;;  %v7281_v11 = vpop.f32.mrf.mxu0  ;;  %11185 = vmatmul.mubr.msk.f32.vlgmr.msra.gmra.mxu0 %vm1003_vm2, %v6824_v50 }
0x104d   :  { %v7282_v56 = vadd.f32 %v10187_v51, %v7281_v11  ;;  %v11139_v57 = vpop.f32.mrf.mxu1  ;;  %11194 = vmatprep.mubr.msk.f32.mxu0 %vm11454_vm1, %v11453_v2 }
0x104e   :  { %v11146_v58 = vpop.f32.mrf.mxu0  ;;  %11188 = vmatpush3.xpose.msk.msra.mxu1 %vm1003_vm2, %v7212_v55 }
0x104f   :  { %11193 = vmatpush3.xpose.msk.msra.mxu0 %vm1003_vm2, %v7282_v56  ;;  %11197 = vmatprep.subr.mxu1 %v11453_v2 }
0x1050   :  { %11202 = vmatprep.subr.mxu0 %v11453_v2 }
0x1051   :  { %v7351_v0 = vpop.f32.mrf.mxu1  ;;  %11190 = vmatmul.mubr.msk.f32.vlgmr.msra.gmra.mxu1 %vm1003_vm2, %v6894_v60 }
0x1052   :  { %v7352_v3 = vadd.f32 %v10188_v61, %v7351_v0  ;;  %v7459_v4 = vpop.f32.mrf.mxu0  ;;  %11195 = vmatmul.mubr.msk.f32.vlgmr.msra.gmra.mxu0 %vm1003_vm2, %v6964_v62  ;;  %11199 = vmatprep.mubr.msk.f32.mxu1 %vm11454_vm1, %v11453_v2 }
0x1053   :  { %v7460_v7 = vadd.f32 %v10205_v63, %v7459_v4  ;;  %v11153_v8 = vpop.f32.mrf.mxu1  ;;  %11204 = vmatprep.mubr.msk.f32.mxu0 %vm11454_vm1, %v11453_v2 }
0x1054   :  { %v11160_v1 = vpop.f32.mrf.mxu0  ;;  %11198 = vmatpush3.xpose.msk.msra.mxu1 %vm1003_vm2, %v7352_v3  ;;  %v10208_v8 = vld [vmem:[%s13072_s2 + $0x2f] ss:$0 sm:$0xff] }
0x1055   :  { %11203 = vmatpush3.msra.mxu0 %v7460_v7  ;;  %11207 = vmatprep.subr.mxu1 %v11453_v2 }
0x1056   :  { %11212 = vmatprep.subr.mxu0 %v11453_v2 }
0x1057   :  { %v7529_v13 = vpop.f32.mrf.mxu1  ;;  %11200 = vmatmul.mubr.msk.f32.vlgmr.msra.gmra.mxu1 %vm1003_vm2, %v7034_v9 }
0x1058   :  { %v7530_v14 = vadd.f32 %v10206_v10, %v7529_v13  ;;  %v12745_v15 = vpop.f32.mrf.mxu0  ;;  %11209 = vmatprep.mubr.msk.f32.mxu1 %vm11454_vm1, %v11453_v2 }
0x1059   :  { %v11167_v16 = vpop.f32.mrf.mxu1  ;;  %v7600_v7 = vadd.f32 %v10207_v46, %v12745_v15 }
0x105a   :  { %v11174_v17 = vpop.f32.mrf.mxu0  ;;  %11208 = vmatpush3.msra.mxu1 %v7530_v14 }
0x105b   :  { %11217 = vmatprep.subr.mxu1 %v11453_v2  ;;  %v10225_v17 = vld [vmem:[%s13073_s3 + $0x60] sm:$0xff] }
0x105c   :  { %v12750_v18 = vpop.f32.mrf.mxu1 }
0x105d   :  { %v7670_v13 = vadd.f32 %v10208_v8, %v12750_v18  ;;  %v10226_v18 = vld [vmem:[%s13073_s3 + $0x68] sm:$0xff] }
0x105e   :  { %v11181_v19 = vpop.f32.mrf.mxu1 }
0x105f   :  { %v10227_v19 = vld [vmem:[%s13073_s3 + $0x70] sm:$0xff] }
0x110c   :  { %v7745_v20 = vpop.f32.mrf.mxu0 }
0x110d   :  { %v7977_v21 = vmul.f32 0.35355338, %v7745_v20 }
0x110e   :  { %v11186_v22 = vpop.f32.mrf.mxu0 }
0x110f   :  { %v7981_v23 = vsel %vm1003_vm2, %v7977_v21, -inf  ;;  %v10228_v22 = vld [vmem:[%s13073_s3 + $0x78] sm:$0xff] }
0x1110   :  { %7982 = vmax.xlane.f32.xlu0 %v7981_v23 }
0x1111   :  { %v7821_v24 = vpop.f32.mrf.mxu1 }
0x1112   :  { %v7978_v25 = vmul.f32 0.35355338, %v7821_v24  ;;  %v7897_v26 = vpop.f32.mrf.mxu0 }
0x1113   :  { %v7979_v28 = vmul.f32 0.35355338, %v7897_v26  ;;  %v11191_v31 = vpop.f32.mrf.mxu1 }
0x1114   :  { %v11196_v32 = vpop.f32.mrf.mxu0  ;;  %v7984_v33 = vsel %vm1003_vm2, %v7978_v25, -inf }
0x1115   :  { %7985 = vmax.xlane.f32.xlu1 %v7984_v33  ;;  %v7987_v35 = vsel %vm1003_vm2, %v7979_v28, -inf  ;;  %v10149_v32 = vld [vmem:[%s13075_s5 + $0x1c] ss:$0 sm:$0xff] }
0x1116   :  { %7988 = vmax.xlane.f32.xlu0 %v7987_v35  ;;  %v6715_v33 = vadd.f32 %v10149_v32, %v12688_v27 }
0x1117   :  { %v7973_v36 = vpop.f32.mrf.mxu1 }
0x1118   :  { %v7980_v37 = vmul.f32 0.35355338, %v7973_v36  ;;  %v10150_v36 = vld [vmem:[%s13075_s5 + $0x1d] ss:$0 sm:$0xff] }
0x1119   :  { %v11201_v39 = vpop.f32.mrf.mxu1 }
0x111a   :  { %v7990_v40 = vsel %vm1003_vm2, %v7980_v37, -inf  ;;  %v10151_v39 = vld [vmem:[%s13075_s5 + $0x1e] ss:$0 sm:$0xff] }
0x111b   :  { %7991 = vmax.xlane.f32.xlu1 %v7990_v40 }
0x1199   :  { %v7983_v5 = vpop.xlane.xlu0 %7982 }
0x119a   :  { %v7993_v6 = vsub.f32 %v7977_v21, %v7983_v5 }
0x119c   :  { %v7997_v42 = vmul.f32 1.442695, %v7993_v6  ;;  %v6716_v6 = vadd.f32 %v10150_v36, %v12690_v29 }
0x119e   :  { %11395 = vpow2.f32 %v7997_v42  ;;  %v7986_v44 = vpop.xlane.xlu1 %7985  ;;  %v6717_v42 = vadd.f32 %v10151_v39, %v12692_v30 }
0x119f   :  { %v7994_v45 = vsub.f32 %v7978_v25, %v7986_v44  ;;  %v7989_v12 = vpop.xlane.xlu0 %7988 }
0x11a0   :  { %v7995_v41 = vsub.f32 %v7979_v28, %v7989_v12 }
0x11a1   :  { %v7999_v48 = vmul.f32 1.442695, %v7994_v45 }
0x11a2   :  { %v8001_v49 = vmul.f32 1.442695, %v7995_v41  ;;  %v10152_v41 = vld [vmem:[%s13075_s5 + $0x1f] ss:$0 sm:$0xff] }
0x11a3   :  { %11397 = vpow2.f32 %v7999_v48  ;;  %v6718_v29 = vadd.f32 %v10152_v41, %v12694_v34  ;;  %v10253_v41 = vld [vmem:[%s13074_s4 + $0xa0] sm:$0xff] }
0x11a4   :  { %11399 = vpow2.f32 %v8001_v49  ;;  %v7992_v50 = vpop.xlane.xlu1 %7991 }
0x11a5   :  { %v7996_v51 = vsub.f32 %v7980_v37, %v7992_v50 }
0x11a7   :  { %v8003_v52 = vmul.f32 1.442695, %v7996_v51 }
0x11a9   :  { %11401 = vpow2.f32 %v8003_v52 }
0x11ab   :  { %v11396_v54 = vpop.eup %11395 }
0x11ac   :  { %v8005_v55 = vsel %vm1003_vm2, %v11396_v54, 0.0 }
0x11ad   :  { %8006 = vadd.xlane.f32.xlu0 %v8005_v55 }
0x11b0   :  { %v11398_v11 = vpop.eup %11397 }
0x11b1   :  { %v11400_v43 = vpop.eup %11399  ;;  %v8008_v56 = vsel %vm1003_vm2, %v11398_v11, 0.0 }
0x11b2   :  { %8009 = vadd.xlane.f32.xlu1 %v8008_v56  ;;  %v8011_v57 = vsel %vm1003_vm2, %v11400_v43, 0.0 }
0x11b3   :  { %8012 = vadd.xlane.f32.xlu0 %v8011_v57 }
0x11b6   :  { %v11402_v58 = vpop.eup %11401 }
0x11b7   :  { %v8014_v60 = vsel %vm1003_vm2, %v11402_v58, 0.0 }
0x11b8   :  { %8015 = vadd.xlane.f32.xlu1 %v8014_v60 }
0x1236   :  { %v8007_v61 = vpop.xlane.xlu0 %8006 }
0x1237   :  { %11403 = vrcp.f32 %v8007_v61 }
0x123b   :  { %v8010_v62 = vpop.xlane.xlu1 %8009 }
0x123c   :  { %11405 = vrcp.f32 %v8010_v62  ;;  %v8013_v63 = vpop.xlane.xlu0 %8012 }
0x123d   :  { %11407 = vrcp.f32 %v8013_v63 }
0x1241   :  { %v8016_v0 = vpop.xlane.xlu1 %8015 }
0x1242   :  { %11409 = vrcp.f32 %v8016_v0 }
0x1244   :  { %v11404_v3 = vpop.eup %11403 }
0x1245   :  { %v8018_v4 = vmul.f32 %v11404_v3, %v11396_v54 }
0x1247   :  { %11205 = vmatmul.mubr.msk.f32.vlgmr.msra.gmra.mxu0 %vm1003_vm2, %v8018_v4 }
0x1248   :  { %11213 = vmatpush3.msra.mxu0 %v7600_v7  ;;  %11214 = vmatprep.mubr.msk.f32.mxu0 %vm11454_vm1, %v11453_v2 }
0x1249   :  { %v11406_v1 = vpop.eup %11405  ;;  %11222 = vmatprep.subr.mxu0 %v11453_v2 }
0x124a   :  { %v11408_v9 = vpop.eup %11407  ;;  %v8020_v10 = vmul.f32 %v11406_v1, %v11398_v11 }
0x124b   :  { %v8022_v14 = vmul.f32 %v11408_v9, %v11400_v43 }
0x124c   :  { %11210 = vmatmul.mubr.msk.f32.vlgmr.msra.gmra.mxu1 %vm1003_vm2, %v8020_v10 }
0x124d   :  { %11215 = vmatmul.mubr.msk.f32.vlgmr.msra.gmra.mxu0 %vm1003_vm2, %v8022_v14  ;;  %11218 = vmatpush3.msra.mxu1 %v7670_v13  ;;  %v10250_v14 = vld [vmem:[%s13074_s4 + $0x88] sm:$0xff] }
0x124e   :  { %11219 = vmatprep.mubr.msk.f32.mxu1 %vm11454_vm1, %v11453_v2  ;;  %11224 = vmatprep.mubr.msk.f32.mxu0 %vm11454_vm1, %v11453_v2 }
0x124f   :  { %v11410_v15 = vpop.eup %11409  ;;  %11227 = vmatprep.subr.mxu1 %v11453_v2  ;;  %11223 = vmatpush3.msra.mxu0 %v10225_v17  ;;  %v10251_v17 = vld [vmem:[%s13074_s4 + $0x90] sm:$0xff] }
0x1250   :  { %v8024_v16 = vmul.f32 %v11410_v15, %v11402_v58  ;;  %11232 = vmatprep.subr.mxu0 %v11453_v2  ;;  %v10249_v15 = vld [vmem:[%s13074_s4 + $0x80] sm:$0xff] }
0x1252   :  { %11220 = vmatmul.mubr.msk.f32.vlgmr.msra.gmra.mxu1 %vm1003_vm2, %v8024_v16  ;;  %v10252_v16 = vld [vmem:[%s13074_s4 + $0x98] sm:$0xff] }
0x1253   :  { %11229 = vmatprep.mubr.msk.f32.mxu1 %vm11454_vm1, %v11453_v2  ;;  %11228 = vmatpush3.msra.mxu1 %v10226_v18 }
0x1254   :  { %11237 = vmatprep.subr.mxu1 %v11453_v2 }
0x1307   :  { %v8094_v20 = vpop.f32.mrf.mxu0 }
0x1308   :  { %11225 = vmatmul.mubr.msk.f32.vlgmr.msra.gmra.mxu0 %vm1003_vm2, %v8094_v20 }
0x1309   :  { %v11206_v21 = vpop.f32.mrf.mxu0  ;;  %11233 = vmatpush3.msra.mxu0 %v10227_v19  ;;  %11234 = vmatprep.mubr.msk.f32.mxu0 %vm11454_vm1, %v11453_v2 }
0x130a   :  { %11242 = vmatprep.subr.mxu0 %v11453_v2 }
0x130c   :  { %v8167_v23 = vpop.f32.mrf.mxu1 }
0x130d   :  { %v8240_v24 = vpop.f32.mrf.mxu0  ;;  %11230 = vmatmul.mubr.msk.f32.vlgmr.msra.gmra.mxu1 %vm1003_vm2, %v8167_v23 }
0x130e   :  { %11235 = vmatmul.mubr.msk.f32.vlgmr.msra.gmra.mxu0 %vm1003_vm2, %v8240_v24  ;;  %v11211_v25 = vpop.f32.mrf.mxu1  ;;  %11238 = vmatpush3.msra.mxu1 %v10228_v22 }
0x130f   :  { %v11216_v26 = vpop.f32.mrf.mxu0  ;;  %11239 = vmatprep.mubr.msk.f32.mxu1 %vm11454_vm1, %v11453_v2  ;;  %11246 = vmatprep.mubr.msk.f32.mxu0 %vm11454_vm1, %v11453_v2 }
0x1310   :  { %11249 = vmatprep.subr.mxu1 %v11453_v2  ;;  %11243 = vmatpush3.msra.mxu0 %v10250_v14 }
0x1311   :  { %11244 = vmatprep.subr.mxu0 %v11453_v2 }
0x1312   :  { %v8313_v28 = vpop.f32.mrf.mxu1  ;;  %11245 = vmatpush3.msra.mxu0 %v10249_v15  ;;  %v10276_v15 = vld [vmem:[%s13074_s4 + $0xf8] sm:$0xff] }
0x1313   :  { %11240 = vmatmul.mubr.msk.f32.vlgmr.msra.gmra.mxu1 %vm1003_vm2, %v8313_v28  ;;  %11256 = vmatprep.subr.mxu0 %v11453_v2 }
0x1314   :  { %v11221_v31 = vpop.f32.mrf.mxu1  ;;  %11253 = vmatprep.mubr.msk.f32.mxu1 %vm11454_vm1, %v11453_v2  ;;  %11250 = vmatpush3.msra.mxu1 %v10252_v16 }
0x1315   :  { %11251 = vmatprep.subr.mxu1 %v11453_v2 }
0x1316   :  { %11252 = vmatpush3.msra.mxu1 %v10251_v17  ;;  %v10264_v17 = vld [vmem:[%s13075_s5 + $0x23] ss:$0 sm:$0xff] }
0x1317   :  { %11263 = vmatprep.subr.mxu1 %v11453_v2 }
0x13c8   :  { %v8391_v35 = vpop.f32.mrf.mxu0 }
0x13c9   :  { %v8614_v37 = vadd.f32 %v8391_v35, %v6715_v33  ;;  %v10241_v35 = vld [vmem:[%s13075_s5 + $0x28] ss:$0 sm:$0xff] }
0x13ca   :  { %v11226_v40 = vpop.f32.mrf.mxu0 }
0x13cb   :  { %v8618_v5 = vadd.f32 %v8614_v37, %v12275_v38  ;;  %v10245_v37 = vld [vmem:[%s13075_s5 + $0x2c] ss:$0 sm:$0xff] }
0x13cd   :  { %v8464_v44 = vpop.f32.mrf.mxu1  ;;  %v8632_v27 = vsel %vm74_vm0, %v8618_v5, 0.0 }
0x13ce   :  { %v8615_v45 = vadd.f32 %v8464_v44, %v6716_v6  ;;  %v8537_v12 = vpop.f32.mrf.mxu0  ;;  %8633 = vadd.xlane.f32.xlu0 %v8632_v27  ;;  %v10254_v6 = vld [vmem:[%s13074_s4 + $0xa8] sm:$0xff] }
0x13cf   :  { %v8616_v48 = vadd.f32 %v8537_v12, %v6717_v42  ;;  %v11231_v49 = vpop.f32.mrf.mxu1  ;;  %v10242_v42 = vld [vmem:[%s13075_s5 + $0x29] ss:$0 sm:$0xff] }
0x13d0   :  { %v11236_v50 = vpop.f32.mrf.mxu0  ;;  %v8619_v51 = vadd.f32 %v8615_v45, %v12300_v47  ;;  %v10243_v45 = vld [vmem:[%s13075_s5 + $0x2a] ss:$0 sm:$0xff] }
0x13d1   :  { %v8620_v38 = vadd.f32 %v8616_v48, %v12308_v53  ;;  %v10246_v48 = vld [vmem:[%s13075_s5 + $0x2d] ss:$0 sm:$0xff]  ;;  %v10247_v50 = vld [vmem:[%s13075_s5 + $0x2e] ss:$0 sm:$0xff] }
0x13d2   :  { %v8635_v30 = vsel %vm74_vm0, %v8619_v51, 0.0 }
0x13d3   :  { %v8610_v52 = vpop.f32.mrf.mxu1  ;;  %8636 = vadd.xlane.f32.xlu1 %v8635_v30  ;;  %v8638_v54 = vsel %vm74_vm0, %v8620_v38, 0.0 }
0x13d4   :  { %v8617_v55 = vadd.f32 %v8610_v52, %v6718_v29  ;;  %8639 = vadd.xlane.f32.xlu0 %v8638_v54  ;;  %v10256_v29 = vld [vmem:[%s13074_s4 + $0xb8] sm:$0xff]  ;;  %v10244_v54 = vld [vmem:[%s13075_s5 + $0x2b] ss:$0 sm:$0xff] }
0x13d5   :  { %v11241_v11 = vpop.f32.mrf.mxu1 }
0x13d6   :  { %v8621_v43 = vadd.f32 %v8617_v55, %v12329_v59  ;;  %v10255_v11 = vld [vmem:[%s13074_s4 + $0xb0] sm:$0xff] }
0x13d8   :  { %v8641_v56 = vsel %vm74_vm0, %v8621_v43, 0.0 }
0x13d9   :  { %8642 = vadd.xlane.f32.xlu1 %v8641_v56 }
0x1457   :  { %v8634_v57 = vpop.xlane.xlu0 %8633 }
0x1458   :  { %v8644_v47 = vmul.f32 0.0625, %v8634_v57 }
0x145a   :  { %v8648_v58 = vsub.f32 %v8618_v5, %v8644_v47  ;;  %v10270_v47 = vld [vmem:[%s13074_s4 + $0xc8] sm:$0xff] }
0x145c   :  { %v8637_v53 = vpop.xlane.xlu1 %8636  ;;  %v8652_v60 = vmul.f32 %v8648_v58, %v8648_v58 }
0x145d   :  { %v8645_v34 = vmul.f32 0.0625, %v8637_v53  ;;  %v8640_v61 = vpop.xlane.xlu0 %8639  ;;  %v10272_v53 = vld [vmem:[%s13074_s4 + $0xd8] sm:$0xff] }
0x145e   :  { %v8646_v62 = vmul.f32 0.0625, %v8640_v61  ;;  %v8656_v63 = vsel %vm74_vm0, %v8652_v60, 0.0  ;;  %v10271_v60 = vld [vmem:[%s13074_s4 + $0xd0] sm:$0xff] }
0x145f   :  { %v8649_v0 = vsub.f32 %v8619_v51, %v8645_v34  ;;  %8657 = vadd.xlane.f32.xlu0 %v8656_v63  ;;  %v10261_v34 = vld [vmem:[%s13075_s5 + $0x20] ss:$0 sm:$0xff] }
0x1460   :  { %v8650_v46 = vsub.f32 %v8620_v38, %v8646_v62 }
0x1461   :  { %v8653_v3 = vmul.f32 %v8649_v0, %v8649_v0 }
0x1462   :  { %v8643_v4 = vpop.xlane.xlu1 %8642  ;;  %v8654_v7 = vmul.f32 %v8650_v46, %v8650_v46 }
0x1463   :  { %v8647_v59 = vmul.f32 0.0625, %v8643_v4  ;;  %v8659_v8 = vsel %vm74_vm0, %v8653_v3, 0.0  ;;  %v10274_v3 = vld [vmem:[%s13074_s4 + $0xe8] sm:$0xff]  ;;  %v10263_v4 = vld [vmem:[%s13075_s5 + $0x22] ss:$0 sm:$0xff] }
0x1464   :  { %8660 = vadd.xlane.f32.xlu1 %v8659_v8  ;;  %v8662_v1 = vsel %vm74_vm0, %v8654_v7, 0.0 }
0x1465   :  { %v8651_v9 = vsub.f32 %v8621_v43, %v8647_v59  ;;  %8663 = vadd.xlane.f32.xlu0 %v8662_v1  ;;  %v10248_v43 = vld [vmem:[%s13075_s5 + $0x2f] ss:$0 sm:$0xff]  ;;  %v10273_v59 = vld [vmem:[%s13074_s4 + $0xe0] sm:$0xff] }
0x1467   :  { %v8655_v10 = vmul.f32 %v8651_v9, %v8651_v9 }
0x1469   :  { %v8665_v13 = vsel %vm74_vm0, %v8655_v10, 0.0 }
0x146a   :  { %8666 = vadd.xlane.f32.xlu1 %v8665_v13 }
0x14e8   :  { %v8658_v18 = vpop.xlane.xlu0 %8657 }
0x14e9   :  { %v8668_v19 = vmul.f32 0.0625, %v8658_v18  ;;  %v10275_v18 = vld [vmem:[%s13074_s4 + $0xf0] sm:$0xff] }
0x14eb   :  { %v8672_v20 = vadd.f32 1e-05, %v8668_v19 }
0x14ed   :  { %11411 = vrsqrt.f32 %v8672_v20  ;;  %v8661_v21 = vpop.xlane.xlu1 %8660 }
0x14ee   :  { %v8669_v22 = vmul.f32 0.0625, %v8661_v21  ;;  %v8664_v23 = vpop.xlane.xlu0 %8663 }
0x14ef   :  { %v8670_v24 = vmul.f32 0.0625, %v8664_v23  ;;  %v10281_v23 = vld [vmem:[%s13075_s5 + $0x24] ss:$0 sm:$0xff] }
0x14f0   :  { %v8673_v25 = vadd.f32 1e-05, %v8669_v22 }
0x14f1   :  { %v8674_v26 = vadd.f32 1e-05, %v8670_v24 }
0x14f2   :  { %11413 = vrsqrt.f32 %v8673_v25 }
0x14f3   :  { %11415 = vrsqrt.f32 %v8674_v26  ;;  %v8667_v28 = vpop.xlane.xlu1 %8666 }
0x14f4   :  { %v8671_v31 = vmul.f32 0.0625, %v8667_v28  ;;  %v10282_v28 = vld [vmem:[%s13075_s5 + $0x25] ss:$0 sm:$0xff] }
0x14f6   :  { %v8675_v32 = vadd.f32 1e-05, %v8671_v31 }
0x14f8   :  { %11417 = vrsqrt.f32 %v8675_v32  ;;  %v10283_v32 = vld [vmem:[%s13075_s5 + $0x26] ss:$0 sm:$0xff] }
0x14fa   :  { %v11412_v33 = vpop.eup %11411 }
0x14fb   :  { %v8680_v36 = vmul.f32 %v11412_v33, %v8648_v58  ;;  %v10269_v58 = vld [vmem:[%s13074_s4 + $0xc0] sm:$0xff] }
0x14fd   :  { %v8708_v39 = vmul.f32 %v10241_v35, %v8680_v36 }
0x14ff   :  { %v11414_v40 = vpop.eup %11413  ;;  %v12860_v5 = vadd.f32 %v10245_v37, %v8708_v39 }
0x1500   :  { %v11416_v44 = vpop.eup %11415  ;;  %v8681_v27 = vmul.f32 %v11414_v40, %v8649_v0 }
0x1501   :  { %v8682_v12 = vmul.f32 %v11416_v44, %v8650_v46  ;;  %11247 = vmatmul.mubr.msk.f32.vlgmr.msra.gmra.mxu0 %vm74_vm0, %v12860_v5  ;;  %v10262_v46 = vld [vmem:[%s13075_s5 + $0x21] ss:$0 sm:$0xff]  ;;  %v10284_v44 = vld [vmem:[%s13075_s5 + $0x27] ss:$0 sm:$0xff] }
0x1502   :  { %11257 = vmatpush3.msra.mxu0 %v10254_v6  ;;  %11260 = vmatprep.mubr.msk.f32.mxu0 %vm11454_vm1, %v11453_v2  ;;  %v8709_v49 = vmul.f32 %v10242_v42, %v8681_v27 }
0x1503   :  { %11258 = vmatprep.subr.mxu0 %v11453_v2  ;;  %v8710_v51 = vmul.f32 %v10243_v45, %v8682_v12 }
0x1504   :  { %11259 = vmatpush3.msra.mxu0 %v10253_v41  ;;  %v12885_v38 = vadd.f32 %v10246_v48, %v8709_v49 }
0x1505   :  { %v11418_v30 = vpop.eup %11417  ;;  %v12890_v52 = vadd.f32 %v10247_v50, %v8710_v51  ;;  %11270 = vmatprep.subr.mxu0 %v11453_v2 }
0x1506   :  { %v8683_v55 = vmul.f32 %v11418_v30, %v8651_v9  ;;  %11254 = vmatmul.mubr.msk.f32.vlgmr.msra.gmra.mxu1 %vm74_vm0, %v12885_v38 }
0x1507   :  { %11261 = vmatmul.mubr.msk.f32.vlgmr.msra.gmra.mxu0 %vm74_vm0, %v12890_v52  ;;  %11264 = vmatpush3.msra.mxu1 %v10256_v29 }
0x1508   :  { %11265 = vmatprep.subr.mxu1 %v11453_v2  ;;  %11267 = vmatprep.mubr.msk.f32.mxu1 %vm11454_vm1, %v11453_v2  ;;  %v8711_v56 = vmul.f32 %v10244_v54, %v8683_v55 }
0x1509   :  { %11266 = vmatpush3.msra.mxu1 %v10255_v11  ;;  %11274 = vmatprep.mubr.msk.f32.mxu0 %vm11454_vm1, %v11453_v2 }
0x150a   :  { %v12911_v57 = vadd.f32 %v10248_v43, %v8711_v56  ;;  %11277 = vmatprep.subr.mxu1 %v11453_v2  ;;  %11271 = vmatpush3.msra.mxu0 %v10270_v47 }
0x150b   :  { %11272 = vmatprep.subr.mxu0 %v11453_v2 }
0x150c   :  { %11268 = vmatmul.mubr.msk.f32.vlgmr.msra.gmra.mxu1 %vm74_vm0, %v12911_v57  ;;  %11273 = vmatpush3.msra.mxu0 %v10269_v58 }
0x150d   :  { %11281 = vmatprep.mubr.msk.f32.mxu1 %vm11454_vm1, %v11453_v2  ;;  %11278 = vmatpush3.msra.mxu1 %v10272_v53 }
0x150e   :  { %11284 = vmatprep.subr.mxu0 %v11453_v2  ;;  %11279 = vmatprep.subr.mxu1 %v11453_v2 }
0x150f   :  { %11280 = vmatpush3.msra.mxu1 %v10271_v60 }
0x1510   :  { %11291 = vmatprep.subr.mxu1 %v11453_v2 }
0x15c1   :  { %v8847_v61 = vpop.f32.mrf.mxu0 }
0x15c2   :  { %v8848_v62 = vadd.f32 %v10261_v34, %v8847_v61 }
0x15c3   :  { %v11248_v63 = vpop.f32.mrf.mxu0 }
0x15c4   :  { %v9070_v0 = vmax.f32 %v8848_v62, 0.0 }
0x15c6   :  { %v8920_v7 = vpop.f32.mrf.mxu1  ;;  %11275 = vmatmul.mubr.msk.f32.vlgmr.msra.gmra.mxu0 %vm74_vm0, %v9070_v0 }
0x15c7   :  { %v8921_v8 = vadd.f32 %v10262_v46, %v8920_v7  ;;  %v8993_v1 = vpop.f32.mrf.mxu0  ;;  %11285 = vmatpush3.msra.mxu0 %v10274_v3  ;;  %11288 = vmatprep.mubr.msk.f32.mxu0 %vm11454_vm1, %v11453_v2  ;;  %v9527_v46 = vld [vmem:[%s13076_s6 + $0x8] sm:$0xff]  ;;  %v9526_v3 = vld [vmem:[%s13076_s6] sm:$0xff]  ;;  %v9528_v7 = vld [vmem:[%s13076_s6 + $0x10] sm:$0xff] }
0x15c8   :  { %v8994_v9 = vadd.f32 %v10263_v4, %v8993_v1  ;;  %v11255_v10 = vpop.f32.mrf.mxu1  ;;  %11286 = vmatprep.subr.mxu0 %v11453_v2  ;;  %v9529_v4 = vld [vmem:[%s13076_s6 + $0x18] sm:$0xff] }
0x15c9   :  { %v9071_v13 = vmax.f32 %v8921_v8, 0.0  ;;  %v11262_v14 = vpop.f32.mrf.mxu0  ;;  %11287 = vmatpush3.msra.mxu0 %v10273_v59 }
0x15ca   :  { %v9072_v16 = vmax.f32 %v8994_v9, 0.0  ;;  %11298 = vmatprep.subr.mxu0 %v11453_v2 }
0x15cb   :  { %11282 = vmatmul.mubr.msk.f32.vlgmr.msra.gmra.mxu1 %vm74_vm0, %v9071_v13 }
0x15cc   :  { %v9066_v19 = vpop.f32.mrf.mxu1  ;;  %11289 = vmatmul.mubr.msk.f32.vlgmr.msra.gmra.mxu0 %vm74_vm0, %v9072_v16  ;;  %11292 = vmatpush3.msra.mxu1 %v10276_v15 }
0x15cd   :  { %v9067_v20 = vadd.f32 %v10264_v17, %v9066_v19  ;;  %11293 = vmatprep.subr.mxu1 %v11453_v2  ;;  %11295 = vmatprep.mubr.msk.f32.mxu1 %vm11454_vm1, %v11453_v2 }
0x15ce   :  { %v11269_v21 = vpop.f32.mrf.mxu1  ;;  %11294 = vmatpush3.msra.mxu1 %v10275_v18  ;;  %11302 = vmatprep.mubr.msk.f32.mxu0 %vm11454_vm1, %v11453_v2 }
0x15cf   :  { %v9073_v22 = vmax.f32 %v9067_v20, 0.0  ;;  %11305 = vmatprep.subr.mxu1 %v11453_v2  ;;  %11299 = vmatpush3.msra.mxu0 %v9527_v46  ;;  %v10297_v21 = vld [vmem:[%s13075_s5 + $0x30] ss:$0 sm:$0xff] }
0x15d0   :  { %11300 = vmatprep.subr.mxu0 %v11453_v2 }
0x15d1   :  { %11296 = vmatmul.mubr.msk.f32.vlgmr.msra.gmra.mxu1 %vm74_vm0, %v9073_v22  ;;  %11301 = vmatpush3.msra.mxu0 %v9526_v3 }
0x15d2   :  { %11309 = vmatprep.mubr.msk.f32.mxu1 %vm11454_vm1, %v11453_v2  ;;  %11312 = vmatprep.subr.mxu0 %v11453_v2 }
0x15d3   :  { %11306 = vmatpush3.msra.mxu1 %v9529_v4 }
0x15d4   :  { %11307 = vmatprep.subr.mxu1 %v11453_v2 }
0x15d5   :  { %11308 = vmatpush3.msra.mxu1 %v9528_v7 }
0x15d6   :  { %11319 = vmatprep.subr.mxu1 %v11453_v2 }
0x1686   :  { %v9181_v24 = vpop.f32.mrf.mxu0 }
0x1687   :  { %v9182_v25 = vadd.f32 %v10281_v23, %v9181_v24  ;;  %v10301_v23 = vld [vmem:[%s13075_s5 + $0x34] ss:$0 sm:$0xff] }
0x1688   :  { %v11276_v26 = vpop.f32.mrf.mxu0 }
0x1689   :  { %v9404_v31 = vadd.f32 %v9182_v25, %v12860_v5  ;;  %v10298_v26 = vld [vmem:[%s13075_s5 + $0x31] ss:$0 sm:$0xff] }
0x168b   :  { %v9254_v33 = vpop.f32.mrf.mxu1  ;;  %v9418_v35 = vsel %vm74_vm0, %v9404_v31, 0.0 }
0x168c   :  { %v9255_v36 = vadd.f32 %v10282_v28, %v9254_v33  ;;  %v9327_v37 = vpop.f32.mrf.mxu0  ;;  %9419 = vadd.xlane.f32.xlu0 %v9418_v35  ;;  %v10299_v35 = vld [vmem:[%s13075_s5 + $0x32] ss:$0 sm:$0xff] }
0x168d   :  { %v9328_v39 = vadd.f32 %v10283_v32, %v9327_v37  ;;  %v11283_v40 = vpop.f32.mrf.mxu1  ;;  %v9530_v37 = vld [vmem:[%s13076_s6 + $0x20] sm:$0xff] }
0x168e   :  { %v11290_v6 = vpop.f32.mrf.mxu0  ;;  %v9405_v42 = vadd.f32 %v9255_v36, %v12885_v38 }
0x168f   :  { %v9406_v5 = vadd.f32 %v9328_v39, %v12890_v52  ;;  %v10302_v39 = vld [vmem:[%s13075_s5 + $0x35] ss:$0 sm:$0xff]  ;;  %v10303_v6 = vld [vmem:[%s13075_s5 + $0x36] ss:$0 sm:$0xff] }
0x1690   :  { %v9421_v27 = vsel %vm74_vm0, %v9405_v42, 0.0 }
0x1691   :  { %v9400_v45 = vpop.f32.mrf.mxu1  ;;  %9422 = vadd.xlane.f32.xlu1 %v9421_v27  ;;  %v9424_v12 = vsel %vm74_vm0, %v9406_v5, 0.0 }
0x1692   :  { %v9401_v41 = vadd.f32 %v10284_v44, %v9400_v45  ;;  %9425 = vadd.xlane.f32.xlu0 %v9424_v12  ;;  %v10300_v45 = vld [vmem:[%s13075_s5 + $0x33] ss:$0 sm:$0xff] }
0x1693   :  { %v11297_v48 = vpop.f32.mrf.mxu1 }
0x1694   :  { %v9407_v49 = vadd.f32 %v9401_v41, %v12911_v57  ;;  %v9532_v48 = vld [vmem:[%s13076_s6 + $0x30] sm:$0xff] }
0x1696   :  { %v9427_v50 = vsel %vm74_vm0, %v9407_v49, 0.0 }
0x1697   :  { %9428 = vadd.xlane.f32.xlu1 %v9427_v50 }
0x1715   :  { %v9420_v51 = vpop.xlane.xlu0 %9419 }
0x1716   :  { %v9430_v38 = vmul.f32 0.0625, %v9420_v51 }
0x1718   :  { %v9434_v29 = vsub.f32 %v9404_v31, %v9430_v38  ;;  %v9531_v31 = vld [vmem:[%s13076_s6 + $0x28] sm:$0xff]  ;;  %v10305_v38 = vld [vmem:[%s13077_s7] ss:$0 sm:$0xff] }
0x171a   :  { %v9423_v30 = vpop.xlane.xlu1 %9422  ;;  %v9438_v54 = vmul.f32 %v9434_v29, %v9434_v29 }
0x171b   :  { %v9431_v52 = vmul.f32 0.0625, %v9423_v30  ;;  %v9426_v55 = vpop.xlane.xlu0 %9425 }
0x171c   :  { %v9432_v11 = vmul.f32 0.0625, %v9426_v55  ;;  %v9442_v43 = vsel %vm74_vm0, %v9438_v54, 0.0 }
0x171d   :  { %v9435_v56 = vsub.f32 %v9405_v42, %v9431_v52  ;;  %9443 = vadd.xlane.f32.xlu0 %v9442_v43 }
0x171e   :  { %v9436_v47 = vsub.f32 %v9406_v5, %v9432_v11  ;;  %v9533_v5 = vld [vmem:[%s13076_s6 + $0x38] sm:$0xff] }
0x171f   :  { %v9439_v58 = vmul.f32 %v9435_v56, %v9435_v56 }
0x1720   :  { %v9429_v53 = vpop.xlane.xlu1 %9428  ;;  %v9440_v60 = vmul.f32 %v9436_v47, %v9436_v47 }
0x1721   :  { %v9433_v57 = vmul.f32 0.0625, %v9429_v53  ;;  %v9445_v34 = vsel %vm74_vm0, %v9439_v58, 0.0 }
0x1722   :  { %9446 = vadd.xlane.f32.xlu1 %v9445_v34  ;;  %v9448_v61 = vsel %vm74_vm0, %v9440_v60, 0.0 }
0x1723   :  { %v9437_v62 = vsub.f32 %v9407_v49, %v9433_v57  ;;  %9449 = vadd.xlane.f32.xlu0 %v9448_v61  ;;  %v10304_v49 = vld [vmem:[%s13075_s5 + $0x37] ss:$0 sm:$0xff]  ;;  %s11455_s5 = smov [#allocation2]  }
0x1724   :  { %s9842_s6 = sshll.u32 %s11455_s5, 4  ;;  %s9843_s6 = int_to_ptr.vmem [resolvable:$true] %s9842_s6 }
0x1725   :  { %v9441_v63 = vmul.f32 %v9437_v62, %v9437_v62  ;;  %s11431_s7 = scalar_lea.vmem %s9843_s6, 512  ;;  %p11436_p1 = scmp.lt.s32.totalorder %s9843_s6, %s9843_s6 }
0x1726   :  { %p11432_p0 = scmp.ne.s32.totalorder %s9843_s6, %s11431_s7  ;;  %p11437_p2 = scmp.lt.s32.totalorder %s11431_s7, %s11431_s7 }
0x1727   :  { %v9451_v0 = vsel %vm74_vm0, %v9441_v63, 0.0 }
0x1728   :  { %9452 = vadd.xlane.f32.xlu1 %v9451_v0  ;;  %p11438_p3 = por %p11437_p2, %p11436_p1 }
0x172a   :  { %p11439_p4 = pnand %p11438_p3, %p11432_p0 }
0x17a6   :  { %v9444_v59 = vpop.xlane.xlu0 %9443 }
0x17a7   :  { %v9454_v8 = vmul.f32 0.0625, %v9444_v59 }
0x17a9   :  { %v9458_v1 = vadd.f32 1e-05, %v9454_v8 }
0x17ab   :  { %11419 = vrsqrt.f32 %v9458_v1  ;;  %v9447_v9 = vpop.xlane.xlu1 %9446 }
0x17ac   :  { %v9455_v10 = vmul.f32 0.0625, %v9447_v9  ;;  %v9450_v13 = vpop.xlane.xlu0 %9449 }
0x17ad   :  { %v9456_v14 = vmul.f32 0.0625, %v9450_v13 }
0x17ae   :  { %v9459_v15 = vadd.f32 1e-05, %v9455_v10 }
0x17af   :  { %v9460_v16 = vadd.f32 1e-05, %v9456_v14 }
0x17b0   :  { %11421 = vrsqrt.f32 %v9459_v15 }
0x17b1   :  { %11423 = vrsqrt.f32 %v9460_v16  ;;  %v9453_v17 = vpop.xlane.xlu1 %9452 }
0x17b2   :  { %v9457_v18 = vmul.f32 0.0625, %v9453_v17 }
0x17b4   :  { %v9461_v19 = vadd.f32 1e-05, %v9457_v18 }
0x17b6   :  { %11425 = vrsqrt.f32 %v9461_v19 }
0x17b8   :  { %v11420_v20 = vpop.eup %11419 }
0x17b9   :  { %v9466_v22 = vmul.f32 %v11420_v20, %v9434_v29 }
0x17bb   :  { %v9494_v24 = vmul.f32 %v10297_v21, %v9466_v22 }
0x17bd   :  { %v11422_v25 = vpop.eup %11421  ;;  %v9522_v28 = vadd.f32 %v10301_v23, %v9494_v24 }
0x17be   :  { %v11424_v32 = vpop.eup %11423  ;;  %v9467_v33 = vmul.f32 %v11422_v25, %v9435_v56 }
0x17bf   :  { %v9468_v36 = vmul.f32 %v11424_v32, %v9436_v47  ;;  %11303 = vmatmul.mubr.msk.f32.vlgmr.msra.gmra.mxu0 %vm74_vm0, %v9522_v28 }
0x17c0   :  { %v9495_v40 = vmul.f32 %v10298_v26, %v9467_v33  ;;  %11313 = vmatpush3.msra.mxu0 %v9531_v31  ;;  %11316 = vmatprep.mubr.msk.f32.mxu0 %vm11454_vm1, %v11453_v2 }
0x17c1   :  { %v9496_v42 = vmul.f32 %v10299_v35, %v9468_v36  ;;  %11314 = vmatprep.subr.mxu0 %v11453_v2 }
0x17c2   :  { %11315 = vmatpush3.msra.mxu0 %v9530_v37  ;;  %v9523_v44 = vadd.f32 %v10302_v39, %v9495_v40 }
0x17c3   :  { %v11426_v27 = vpop.eup %11425  ;;  %v9524_v12 = vadd.f32 %v10303_v6, %v9496_v42 }
0x17c4   :  { %v9469_v41 = vmul.f32 %v11426_v27, %v9437_v62  ;;  %11310 = vmatmul.mubr.msk.f32.vlgmr.msra.gmra.mxu1 %vm74_vm0, %v9523_v44 }
0x17c5   :  { %11317 = vmatmul.mubr.msk.f32.vlgmr.msra.gmra.mxu0 %vm74_vm0, %v9524_v12  ;;  %11320 = vmatpush3.msra.mxu1 %v9533_v5 }
0x17c6   :  { %v9497_v50 = vmul.f32 %v10300_v45, %v9469_v41  ;;  %11321 = vmatprep.subr.mxu1 %v11453_v2  ;;  %11323 = vmatprep.mubr.msk.f32.mxu1 %vm11454_vm1, %v11453_v2 }
0x17c7   :  { %11322 = vmatpush3.msra.mxu1 %v9532_v48 }
0x17c8   :  { %v9525_v51 = vadd.f32 %v10304_v49, %v9497_v50 }
0x17ca   :  { %11324 = vmatmul.mubr.msk.f32.vlgmr.msra.gmra.mxu1 %vm74_vm0, %v9525_v51 }
0x187f   :  { %v9610_v29 = vpop.f32.mrf.mxu0 }
0x1880   :  { %v9611_v30 = vadd.f32 %v10305_v38, %v9610_v29 }
0x1881   :  { %v11304_v54 = vpop.f32.mrf.mxu0 }
0x1882   :  { %9833 = vst.msk [vmem:[#allocation2] sm:$0xff] %vm1003_vm2, %v9611_v30 }
0x1884   :  { %v9683_v52 = vpop.f32.mrf.mxu1 }
0x1885   :  { %v9684_v55 = vadd.f32 %v10305_v38, %v9683_v52  ;;  %v9756_v11 = vpop.f32.mrf.mxu0 }
0x1886   :  { %v9757_v43 = vadd.f32 %v10305_v38, %v9756_v11  ;;  %v11311_v56 = vpop.f32.mrf.mxu1 }
0x1887   :  { %9834 = vst.msk [vmem:[#allocation2 + $0x8] sm:$0xff] %vm1003_vm2, %v9684_v55  ;;  %v11318_v2 = vpop.f32.mrf.mxu0 }
0x1888   :  { %9835 = vst.msk [vmem:[#allocation2 + $0x10] sm:$0xff] %vm1003_vm2, %v9757_v43 }
0x188a   :  { %v9829_v47 = vpop.f32.mrf.mxu1 }
0x188b   :  { %v9830_v58 = vadd.f32 %v10305_v38, %v9829_v47 }
0x188c   :  { %v11325_v53 = vpop.f32.mrf.mxu1 }
0x188d   :  { %9836 = vst.msk [vmem:[#allocation2 + $0x18] sm:$0xff] %vm1003_vm2, %v9830_v58 }
0x188e   :  { %11442 = shalt.err (!%p11439_p4)
}
0x188f   :  { %s11456_s3 = smov 128   ;;  %s11457_s19 = smov 8  }
0x1890   :  { %9848 = dma.vmem_to_hbm [thread:$0]  %s9843_s6, 512, %s13078_s8, [#allocation3], %s11456_s3, %s11456_s3, %s11457_s19  }
0x1891   :  { %11451 = dma.done.wait [#allocation3], 512  }
0x1892   :  { %11452 = vsyncadd [#allocation3], 4294966784 }
0x1893   :  { %9852 = vsyncpa [#allocation3], 1 }

</bundles_post_ra>
